<compile_context>
chip_gen: v7x
topology: tpu7x:2x2x1
jax: 0.10.0
libtpu: 0.0.40
codegen_flags: <defaults>
</compile_context>

<pallas_src>
import functools

import jax
import jax.numpy as jnp
from jax.experimental import pallas as pl
from jax.experimental.pallas import tpu as pltpu

LANE = 128      # vreg lane width: pad every feature dim to a multiple of this
SUBLANE = 8     # vreg sublane width

_FIXED2 = lambda t: (0, 0)          # "same 2-D block every grid step"


def _round_up(v, m):
    return ((v + m - 1) // m) * m


def _pad2d(a, rows, cols, value=0.0):
    r, c = a.shape
    return jnp.pad(a, ((0, rows - r), (0, cols - c)), constant_values=value)


def _pad_row(v, cols, value=0.0):
    return jnp.pad(v.reshape(1, -1), ((0, 0), (0, cols - v.shape[0])),
                   constant_values=value)


# ----------------------------------------------------------------------------
# Kernel 1: fully fused GINE layer.
#   per edge tile t (reduction axis, "arbitrary"):
#     et    = relu(relu(e_t @ W0 + b0) @ W1 + b1)
#     m     = relu( (src_oh_t @ x) + et )
#     neigh += dst_oh_t^T_t @ m                      (VMEM f32 accumulator)
#   at the last tile:
#     rst   = (1 + eps) * x + neigh
#     out   = apply_func MLP(rst)   (Linear+ReLU [+Linear+ReLU] + folded BN)
# ----------------------------------------------------------------------------
def _gine_layer_kernel(n_mlp, eps_ref, e_ref, src_ref, dstT_ref, x_ref,
                       et0_w_ref, et0_b_ref, et1_w_ref, et1_b_ref, *refs):
    mlp_refs = refs[:4 * n_mlp]
    o_ref = refs[4 * n_mlp]
    neigh_ref = refs[4 * n_mlp + 1]

    t = pl.program_id(0)

    @pl.when(t == 0)
    def _():
        neigh_ref[...] = jnp.zeros_like(neigh_ref)

    # edge feature MLP (per edge tile), f32 on the VPU (v5e-safe elementwise)
    et = jnp.dot(e_ref[...], et0_w_ref[...], preferred_element_type=jnp.float32)
    et = jnp.maximum(et + et0_b_ref[...], 0.0)
    et = jnp.dot(et, et1_w_ref[...], preferred_element_type=jnp.float32)
    et = jnp.maximum(et + et1_b_ref[...], 0.0)

    # gather x[src] for this edge tile: bf16 one-hot MXU matmul, f32 accumulate
    xs = jnp.dot(src_ref[...], x_ref[...].astype(jnp.bfloat16),
                 preferred_element_type=jnp.float32)
    m = jnp.maximum(xs + et, 0.0)                         # message  (TE, Din)

    # scatter-sum messages by destination into the per-node accumulator
    neigh_ref[...] += jnp.dot(dstT_ref[...], m.astype(jnp.bfloat16),
                              preferred_element_type=jnp.float32)

    @pl.when(t == pl.num_programs(0) - 1)
    def _():
        # rst = (1 + eps) * feat_dst + neigh   (eps scalar lives in SMEM)
        h = eps_ref[0, 0] * x_ref[...] + neigh_ref[...]
        for i in range(n_mlp):
            w_ref, b_ref, sc_ref, sh_ref = mlp_refs[4 * i: 4 * i + 4]
            h = jnp.dot(h, w_ref[...], preferred_element_type=jnp.float32)
            h = jnp.maximum(h + b_ref[...], 0.0)          # Linear + ReLU
            h = h * sc_ref[...] + sh_ref[...]             # folded eval BatchNorm
        o_ref[...] = h.astype(o_ref.dtype)


def gine_layer(one_plus_eps, e_p, src_oh, dst_oh_t, x_p,
               et0_w, et0_b, et1_w, et1_b, mlp, *, edge_tile):
    N_p, Din_p = x_p.shape
    E_p, ED_p = e_p.shape
    Dout_p = mlp[-1][0].shape[1]
    n_mlp = len(mlp)
    n_tiles = E_p // edge_tile

    mlp_args, mlp_specs = [], []
    for step in mlp:
        for a in step:
            mlp_args.append(a)
            mlp_specs.append(pl.BlockSpec(a.shape, _FIXED2))

    in_specs = [
        pl.BlockSpec(memory_space=pltpu.MemorySpace.SMEM),       # 1 + eps scalar
        pl.BlockSpec((edge_tile, ED_p), lambda t: (t, 0)),       # edge features
        pl.BlockSpec((edge_tile, N_p), lambda t: (t, 0)),        # src one-hot (bf16)
        pl.BlockSpec((N_p, edge_tile), lambda t: (0, t)),        # dst one-hot^T (bf16)
        pl.BlockSpec((N_p, Din_p), _FIXED2),                     # node features (resident)
        pl.BlockSpec(et0_w.shape, _FIXED2),
        pl.BlockSpec(et0_b.shape, _FIXED2),
        pl.BlockSpec(et1_w.shape, _FIXED2),
        pl.BlockSpec(et1_b.shape, _FIXED2),
    ] + mlp_specs

    flops = (2 * E_p * ED_p * ED_p + 2 * E_p * ED_p * Din_p
             + 4 * E_p * N_p * Din_p)
    for (w, _, _, _) in mlp:
        flops += 2 * N_p * w.shape[0] * w.shape[1]
    bytes_accessed = int(sum(a.size * a.dtype.itemsize for a in
                             (e_p, src_oh, dst_oh_t, x_p, et0_w, et1_w, *mlp_args))
                         + N_p * Dout_p * 4)

    return pl.pallas_call(
        functools.partial(_gine_layer_kernel, n_mlp),
        out_shape=jax.ShapeDtypeStruct((N_p, Dout_p), jnp.float32),
        grid=(n_tiles,),
        in_specs=in_specs,
        out_specs=pl.BlockSpec((N_p, Dout_p), _FIXED2),
        scratch_shapes=[pltpu.VMEM((N_p, Din_p), jnp.float32)],   # neigh accumulator
        compiler_params=pltpu.CompilerParams(
            dimension_semantics=("arbitrary",),        # edge axis is a reduction
            vmem_limit_bytes=48 * 1024 * 1024),        # v7x-safe (< 64 MiB physical)
        cost_estimate=pl.CostEstimate(flops=int(flops), transcendentals=0,
                                      bytes_accessed=bytes_accessed),
    )(one_plus_eps, e_p, src_oh, dst_oh_t, x_p,
      et0_w, et0_b, et1_w, et1_b, *mlp_args)


# ----------------------------------------------------------------------------
# Kernel 2: fused PPI pair head, tiled over pairs.
#   h  = relu(x @ lin_w + lin_b)     (computed once at t==0, kept in VMEM)
#   x1 = h[ppi[:,0]], x2 = h[ppi[:,1]]   (bf16 one-hot gathers)
#   out = (x1 * x2) @ fc_w + fc_b
# ----------------------------------------------------------------------------
def _head_kernel(x_ref, lin_w_ref, lin_b_ref, p1_ref, p2_ref,
                 fc_w_ref, fc_b_ref, o_ref, h_ref):
    @pl.when(pl.program_id(0) == 0)
    def _():
        h = jnp.dot(x_ref[...], lin_w_ref[...], preferred_element_type=jnp.float32)
        h = jnp.maximum(h + lin_b_ref[...], 0.0)
        # F.dropout(p=0.5) is the identity in eval mode.
        h_ref[...] = h.astype(jnp.bfloat16)

    hb = h_ref[...]
    x1 = jnp.dot(p1_ref[...], hb, preferred_element_type=jnp.float32)   # x[ppi[:,0]]
    x2 = jnp.dot(p2_ref[...], hb, preferred_element_type=jnp.float32)   # x[ppi[:,1]]
    out = jnp.dot(x1 * x2, fc_w_ref[...], preferred_element_type=jnp.float32)
    o_ref[...] = (out + fc_b_ref[...]).astype(o_ref.dtype)


def gine_head(x_p, lin_w, lin_b, p1_oh, p2_oh, fc_w, fc_b, *, pair_tile):
    N_p, H_p = x_p.shape
    P_p = p1_oh.shape[0]
    O_p = fc_w.shape[1]
    n_tiles = P_p // pair_tile

    in_specs = [
        pl.BlockSpec((N_p, H_p), _FIXED2),
        pl.BlockSpec(lin_w.shape, _FIXED2),
        pl.BlockSpec(lin_b.shape, _FIXED2),
        pl.BlockSpec((pair_tile, N_p), lambda t: (t, 0)),
        pl.BlockSpec((pair_tile, N_p), lambda t: (t, 0)),
        pl.BlockSpec(fc_w.shape, _FIXED2),
        pl.BlockSpec(fc_b.shape, _FIXED2),
    ]
    flops = 2 * N_p * H_p * H_p + 4 * P_p * N_p * H_p + 2 * P_p * H_p * O_p
    bytes_accessed = int(sum(a.size * a.dtype.itemsize for a in
                             (x_p, lin_w, p1_oh, p2_oh, fc_w)) + P_p * O_p * 4)

    return pl.pallas_call(
        _head_kernel,
        out_shape=jax.ShapeDtypeStruct((P_p, O_p), jnp.float32),
        grid=(n_tiles,),
        in_specs=in_specs,
        out_specs=pl.BlockSpec((pair_tile, O_p), lambda t: (t, 0)),
        scratch_shapes=[pltpu.VMEM((N_p, H_p), jnp.bfloat16)],    # cached relu(linear(x))
        compiler_params=pltpu.CompilerParams(
            dimension_semantics=("arbitrary",),        # scratch carries across tiles
            vmem_limit_bytes=48 * 1024 * 1024),
        cost_estimate=pl.CostEstimate(flops=int(flops), transcendentals=0,
                                      bytes_accessed=bytes_accessed),
    )(x_p, lin_w, lin_b, p1_oh, p2_oh, fc_w, fc_b)


# ----------------------------------------------------------------------------
# Parameter construction (deterministic, PyTorch-Linear-style uniform init),
# already zero-padded to 128-lane feature dims (padded columns stay exactly 0).
# ----------------------------------------------------------------------------
def _init_linear(key, in_dim, out_dim):
    k1, k2 = jax.random.split(key)
    bound = 1.0 / jnp.sqrt(jnp.float32(in_dim))
    w = jax.random.uniform(k1, (in_dim, out_dim), jnp.float32, -bound, bound)
    b = jax.random.uniform(k2, (out_dim,), jnp.float32, -bound, bound)
    return w, b


def _init_bn(key, dim, bn_eps=1e-5):
    # Eval-mode BatchNorm1d folded to per-channel scale/shift from running stats.
    k1, k2 = jax.random.split(key)
    gamma = jax.random.uniform(k1, (dim,), jnp.float32, 0.5, 1.5)
    beta = jax.random.normal(k2, (dim,), jnp.float32) * 0.1
    running_mean = jnp.zeros((dim,), jnp.float32)
    running_var = jnp.ones((dim,), jnp.float32)
    scale = gamma / jnp.sqrt(running_var + bn_eps)
    shift = beta - running_mean * scale
    return scale, shift


def init_gine_params(key, num_layers, prot_hidden, ppi_hidden, edge_dim, out_dim):
    ED, H, O, D0 = edge_dim, ppi_hidden, out_dim, prot_hidden * 2
    ED_p, H_p, O_p, D0_p = (_round_up(d, LANE) for d in (ED, H, O, D0))
    params = {"layers": [], "dims": dict(ED_p=ED_p, H_p=H_p, O_p=O_p, D0_p=D0_p)}

    for l in range(num_layers):
        key, k0, k1, k2, k3, k4 = jax.random.split(key, 6)
        in_ch, in_ch_p = (D0, D0_p) if l == 0 else (H, H_p)
        lp = {"one_plus_eps": jnp.ones((1, 1), jnp.float32)}   # learn_eps, init_eps = 0
        w, b = _init_linear(k0, ED, ED)
        lp["et0_w"], lp["et0_b"] = _pad2d(w, ED_p, ED_p), _pad_row(b, ED_p)
        w, b = _init_linear(k1, ED, in_ch)
        lp["et1_w"], lp["et1_b"] = _pad2d(w, ED_p, in_ch_p), _pad_row(b, in_ch_p)
        mlp = []
        if l == 0:                                   # Linear(D0,H) + ReLU  (no BN)
            w, b = _init_linear(k2, D0, H)
            mlp.append((_pad2d(w, D0_p, H_p), _pad_row(b, H_p),
                        jnp.ones((1, H_p), jnp.float32),
                        jnp.zeros((1, H_p), jnp.float32)))
        w, b = _init_linear(k3, H, H)                # Linear(H,H) + ReLU + BN(H)
        scale, shift = _init_bn(k4, H)
        mlp.append((_pad2d(w, H_p, H_p), _pad_row(b, H_p),
                    _pad_row(scale, H_p, value=1.0), _pad_row(shift, H_p)))
        lp["mlp"] = mlp
        params["layers"].append(lp)

    key, k5, k6 = jax.random.split(key, 3)
    w, b = _init_linear(k5, H, H)
    params["lin_w"], params["lin_b"] = _pad2d(w, H_p, H_p), _pad_row(b, H_p)
    w, b = _init_linear(k6, H, O)
    params["fc_w"], params["fc_b"] = _pad2d(w, H_p, O_p), _pad_row(b, O_p)
    return params


# ----------------------------------------------------------------------------
# Full forward pass: one fused Pallas kernel per layer + one fused head kernel.
# ----------------------------------------------------------------------------
def gine_forward(params, graph, x, e):
    dims = params["dims"]
    x_p = _pad2d(x, graph["N_p"], dims["D0_p"])
    e_p = _pad2d(e, graph["E_p"], dims["ED_p"])
    for lp in params["layers"]:
        x_p = gine_layer(lp["one_plus_eps"], e_p, graph["src_oh"], graph["dst_oh_t"],
                         x_p, lp["et0_w"], lp["et0_b"], lp["et1_w"], lp["et1_b"],
                         lp["mlp"], edge_tile=graph["edge_tile"])
    out_p = gine_head(x_p, params["lin_w"], params["lin_b"],
                      graph["p1_oh"], graph["p2_oh"],
                      params["fc_w"], params["fc_b"],
                      pair_tile=graph["pair_tile"])
    return out_p[:graph["n_pairs"], :graph["out_dim"]]


# ----------------------------------------------------------------------------
if __name__ == "__main__":
    key = jax.random.PRNGKey(0)

    N_NODES, N_EDGES, N_PAIRS = 16, 32, 8
    PROT_HIDDEN, PPI_HIDDEN, EDGE_DIM, OUT_DIM = 16, 32, 8, 4
    NUM_LAYERS = 2

    key, kx, ke, ks, kd, kp = jax.random.split(key, 6)
    x = jax.random.normal(kx, (N_NODES, PROT_HIDDEN * 2), jnp.float32)
    e = jax.random.normal(ke, (N_EDGES, EDGE_DIM), jnp.float32)
    src = jax.random.randint(ks, (N_EDGES,), 0, N_NODES)
    dst = jax.random.randint(kd, (N_EDGES,), 0, N_NODES)
    ppi = jax.random.randint(kp, (N_PAIRS, 2), 0, N_NODES)

    # padded graph structure (bf16 one-hot incidence matrices; 0/1 exact in bf16)
    N_p = _round_up(N_NODES, LANE)
    edge_tile = min(512, _round_up(N_EDGES, LANE))
    E_p = _round_up(N_EDGES, edge_tile)
    pair_tile = min(256, _round_up(N_PAIRS, SUBLANE))
    P_p = _round_up(N_PAIRS, pair_tile)

    graph = dict(
        N_p=N_p, E_p=E_p, edge_tile=edge_tile, pair_tile=pair_tile,
        n_pairs=N_PAIRS, out_dim=OUT_DIM,
        src_oh=_pad2d(jax.nn.one_hot(src, N_NODES, dtype=jnp.bfloat16), E_p, N_p),
        dst_oh_t=_pad2d(jax.nn.one_hot(dst, N_NODES, dtype=jnp.bfloat16).T, N_p, E_p),
        p1_oh=_pad2d(jax.nn.one_hot(ppi[:, 0], N_NODES, dtype=jnp.bfloat16), P_p, N_p),
        p2_oh=_pad2d(jax.nn.one_hot(ppi[:, 1], N_NODES, dtype=jnp.bfloat16), P_p, N_p),
    )

    key, kparams = jax.random.split(key)
    params = init_gine_params(kparams, NUM_LAYERS, PROT_HIDDEN, PPI_HIDDEN,
                              EDGE_DIM, OUT_DIM)

    fwd = jax.jit(functools.partial(gine_forward, params, graph))
    out = fwd(x, e)
    jax.block_until_ready(out)
    assert out.shape == (N_PAIRS, OUT_DIM)
    print("KERNEL_OK")
</pallas_src>

<mosaic_0001>
module attributes {stable_mosaic.version = 11 : i64} {
  func.func @_head_kernel(%arg0: i32, %arg1: memref<128x128xf32, #tpu.memory_space<vmem>>, %arg2: memref<128x128xf32, #tpu.memory_space<vmem>>, %arg3: memref<1x128xf32, #tpu.memory_space<vmem>>, %arg4: memref<8x128xbf16, #tpu.memory_space<vmem>>, %arg5: memref<8x128xbf16, #tpu.memory_space<vmem>>, %arg6: memref<128x128xf32, #tpu.memory_space<vmem>>, %arg7: memref<1x128xf32, #tpu.memory_space<vmem>>, %arg8: memref<8x128xf32, #tpu.memory_space<vmem>>, %arg9: memref<128x128xbf16, #tpu.memory_space<vmem>>) attributes {dimension_semantics = [#tpu.dimension_semantics<arbitrary>], iteration_bounds = array<i64: 1>, scalar_prefetch = 0 : i64, scratch_operands = 1 : i64, tpu.core_type = #tpu.core_type<tc>, window_params = [{pipeline_mode = #tpu.pipeline_mode<synchronous>, transform_indices = @transform_0, window_bounds = array<i64: 128, 128>}, {pipeline_mode = #tpu.pipeline_mode<synchronous>, transform_indices = @transform_1, window_bounds = array<i64: 128, 128>}, {pipeline_mode = #tpu.pipeline_mode<synchronous>, transform_indices = @transform_2, window_bounds = array<i64: 1, 128>}, {transform_indices = @transform_3, window_bounds = array<i64: 8, 128>}, {transform_indices = @transform_4, window_bounds = array<i64: 8, 128>}, {pipeline_mode = #tpu.pipeline_mode<synchronous>, transform_indices = @transform_5, window_bounds = array<i64: 128, 128>}, {pipeline_mode = #tpu.pipeline_mode<synchronous>, transform_indices = @transform_6, window_bounds = array<i64: 1, 128>}, {transform_indices = @transform_7, window_bounds = array<i64: 8, 128>}]} {
    %c0_i32 = arith.constant 0 : i32
    %0 = arith.cmpi eq, %arg0, %c0_i32 : i32
    %1 = arith.extui %0 : i1 to i32
    %c0_i32_0 = arith.constant 0 : i32
    %2 = arith.cmpi ne, %1, %c0_i32_0 : i32
    scf.if %2 {
      %c0_14 = arith.constant 0 : index
      %c0_15 = arith.constant 0 : index
      %15 = vector.load %arg1[%c0_14, %c0_15] : memref<128x128xf32, #tpu.memory_space<vmem>>, vector<128x128xf32>
      %c0_16 = arith.constant 0 : index
      %c0_17 = arith.constant 0 : index
      %16 = vector.load %arg2[%c0_16, %c0_17] : memref<128x128xf32, #tpu.memory_space<vmem>>, vector<128x128xf32>
      %cst_18 = arith.constant dense<0.000000e+00> : vector<128x128xf32>
      %17 = tpu.matmul %15, %16, %cst_18 {dimension_numbers = #tpu.dot_dimension_numbers<[1], [0], [0], [1], [0, 0, 1, 1], [], []>} : vector<128x128xf32>, vector<128x128xf32>, vector<128x128xf32> -> vector<128x128xf32>
      %c0_19 = arith.constant 0 : index
      %c0_20 = arith.constant 0 : index
      %18 = vector.load %arg3[%c0_19, %c0_20] : memref<1x128xf32, #tpu.memory_space<vmem>>, vector<1x128xf32>
      %19 = vector.broadcast %18 : vector<1x128xf32> to vector<128x128xf32>
      %20 = arith.addf %17, %19 : vector<128x128xf32>
      %cst_21 = arith.constant 0.000000e+00 : f32
      %21 = vector.broadcast %cst_21 : f32 to vector<128x128xf32>
      %22 = arith.maximumf %20, %21 : vector<128x128xf32>
      %23 = arith.truncf %22 : vector<128x128xf32> to vector<128x128xbf16>
      %c0_22 = arith.constant 0 : index
      %c0_23 = arith.constant 0 : index
      %24 = vector.load %arg9[%c0_22, %c0_23] : memref<128x128xbf16, #tpu.memory_space<vmem>>, vector<128x128xbf16>
      tpu.vector_store %arg9[%c0_22, %c0_23], %23 {strides = array<i32>} : memref<128x128xbf16, #tpu.memory_space<vmem>>, vector<128x128xbf16>,
    } else {
    }
    %c0 = arith.constant 0 : index
    %c0_1 = arith.constant 0 : index
    %3 = vector.load %arg9[%c0, %c0_1] : memref<128x128xbf16, #tpu.memory_space<vmem>>, vector<128x128xbf16>
    %c0_2 = arith.constant 0 : index
    %c0_3 = arith.constant 0 : index
    %4 = vector.load %arg4[%c0_2, %c0_3] : memref<8x128xbf16, #tpu.memory_space<vmem>>, vector<8x128xbf16>
    %cst = arith.constant dense<0.000000e+00> : vector<8x128xf32>
    %5 = tpu.matmul %4, %3, %cst {dimension_numbers = #tpu.dot_dimension_numbers<[1], [0], [0], [1], [0, 0, 1, 1], [], []>} : vector<8x128xbf16>, vector<128x128xbf16>, vector<8x128xf32> -> vector<8x128xf32>
    %c0_4 = arith.constant 0 : index
    %c0_5 = arith.constant 0 : index
    %6 = vector.load %arg5[%c0_4, %c0_5] : memref<8x128xbf16, #tpu.memory_space<vmem>>, vector<8x128xbf16>
    %cst_6 = arith.constant dense<0.000000e+00> : vector<8x128xf32>
    %7 = tpu.matmul %6, %3, %cst_6 {dimension_numbers = #tpu.dot_dimension_numbers<[1], [0], [0], [1], [0, 0, 1, 1], [], []>} : vector<8x128xbf16>, vector<128x128xbf16>, vector<8x128xf32> -> vector<8x128xf32>
    %8 = arith.mulf %5, %7 : vector<8x128xf32>
    %c0_7 = arith.constant 0 : index
    %c0_8 = arith.constant 0 : index
    %9 = vector.load %arg6[%c0_7, %c0_8] : memref<128x128xf32, #tpu.memory_space<vmem>>, vector<128x128xf32>
    %cst_9 = arith.constant dense<0.000000e+00> : vector<8x128xf32>
    %10 = tpu.matmul %8, %9, %cst_9 {dimension_numbers = #tpu.dot_dimension_numbers<[1], [0], [0], [1], [0, 0, 1, 1], [], []>} : vector<8x128xf32>, vector<128x128xf32>, vector<8x128xf32> -> vector<8x128xf32>
    %c0_10 = arith.constant 0 : index
    %c0_11 = arith.constant 0 : index
    %11 = vector.load %arg7[%c0_10, %c0_11] : memref<1x128xf32, #tpu.memory_space<vmem>>, vector<1x128xf32>
    %12 = vector.broadcast %11 : vector<1x128xf32> to vector<8x128xf32>
    %13 = arith.addf %10, %12 : vector<8x128xf32>
    %c0_12 = arith.constant 0 : index
    %c0_13 = arith.constant 0 : index
    %14 = vector.load %arg8[%c0_12, %c0_13] : memref<8x128xf32, #tpu.memory_space<vmem>>, vector<8x128xf32>
    tpu.vector_store %arg8[%c0_12, %c0_13], %13 {strides = array<i32>} : memref<8x128xf32, #tpu.memory_space<vmem>>, vector<8x128xf32>,
    return
  }
  func.func @transform_0(%arg0: i32) -> (i32, i32) {
    %c0_i32 = arith.constant 0 : i32
    %c0_i32_0 = arith.constant 0 : i32
    %c0_i32_1 = arith.constant 0 : i32
    return %c0_i32, %c0_i32_0 : i32, i32
  }
  func.func @transform_1(%arg0: i32) -> (i32, i32) {
    %c0_i32 = arith.constant 0 : i32
    %c0_i32_0 = arith.constant 0 : i32
    %c0_i32_1 = arith.constant 0 : i32
    return %c0_i32, %c0_i32_0 : i32, i32
  }
  func.func @transform_2(%arg0: i32) -> (i32, i32) {
    %c0_i32 = arith.constant 0 : i32
    %c0_i32_0 = arith.constant 0 : i32
    %c0_i32_1 = arith.constant 0 : i32
    return %c0_i32, %c0_i32_0 : i32, i32
  }
  func.func @transform_3(%arg0: i32) -> (i32, i32) {
    %c0_i32 = arith.constant 0 : i32
    %c0_i32_0 = arith.constant 0 : i32
    return %arg0, %c0_i32 : i32, i32
  }
  func.func @transform_4(%arg0: i32) -> (i32, i32) {
    %c0_i32 = arith.constant 0 : i32
    %c0_i32_0 = arith.constant 0 : i32
    return %arg0, %c0_i32 : i32, i32
  }
  func.func @transform_5(%arg0: i32) -> (i32, i32) {
    %c0_i32 = arith.constant 0 : i32
    %c0_i32_0 = arith.constant 0 : i32
    %c0_i32_1 = arith.constant 0 : i32
    return %c0_i32, %c0_i32_0 : i32, i32
  }
  func.func @transform_6(%arg0: i32) -> (i32, i32) {
    %c0_i32 = arith.constant 0 : i32
    %c0_i32_0 = arith.constant 0 : i32
    %c0_i32_1 = arith.constant 0 : i32
    return %c0_i32, %c0_i32_0 : i32, i32
  }
  func.func @transform_7(%arg0: i32) -> (i32, i32) {
    %c0_i32 = arith.constant 0 : i32
    %c0_i32_0 = arith.constant 0 : i32
    return %arg0, %c0_i32 : i32, i32
  }
}

module attributes {stable_mosaic.version = 11 : i64} {
  func.func @_gine_layer_kernel(%arg0: i32, %arg1: memref<1x1xf32, #tpu.memory_space<smem>>, %arg2: memref<128x128xf32, #tpu.memory_space<vmem>>, %arg3: memref<128x128xbf16, #tpu.memory_space<vmem>>, %arg4: memref<128x128xbf16, #tpu.memory_space<vmem>>, %arg5: memref<128x128xf32, #tpu.memory_space<vmem>>, %arg6: memref<128x128xf32, #tpu.memory_space<vmem>>, %arg7: memref<1x128xf32, #tpu.memory_space<vmem>>, %arg8: memref<128x128xf32, #tpu.memory_space<vmem>>, %arg9: memref<1x128xf32, #tpu.memory_space<vmem>>, %arg10: memref<128x128xf32, #tpu.memory_space<vmem>>, %arg11: memref<1x128xf32, #tpu.memory_space<vmem>>, %arg12: memref<1x128xf32, #tpu.memory_space<vmem>>, %arg13: memref<1x128xf32, #tpu.memory_space<vmem>>, %arg14: memref<128x128xf32, #tpu.memory_space<vmem>>, %arg15: memref<1x128xf32, #tpu.memory_space<vmem>>, %arg16: memref<1x128xf32, #tpu.memory_space<vmem>>, %arg17: memref<1x128xf32, #tpu.memory_space<vmem>>, %arg18: memref<128x128xf32, #tpu.memory_space<vmem>>, %arg19: memref<128x128xf32, #tpu.memory_space<vmem>>) attributes {dimension_semantics = [#tpu.dimension_semantics<arbitrary>], iteration_bounds = array<i64: 1>, scalar_prefetch = 0 : i64, scratch_operands = 1 : i64, tpu.core_type = #tpu.core_type<tc>, window_params = [{transform_indices = @transform_0, window_bounds = array<i64: 1, 1>}, {transform_indices = @transform_1, window_bounds = array<i64: 128, 128>}, {transform_indices = @transform_2, window_bounds = array<i64: 128, 128>}, {transform_indices = @transform_3, window_bounds = array<i64: 128, 128>}, {pipeline_mode = #tpu.pipeline_mode<synchronous>, transform_indices = @transform_4, window_bounds = array<i64: 128, 128>}, {pipeline_mode = #tpu.pipeline_mode<synchronous>, transform_indices = @transform_5, window_bounds = array<i64: 128, 128>}, {pipeline_mode = #tpu.pipeline_mode<synchronous>, transform_indices = @transform_6, window_bounds = array<i64: 1, 128>}, {pipeline_mode = #tpu.pipeline_mode<synchronous>, transform_indices = @transform_7, window_bounds = array<i64: 128, 128>}, {pipeline_mode = #tpu.pipeline_mode<synchronous>, transform_indices = @transform_8, window_bounds = array<i64: 1, 128>}, {pipeline_mode = #tpu.pipeline_mode<synchronous>, transform_indices = @transform_9, window_bounds = array<i64: 128, 128>}, {pipeline_mode = #tpu.pipeline_mode<synchronous>, transform_indices = @transform_10, window_bounds = array<i64: 1, 128>}, {pipeline_mode = #tpu.pipeline_mode<synchronous>, transform_indices = @transform_11, window_bounds = array<i64: 1, 128>}, {pipeline_mode = #tpu.pipeline_mode<synchronous>, transform_indices = @transform_12, window_bounds = array<i64: 1, 128>}, {pipeline_mode = #tpu.pipeline_mode<synchronous>, transform_indices = @transform_13, window_bounds = array<i64: 128, 128>}, {pipeline_mode = #tpu.pipeline_mode<synchronous>, transform_indices = @transform_14, window_bounds = array<i64: 1, 128>}, {pipeline_mode = #tpu.pipeline_mode<synchronous>, transform_indices = @transform_15, window_bounds = array<i64: 1, 128>}, {pipeline_mode = #tpu.pipeline_mode<synchronous>, transform_indices = @transform_16, window_bounds = array<i64: 1, 128>}, {pipeline_mode = #tpu.pipeline_mode<synchronous>, transform_indices = @transform_17, window_bounds = array<i64: 128, 128>}]} {
    %c0_i32 = arith.constant 0 : i32
    %0 = arith.cmpi eq, %arg0, %c0_i32 : i32
    %1 = arith.extui %0 : i1 to i32
    %c0_i32_0 = arith.constant 0 : i32
    %2 = arith.cmpi ne, %1, %c0_i32_0 : i32
    scf.if %2 {
      %cst_28 = arith.constant 0.000000e+00 : f32
      %34 = vector.broadcast %cst_28 : f32 to vector<128x128xf32>
      %c0_29 = arith.constant 0 : index
      %c0_30 = arith.constant 0 : index
      %35 = vector.load %arg19[%c0_29, %c0_30] : memref<128x128xf32, #tpu.memory_space<vmem>>, vector<128x128xf32>
      tpu.vector_store %arg19[%c0_29, %c0_30], %34 {strides = array<i32>} : memref<128x128xf32, #tpu.memory_space<vmem>>, vector<128x128xf32>,
    } else {
    }
    %c0 = arith.constant 0 : index
    %c0_1 = arith.constant 0 : index
    %3 = vector.load %arg2[%c0, %c0_1] : memref<128x128xf32, #tpu.memory_space<vmem>>, vector<128x128xf32>
    %c0_2 = arith.constant 0 : index
    %c0_3 = arith.constant 0 : index
    %4 = vector.load %arg6[%c0_2, %c0_3] : memref<128x128xf32, #tpu.memory_space<vmem>>, vector<128x128xf32>
    %cst = arith.constant dense<0.000000e+00> : vector<128x128xf32>
    %5 = tpu.matmul %3, %4, %cst {dimension_numbers = #tpu.dot_dimension_numbers<[1], [0], [0], [1], [0, 0, 1, 1], [], []>} : vector<128x128xf32>, vector<128x128xf32>, vector<128x128xf32> -> vector<128x128xf32>
    %c0_4 = arith.constant 0 : index
    %c0_5 = arith.constant 0 : index
    %6 = vector.load %arg7[%c0_4, %c0_5] : memref<1x128xf32, #tpu.memory_space<vmem>>, vector<1x128xf32>
    %7 = vector.broadcast %6 : vector<1x128xf32> to vector<128x128xf32>
    %8 = arith.addf %5, %7 : vector<128x128xf32>
    %cst_6 = arith.constant 0.000000e+00 : f32
    %9 = vector.broadcast %cst_6 : f32 to vector<128x128xf32>
    %10 = arith.maximumf %8, %9 : vector<128x128xf32>
    %c0_7 = arith.constant 0 : index
    %c0_8 = arith.constant 0 : index
    %11 = vector.load %arg8[%c0_7, %c0_8] : memref<128x128xf32, #tpu.memory_space<vmem>>, vector<128x128xf32>
    %cst_9 = arith.constant dense<0.000000e+00> : vector<128x128xf32>
    %12 = tpu.matmul %10, %11, %cst_9 {dimension_numbers = #tpu.dot_dimension_numbers<[1], [0], [0], [1], [0, 0, 1, 1], [], []>} : vector<128x128xf32>, vector<128x128xf32>, vector<128x128xf32> -> vector<128x128xf32>
    %c0_10 = arith.constant 0 : index
    %c0_11 = arith.constant 0 : index
    %13 = vector.load %arg9[%c0_10, %c0_11] : memref<1x128xf32, #tpu.memory_space<vmem>>, vector<1x128xf32>
    %14 = vector.broadcast %13 : vector<1x128xf32> to vector<128x128xf32>
    %15 = arith.addf %12, %14 : vector<128x128xf32>
    %cst_12 = arith.constant 0.000000e+00 : f32
    %16 = vector.broadcast %cst_12 : f32 to vector<128x128xf32>
    %17 = arith.maximumf %15, %16 : vector<128x128xf32>
    %c0_13 = arith.constant 0 : index
    %c0_14 = arith.constant 0 : index
    %18 = vector.load %arg3[%c0_13, %c0_14] : memref<128x128xbf16, #tpu.memory_space<vmem>>, vector<128x128xbf16>
    %c0_15 = arith.constant 0 : index
    %c0_16 = arith.constant 0 : index
    %19 = vector.load %arg5[%c0_15, %c0_16] : memref<128x128xf32, #tpu.memory_space<vmem>>, vector<128x128xf32>
    %20 = arith.truncf %19 : vector<128x128xf32> to vector<128x128xbf16>
    %cst_17 = arith.constant dense<0.000000e+00> : vector<128x128xf32>
    %21 = tpu.matmul %18, %20, %cst_17 {dimension_numbers = #tpu.dot_dimension_numbers<[1], [0], [0], [1], [0, 0, 1, 1], [], []>} : vector<128x128xbf16>, vector<128x128xbf16>, vector<128x128xf32> -> vector<128x128xf32>
    %22 = arith.addf %21, %17 : vector<128x128xf32>
    %cst_18 = arith.constant 0.000000e+00 : f32
    %23 = vector.broadcast %cst_18 : f32 to vector<128x128xf32>
    %24 = arith.maximumf %22, %23 : vector<128x128xf32>
    %c0_19 = arith.constant 0 : index
    %c0_20 = arith.constant 0 : index
    %25 = vector.load %arg19[%c0_19, %c0_20] : memref<128x128xf32, #tpu.memory_space<vmem>>, vector<128x128xf32>
    %c0_21 = arith.constant 0 : index
    %c0_22 = arith.constant 0 : index
    %26 = vector.load %arg4[%c0_21, %c0_22] : memref<128x128xbf16, #tpu.memory_space<vmem>>, vector<128x128xbf16>
    %27 = arith.truncf %24 : vector<128x128xf32> to vector<128x128xbf16>
    %cst_23 = arith.constant dense<0.000000e+00> : vector<128x128xf32>
    %28 = tpu.matmul %26, %27, %cst_23 {dimension_numbers = #tpu.dot_dimension_numbers<[1], [0], [0], [1], [0, 0, 1, 1], [], []>} : vector<128x128xbf16>, vector<128x128xbf16>, vector<128x128xf32> -> vector<128x128xf32>
    %29 = arith.addf %25, %28 : vector<128x128xf32>
    %c0_24 = arith.constant 0 : index
    %c0_25 = arith.constant 0 : index
    %30 = vector.load %arg19[%c0_24, %c0_25] : memref<128x128xf32, #tpu.memory_space<vmem>>, vector<128x128xf32>
    tpu.vector_store %arg19[%c0_24, %c0_25], %29 {strides = array<i32>} : memref<128x128xf32, #tpu.memory_space<vmem>>, vector<128x128xf32>,
    %c0_i32_26 = arith.constant 0 : i32
    %31 = arith.cmpi eq, %arg0, %c0_i32_26 : i32
    %32 = arith.extui %31 : i1 to i32
    %c0_i32_27 = arith.constant 0 : i32
    %33 = arith.cmpi ne, %32, %c0_i32_27 : i32
    scf.if %33 {
      %c0_28 = arith.constant 0 : index
      %c0_29 = arith.constant 0 : index
      %34 = memref.load %arg1[%c0_28, %c0_29] : memref<1x1xf32, #tpu.memory_space<smem>>
      %c0_30 = arith.constant 0 : index
      %c0_31 = arith.constant 0 : index
      %35 = vector.load %arg5[%c0_30, %c0_31] : memref<128x128xf32, #tpu.memory_space<vmem>>, vector<128x128xf32>
      %36 = vector.broadcast %34 : f32 to vector<128x128xf32>
      %37 = arith.mulf %36, %35 : vector<128x128xf32>
      %c0_32 = arith.constant 0 : index
      %c0_33 = arith.constant 0 : index
      %38 = vector.load %arg19[%c0_32, %c0_33] : memref<128x128xf32, #tpu.memory_space<vmem>>, vector<128x128xf32>
      %39 = arith.addf %37, %38 : vector<128x128xf32>
      %c0_34 = arith.constant 0 : index
      %c0_35 = arith.constant 0 : index
      %40 = vector.load %arg10[%c0_34, %c0_35] : memref<128x128xf32, #tpu.memory_space<vmem>>, vector<128x128xf32>
      %cst_36 = arith.constant dense<0.000000e+00> : vector<128x128xf32>
      %41 = tpu.matmul %39, %40, %cst_36 {dimension_numbers = #tpu.dot_dimension_numbers<[1], [0], [0], [1], [0, 0, 1, 1], [], []>} : vector<128x128xf32>, vector<128x128xf32>, vector<128x128xf32> -> vector<128x128xf32>
      %c0_37 = arith.constant 0 : index
      %c0_38 = arith.constant 0 : index
      %42 = vector.load %arg11[%c0_37, %c0_38] : memref<1x128xf32, #tpu.memory_space<vmem>>, vector<1x128xf32>
      %43 = vector.broadcast %42 : vector<1x128xf32> to vector<128x128xf32>
      %44 = arith.addf %41, %43 : vector<128x128xf32>
      %cst_39 = arith.constant 0.000000e+00 : f32
      %45 = vector.broadcast %cst_39 : f32 to vector<128x128xf32>
      %46 = arith.maximumf %44, %45 : vector<128x128xf32>
      %c0_40 = arith.constant 0 : index
      %c0_41 = arith.constant 0 : index
      %47 = vector.load %arg12[%c0_40, %c0_41] : memref<1x128xf32, #tpu.memory_space<vmem>>, vector<1x128xf32>
      %48 = vector.broadcast %47 : vector<1x128xf32> to vector<128x128xf32>
      %49 = arith.mulf %46, %48 : vector<128x128xf32>
      %c0_42 = arith.constant 0 : index
      %c0_43 = arith.constant 0 : index
      %50 = vector.load %arg13[%c0_42, %c0_43] : memref<1x128xf32, #tpu.memory_space<vmem>>, vector<1x128xf32>
      %51 = vector.broadcast %50 : vector<1x128xf32> to vector<128x128xf32>
      %52 = arith.addf %49, %51 : vector<128x128xf32>
      %c0_44 = arith.constant 0 : index
      %c0_45 = arith.constant 0 : index
      %53 = vector.load %arg14[%c0_44, %c0_45] : memref<128x128xf32, #tpu.memory_space<vmem>>, vector<128x128xf32>
      %cst_46 = arith.constant dense<0.000000e+00> : vector<128x128xf32>
      %54 = tpu.matmul %52, %53, %cst_46 {dimension_numbers = #tpu.dot_dimension_numbers<[1], [0], [0], [1], [0, 0, 1, 1], [], []>} : vector<128x128xf32>, vector<128x128xf32>, vector<128x128xf32> -> vector<128x128xf32>
      %c0_47 = arith.constant 0 : index
      %c0_48 = arith.constant 0 : index
      %55 = vector.load %arg15[%c0_47, %c0_48] : memref<1x128xf32, #tpu.memory_space<vmem>>, vector<1x128xf32>
      %56 = vector.broadcast %55 : vector<1x128xf32> to vector<128x128xf32>
      %57 = arith.addf %54, %56 : vector<128x128xf32>
      %cst_49 = arith.constant 0.000000e+00 : f32
      %58 = vector.broadcast %cst_49 : f32 to vector<128x128xf32>
      %59 = arith.maximumf %57, %58 : vector<128x128xf32>
      %c0_50 = arith.constant 0 : index
      %c0_51 = arith.constant 0 : index
      %60 = vector.load %arg16[%c0_50, %c0_51] : memref<1x128xf32, #tpu.memory_space<vmem>>, vector<1x128xf32>
      %61 = vector.broadcast %60 : vector<1x128xf32> to vector<128x128xf32>
      %62 = arith.mulf %59, %61 : vector<128x128xf32>
      %c0_52 = arith.constant 0 : index
      %c0_53 = arith.constant 0 : index
      %63 = vector.load %arg17[%c0_52, %c0_53] : memref<1x128xf32, #tpu.memory_space<vmem>>, vector<1x128xf32>
      %64 = vector.broadcast %63 : vector<1x128xf32> to vector<128x128xf32>
      %65 = arith.addf %62, %64 : vector<128x128xf32>
      %c0_54 = arith.constant 0 : index
      %c0_55 = arith.constant 0 : index
      %66 = vector.load %arg18[%c0_54, %c0_55] : memref<128x128xf32, #tpu.memory_space<vmem>>, vector<128x128xf32>
      tpu.vector_store %arg18[%c0_54, %c0_55], %65 {strides = array<i32>} : memref<128x128xf32, #tpu.memory_space<vmem>>, vector<128x128xf32>,
    } else {
    }
    return
  }
  func.func @transform_0(%arg0: i32) -> (i32, i32) {
    %c0_i32 = arith.constant 0 : i32
    %c0_i32_0 = arith.constant 0 : i32
    %c0_i32_1 = arith.constant 0 : i32
    return %c0_i32, %c0_i32_0 : i32, i32
  }
  func.func @transform_1(%arg0: i32) -> (i32, i32) {
    %c0_i32 = arith.constant 0 : i32
    %c0_i32_0 = arith.constant 0 : i32
    return %arg0, %c0_i32 : i32, i32
  }
  func.func @transform_2(%arg0: i32) -> (i32, i32) {
    %c0_i32 = arith.constant 0 : i32
    %c0_i32_0 = arith.constant 0 : i32
    return %arg0, %c0_i32 : i32, i32
  }
  func.func @transform_3(%arg0: i32) -> (i32, i32) {
    %c0_i32 = arith.constant 0 : i32
    %c0_i32_0 = arith.constant 0 : i32
    return %c0_i32, %arg0 : i32, i32
  }
  func.func @transform_4(%arg0: i32) -> (i32, i32) {
    %c0_i32 = arith.constant 0 : i32
    %c0_i32_0 = arith.constant 0 : i32
    %c0_i32_1 = arith.constant 0 : i32
    return %c0_i32, %c0_i32_0 : i32, i32
  }
  func.func @transform_5(%arg0: i32) -> (i32, i32) {
    %c0_i32 = arith.constant 0 : i32
    %c0_i32_0 = arith.constant 0 : i32
    %c0_i32_1 = arith.constant 0 : i32
    return %c0_i32, %c0_i32_0 : i32, i32
  }
  func.func @transform_6(%arg0: i32) -> (i32, i32) {
    %c0_i32 = arith.constant 0 : i32
    %c0_i32_0 = arith.constant 0 : i32
    %c0_i32_1 = arith.constant 0 : i32
    return %c0_i32, %c0_i32_0 : i32, i32
  }
  func.func @transform_7(%arg0: i32) -> (i32, i32) {
    %c0_i32 = arith.constant 0 : i32
    %c0_i32_0 = arith.constant 0 : i32
    %c0_i32_1 = arith.constant 0 : i32
    return %c0_i32, %c0_i32_0 : i32, i32
  }
  func.func @transform_8(%arg0: i32) -> (i32, i32) {
    %c0_i32 = arith.constant 0 : i32
    %c0_i32_0 = arith.constant 0 : i32
    %c0_i32_1 = arith.constant 0 : i32
    return %c0_i32, %c0_i32_0 : i32, i32
  }
  func.func @transform_9(%arg0: i32) -> (i32, i32) {
    %c0_i32 = arith.constant 0 : i32
    %c0_i32_0 = arith.constant 0 : i32
    %c0_i32_1 = arith.constant 0 : i32
    return %c0_i32, %c0_i32_0 : i32, i32
  }
  func.func @transform_10(%arg0: i32) -> (i32, i32) {
    %c0_i32 = arith.constant 0 : i32
    %c0_i32_0 = arith.constant 0 : i32
    %c0_i32_1 = arith.constant 0 : i32
    return %c0_i32, %c0_i32_0 : i32, i32
  }
  func.func @transform_11(%arg0: i32) -> (i32, i32) {
    %c0_i32 = arith.constant 0 : i32
    %c0_i32_0 = arith.constant 0 : i32
    %c0_i32_1 = arith.constant 0 : i32
    return %c0_i32, %c0_i32_0 : i32, i32
  }
  func.func @transform_12(%arg0: i32) -> (i32, i32) {
    %c0_i32 = arith.constant 0 : i32
    %c0_i32_0 = arith.constant 0 : i32
    %c0_i32_1 = arith.constant 0 : i32
    return %c0_i32, %c0_i32_0 : i32, i32
  }
  func.func @transform_13(%arg0: i32) -> (i32, i32) {
    %c0_i32 = arith.constant 0 : i32
    %c0_i32_0 = arith.constant 0 : i32
    %c0_i32_1 = arith.constant 0 : i32
    return %c0_i32, %c0_i32_0 : i32, i32
  }
  func.func @transform_14(%arg0: i32) -> (i32, i32) {
    %c0_i32 = arith.constant 0 : i32
    %c0_i32_0 = arith.constant 0 : i32
    %c0_i32_1 = arith.constant 0 : i32
    return %c0_i32, %c0_i32_0 : i32, i32
  }
  func.func @transform_15(%arg0: i32) -> (i32, i32) {
    %c0_i32 = arith.constant 0 : i32
    %c0_i32_0 = arith.constant 0 : i32
    %c0_i32_1 = arith.constant 0 : i32
    return %c0_i32, %c0_i32_0 : i32, i32
  }
  func.func @transform_16(%arg0: i32) -> (i32, i32) {
    %c0_i32 = arith.constant 0 : i32
    %c0_i32_0 = arith.constant 0 : i32
    %c0_i32_1 = arith.constant 0 : i32
    return %c0_i32, %c0_i32_0 : i32, i32
  }
  func.func @transform_17(%arg0: i32) -> (i32, i32) {
    %c0_i32 = arith.constant 0 : i32
    %c0_i32_0 = arith.constant 0 : i32
    %c0_i32_1 = arith.constant 0 : i32
    return %c0_i32, %c0_i32_0 : i32, i32
  }
}

module attributes {stable_mosaic.version = 11 : i64} {
  func.func @_gine_layer_kernel(%arg0: i32, %arg1: memref<1x1xf32, #tpu.memory_space<smem>>, %arg2: memref<128x128xf32, #tpu.memory_space<vmem>>, %arg3: memref<128x128xbf16, #tpu.memory_space<vmem>>, %arg4: memref<128x128xbf16, #tpu.memory_space<vmem>>, %arg5: memref<128x128xf32, #tpu.memory_space<vmem>>, %arg6: memref<128x128xf32, #tpu.memory_space<vmem>>, %arg7: memref<1x128xf32, #tpu.memory_space<vmem>>, %arg8: memref<128x128xf32, #tpu.memory_space<vmem>>, %arg9: memref<1x128xf32, #tpu.memory_space<vmem>>, %arg10: memref<128x128xf32, #tpu.memory_space<vmem>>, %arg11: memref<1x128xf32, #tpu.memory_space<vmem>>, %arg12: memref<1x128xf32, #tpu.memory_space<vmem>>, %arg13: memref<1x128xf32, #tpu.memory_space<vmem>>, %arg14: memref<128x128xf32, #tpu.memory_space<vmem>>, %arg15: memref<128x128xf32, #tpu.memory_space<vmem>>) attributes {dimension_semantics = [#tpu.dimension_semantics<arbitrary>], iteration_bounds = array<i64: 1>, scalar_prefetch = 0 : i64, scratch_operands = 1 : i64, tpu.core_type = #tpu.core_type<tc>, window_params = [{transform_indices = @transform_0, window_bounds = array<i64: 1, 1>}, {transform_indices = @transform_1, window_bounds = array<i64: 128, 128>}, {transform_indices = @transform_2, window_bounds = array<i64: 128, 128>}, {transform_indices = @transform_3, window_bounds = array<i64: 128, 128>}, {pipeline_mode = #tpu.pipeline_mode<synchronous>, transform_indices = @transform_4, window_bounds = array<i64: 128, 128>}, {pipeline_mode = #tpu.pipeline_mode<synchronous>, transform_indices = @transform_5, window_bounds = array<i64: 128, 128>}, {pipeline_mode = #tpu.pipeline_mode<synchronous>, transform_indices = @transform_6, window_bounds = array<i64: 1, 128>}, {pipeline_mode = #tpu.pipeline_mode<synchronous>, transform_indices = @transform_7, window_bounds = array<i64: 128, 128>}, {pipeline_mode = #tpu.pipeline_mode<synchronous>, transform_indices = @transform_8, window_bounds = array<i64: 1, 128>}, {pipeline_mode = #tpu.pipeline_mode<synchronous>, transform_indices = @transform_9, window_bounds = array<i64: 128, 128>}, {pipeline_mode = #tpu.pipeline_mode<synchronous>, transform_indices = @transform_10, window_bounds = array<i64: 1, 128>}, {pipeline_mode = #tpu.pipeline_mode<synchronous>, transform_indices = @transform_11, window_bounds = array<i64: 1, 128>}, {pipeline_mode = #tpu.pipeline_mode<synchronous>, transform_indices = @transform_12, window_bounds = array<i64: 1, 128>}, {pipeline_mode = #tpu.pipeline_mode<synchronous>, transform_indices = @transform_13, window_bounds = array<i64: 128, 128>}]} {
    %c0_i32 = arith.constant 0 : i32
    %0 = arith.cmpi eq, %arg0, %c0_i32 : i32
    %1 = arith.extui %0 : i1 to i32
    %c0_i32_0 = arith.constant 0 : i32
    %2 = arith.cmpi ne, %1, %c0_i32_0 : i32
    scf.if %2 {
      %cst_28 = arith.constant 0.000000e+00 : f32
      %34 = vector.broadcast %cst_28 : f32 to vector<128x128xf32>
      %c0_29 = arith.constant 0 : index
      %c0_30 = arith.constant 0 : index
      %35 = vector.load %arg15[%c0_29, %c0_30] : memref<128x128xf32, #tpu.memory_space<vmem>>, vector<128x128xf32>
      tpu.vector_store %arg15[%c0_29, %c0_30], %34 {strides = array<i32>} : memref<128x128xf32, #tpu.memory_space<vmem>>, vector<128x128xf32>,
    } else {
    }
    %c0 = arith.constant 0 : index
    %c0_1 = arith.constant 0 : index
    %3 = vector.load %arg2[%c0, %c0_1] : memref<128x128xf32, #tpu.memory_space<vmem>>, vector<128x128xf32>
    %c0_2 = arith.constant 0 : index
    %c0_3 = arith.constant 0 : index
    %4 = vector.load %arg6[%c0_2, %c0_3] : memref<128x128xf32, #tpu.memory_space<vmem>>, vector<128x128xf32>
    %cst = arith.constant dense<0.000000e+00> : vector<128x128xf32>
    %5 = tpu.matmul %3, %4, %cst {dimension_numbers = #tpu.dot_dimension_numbers<[1], [0], [0], [1], [0, 0, 1, 1], [], []>} : vector<128x128xf32>, vector<128x128xf32>, vector<128x128xf32> -> vector<128x128xf32>
    %c0_4 = arith.constant 0 : index
    %c0_5 = arith.constant 0 : index
    %6 = vector.load %arg7[%c0_4, %c0_5] : memref<1x128xf32, #tpu.memory_space<vmem>>, vector<1x128xf32>
    %7 = vector.broadcast %6 : vector<1x128xf32> to vector<128x128xf32>
    %8 = arith.addf %5, %7 : vector<128x128xf32>
    %cst_6 = arith.constant 0.000000e+00 : f32
    %9 = vector.broadcast %cst_6 : f32 to vector<128x128xf32>
    %10 = arith.maximumf %8, %9 : vector<128x128xf32>
    %c0_7 = arith.constant 0 : index
    %c0_8 = arith.constant 0 : index
    %11 = vector.load %arg8[%c0_7, %c0_8] : memref<128x128xf32, #tpu.memory_space<vmem>>, vector<128x128xf32>
    %cst_9 = arith.constant dense<0.000000e+00> : vector<128x128xf32>
    %12 = tpu.matmul %10, %11, %cst_9 {dimension_numbers = #tpu.dot_dimension_numbers<[1], [0], [0], [1], [0, 0, 1, 1], [], []>} : vector<128x128xf32>, vector<128x128xf32>, vector<128x128xf32> -> vector<128x128xf32>
    %c0_10 = arith.constant 0 : index
    %c0_11 = arith.constant 0 : index
    %13 = vector.load %arg9[%c0_10, %c0_11] : memref<1x128xf32, #tpu.memory_space<vmem>>, vector<1x128xf32>
    %14 = vector.broadcast %13 : vector<1x128xf32> to vector<128x128xf32>
    %15 = arith.addf %12, %14 : vector<128x128xf32>
    %cst_12 = arith.constant 0.000000e+00 : f32
    %16 = vector.broadcast %cst_12 : f32 to vector<128x128xf32>
    %17 = arith.maximumf %15, %16 : vector<128x128xf32>
    %c0_13 = arith.constant 0 : index
    %c0_14 = arith.constant 0 : index
    %18 = vector.load %arg3[%c0_13, %c0_14] : memref<128x128xbf16, #tpu.memory_space<vmem>>, vector<128x128xbf16>
    %c0_15 = arith.constant 0 : index
    %c0_16 = arith.constant 0 : index
    %19 = vector.load %arg5[%c0_15, %c0_16] : memref<128x128xf32, #tpu.memory_space<vmem>>, vector<128x128xf32>
    %20 = arith.truncf %19 : vector<128x128xf32> to vector<128x128xbf16>
    %cst_17 = arith.constant dense<0.000000e+00> : vector<128x128xf32>
    %21 = tpu.matmul %18, %20, %cst_17 {dimension_numbers = #tpu.dot_dimension_numbers<[1], [0], [0], [1], [0, 0, 1, 1], [], []>} : vector<128x128xbf16>, vector<128x128xbf16>, vector<128x128xf32> -> vector<128x128xf32>
    %22 = arith.addf %21, %17 : vector<128x128xf32>
    %cst_18 = arith.constant 0.000000e+00 : f32
    %23 = vector.broadcast %cst_18 : f32 to vector<128x128xf32>
    %24 = arith.maximumf %22, %23 : vector<128x128xf32>
    %c0_19 = arith.constant 0 : index
    %c0_20 = arith.constant 0 : index
    %25 = vector.load %arg15[%c0_19, %c0_20] : memref<128x128xf32, #tpu.memory_space<vmem>>, vector<128x128xf32>
    %c0_21 = arith.constant 0 : index
    %c0_22 = arith.constant 0 : index
    %26 = vector.load %arg4[%c0_21, %c0_22] : memref<128x128xbf16, #tpu.memory_space<vmem>>, vector<128x128xbf16>
    %27 = arith.truncf %24 : vector<128x128xf32> to vector<128x128xbf16>
    %cst_23 = arith.constant dense<0.000000e+00> : vector<128x128xf32>
    %28 = tpu.matmul %26, %27, %cst_23 {dimension_numbers = #tpu.dot_dimension_numbers<[1], [0], [0], [1], [0, 0, 1, 1], [], []>} : vector<128x128xbf16>, vector<128x128xbf16>, vector<128x128xf32> -> vector<128x128xf32>
    %29 = arith.addf %25, %28 : vector<128x128xf32>
    %c0_24 = arith.constant 0 : index
    %c0_25 = arith.constant 0 : index
    %30 = vector.load %arg15[%c0_24, %c0_25] : memref<128x128xf32, #tpu.memory_space<vmem>>, vector<128x128xf32>
    tpu.vector_store %arg15[%c0_24, %c0_25], %29 {strides = array<i32>} : memref<128x128xf32, #tpu.memory_space<vmem>>, vector<128x128xf32>,
    %c0_i32_26 = arith.constant 0 : i32
    %31 = arith.cmpi eq, %arg0, %c0_i32_26 : i32
    %32 = arith.extui %31 : i1 to i32
    %c0_i32_27 = arith.constant 0 : i32
    %33 = arith.cmpi ne, %32, %c0_i32_27 : i32
    scf.if %33 {
      %c0_28 = arith.constant 0 : index
      %c0_29 = arith.constant 0 : index
      %34 = memref.load %arg1[%c0_28, %c0_29] : memref<1x1xf32, #tpu.memory_space<smem>>
      %c0_30 = arith.constant 0 : index
      %c0_31 = arith.constant 0 : index
      %35 = vector.load %arg5[%c0_30, %c0_31] : memref<128x128xf32, #tpu.memory_space<vmem>>, vector<128x128xf32>
      %36 = vector.broadcast %34 : f32 to vector<128x128xf32>
      %37 = arith.mulf %36, %35 : vector<128x128xf32>
      %c0_32 = arith.constant 0 : index
      %c0_33 = arith.constant 0 : index
      %38 = vector.load %arg15[%c0_32, %c0_33] : memref<128x128xf32, #tpu.memory_space<vmem>>, vector<128x128xf32>
      %39 = arith.addf %37, %38 : vector<128x128xf32>
      %c0_34 = arith.constant 0 : index
      %c0_35 = arith.constant 0 : index
      %40 = vector.load %arg10[%c0_34, %c0_35] : memref<128x128xf32, #tpu.memory_space<vmem>>, vector<128x128xf32>
      %cst_36 = arith.constant dense<0.000000e+00> : vector<128x128xf32>
      %41 = tpu.matmul %39, %40, %cst_36 {dimension_numbers = #tpu.dot_dimension_numbers<[1], [0], [0], [1], [0, 0, 1, 1], [], []>} : vector<128x128xf32>, vector<128x128xf32>, vector<128x128xf32> -> vector<128x128xf32>
      %c0_37 = arith.constant 0 : index
      %c0_38 = arith.constant 0 : index
      %42 = vector.load %arg11[%c0_37, %c0_38] : memref<1x128xf32, #tpu.memory_space<vmem>>, vector<1x128xf32>
      %43 = vector.broadcast %42 : vector<1x128xf32> to vector<128x128xf32>
      %44 = arith.addf %41, %43 : vector<128x128xf32>
      %cst_39 = arith.constant 0.000000e+00 : f32
      %45 = vector.broadcast %cst_39 : f32 to vector<128x128xf32>
      %46 = arith.maximumf %44, %45 : vector<128x128xf32>
      %c0_40 = arith.constant 0 : index
      %c0_41 = arith.constant 0 : index
      %47 = vector.load %arg12[%c0_40, %c0_41] : memref<1x128xf32, #tpu.memory_space<vmem>>, vector<1x128xf32>
      %48 = vector.broadcast %47 : vector<1x128xf32> to vector<128x128xf32>
      %49 = arith.mulf %46, %48 : vector<128x128xf32>
      %c0_42 = arith.constant 0 : index
      %c0_43 = arith.constant 0 : index
      %50 = vector.load %arg13[%c0_42, %c0_43] : memref<1x128xf32, #tpu.memory_space<vmem>>, vector<1x128xf32>
      %51 = vector.broadcast %50 : vector<1x128xf32> to vector<128x128xf32>
      %52 = arith.addf %49, %51 : vector<128x128xf32>
      %c0_44 = arith.constant 0 : index
      %c0_45 = arith.constant 0 : index
      %53 = vector.load %arg14[%c0_44, %c0_45] : memref<128x128xf32, #tpu.memory_space<vmem>>, vector<128x128xf32>
      tpu.vector_store %arg14[%c0_44, %c0_45], %52 {strides = array<i32>} : memref<128x128xf32, #tpu.memory_space<vmem>>, vector<128x128xf32>,
    } else {
    }
    return
  }
  func.func @transform_0(%arg0: i32) -> (i32, i32) {
    %c0_i32 = arith.constant 0 : i32
    %c0_i32_0 = arith.constant 0 : i32
    %c0_i32_1 = arith.constant 0 : i32
    return %c0_i32, %c0_i32_0 : i32, i32
  }
  func.func @transform_1(%arg0: i32) -> (i32, i32) {
    %c0_i32 = arith.constant 0 : i32
    %c0_i32_0 = arith.constant 0 : i32
    return %arg0, %c0_i32 : i32, i32
  }
  func.func @transform_2(%arg0: i32) -> (i32, i32) {
    %c0_i32 = arith.constant 0 : i32
    %c0_i32_0 = arith.constant 0 : i32
    return %arg0, %c0_i32 : i32, i32
  }
  func.func @transform_3(%arg0: i32) -> (i32, i32) {
    %c0_i32 = arith.constant 0 : i32
    %c0_i32_0 = arith.constant 0 : i32
    return %c0_i32, %arg0 : i32, i32
  }
  func.func @transform_4(%arg0: i32) -> (i32, i32) {
    %c0_i32 = arith.constant 0 : i32
    %c0_i32_0 = arith.constant 0 : i32
    %c0_i32_1 = arith.constant 0 : i32
    return %c0_i32, %c0_i32_0 : i32, i32
  }
  func.func @transform_5(%arg0: i32) -> (i32, i32) {
    %c0_i32 = arith.constant 0 : i32
    %c0_i32_0 = arith.constant 0 : i32
    %c0_i32_1 = arith.constant 0 : i32
    return %c0_i32, %c0_i32_0 : i32, i32
  }
  func.func @transform_6(%arg0: i32) -> (i32, i32) {
    %c0_i32 = arith.constant 0 : i32
    %c0_i32_0 = arith.constant 0 : i32
    %c0_i32_1 = arith.constant 0 : i32
    return %c0_i32, %c0_i32_0 : i32, i32
  }
  func.func @transform_7(%arg0: i32) -> (i32, i32) {
    %c0_i32 = arith.constant 0 : i32
    %c0_i32_0 = arith.constant 0 : i32
    %c0_i32_1 = arith.constant 0 : i32
    return %c0_i32, %c0_i32_0 : i32, i32
  }
  func.func @transform_8(%arg0: i32) -> (i32, i32) {
    %c0_i32 = arith.constant 0 : i32
    %c0_i32_0 = arith.constant 0 : i32
    %c0_i32_1 = arith.constant 0 : i32
    return %c0_i32, %c0_i32_0 : i32, i32
  }
  func.func @transform_9(%arg0: i32) -> (i32, i32) {
    %c0_i32 = arith.constant 0 : i32
    %c0_i32_0 = arith.constant 0 : i32
    %c0_i32_1 = arith.constant 0 : i32
    return %c0_i32, %c0_i32_0 : i32, i32
  }
  func.func @transform_10(%arg0: i32) -> (i32, i32) {
    %c0_i32 = arith.constant 0 : i32
    %c0_i32_0 = arith.constant 0 : i32
    %c0_i32_1 = arith.constant 0 : i32
    return %c0_i32, %c0_i32_0 : i32, i32
  }
  func.func @transform_11(%arg0: i32) -> (i32, i32) {
    %c0_i32 = arith.constant 0 : i32
    %c0_i32_0 = arith.constant 0 : i32
    %c0_i32_1 = arith.constant 0 : i32
    return %c0_i32, %c0_i32_0 : i32, i32
  }
  func.func @transform_12(%arg0: i32) -> (i32, i32) {
    %c0_i32 = arith.constant 0 : i32
    %c0_i32_0 = arith.constant 0 : i32
    %c0_i32_1 = arith.constant 0 : i32
    return %c0_i32, %c0_i32_0 : i32, i32
  }
  func.func @transform_13(%arg0: i32) -> (i32, i32) {
    %c0_i32 = arith.constant 0 : i32
    %c0_i32_0 = arith.constant 0 : i32
    %c0_i32_1 = arith.constant 0 : i32
    return %c0_i32, %c0_i32_0 : i32, i32
  }
}

</mosaic_0001>

<bundles_post_ra>
// kernel: gine_forward.5
= control target key start
LH: loop header
LB: loop body
LE: loop exit
PB: predicated region body
PF: predicated region fallthrough
CT: control target
= control target key end

     0   :  { %v695_v40 = vmov 0.0   ;;  %vm696_vm0 = vmmov 0   ;;  %s937_s1 = inlined_call_operand.vmem [shape: f32[128,128], index: 1, kind: input, shape index: {}]   ;;  %s938_s0 = inlined_call_operand.vmem [shape: f32[128,128], index: 0, kind: input, shape index: {}]   ;;  %s939_s2 = inlined_call_operand.vmem [shape: f32[1,128], index: 2, kind: input, shape index: {}]   ;;  %s940_s5 = inlined_call_operand.vmem [shape: f32[128,128], index: 5, kind: input, shape index: {}]   ;;  %s941_s3 = inlined_call_operand.vmem [shape: bf16[8,128], index: 3, kind: input, shape index: {}]   ;;  %s942_s4 = inlined_call_operand.vmem [shape: bf16[8,128], index: 4, kind: input, shape index: {}]   ;;  %s943_s6 = inlined_call_operand.vmem [shape: f32[1,128], index: 6, kind: input, shape index: {}]   ;;  %s944_s7 = inlined_call_operand.vmem [shape: f32[8,128], index: 7, kind: output, shape index: {}]  }
   0x1   :  { %v47_v0 = vld [vmem:[%s937_s1] sm:$0xff]  ;;  %v48_v1 = vld [vmem:[%s937_s1 + $0x8] sm:$0xff]  ;;  %v49_v2 = vld [vmem:[%s937_s1 + $0x10] sm:$0xff]  ;;  %561 = vmatprep.subr.bf16.mxu1 %v695_v40  ;;  %577 = vmatprep.mubr.msk.bf16.mxu1 %vm696_vm0, %v695_v40 }
   0x2   :  { %v636_v3 = vpack.c.bf16 %v48_v1, %v47_v0  ;;  %v50_v4 = vld [vmem:[%s937_s1 + $0x18] sm:$0xff]  ;;  %v51_v6 = vld [vmem:[%s937_s1 + $0x20] sm:$0xff]  ;;  %v52_v7 = vld [vmem:[%s937_s1 + $0x28] sm:$0xff] }
   0x3   :  { %v640_v5 = vpack.c.bf16 %v50_v4, %v49_v2  ;;  %v644_v8 = vpack.c.bf16 %v52_v7, %v51_v6  ;;  %v31_v9 = vld [vmem:[%s938_s0] sm:$0xff]  ;;  %v53_v10 = vld [vmem:[%s937_s1 + $0x30] sm:$0xff]  ;;  %v54_v11 = vld [vmem:[%s937_s1 + $0x38] sm:$0xff] }
   0x4   :  { %637 = vmatprep.subr.bf16.mxu0 %v636_v3  ;;  %537 = vmatprep.mubr.f32.mxu0 %v31_v9  ;;  %v648_v12 = vpack.c.bf16 %v54_v11, %v53_v10  ;;  %v55_v13 = vld [vmem:[%s937_s1 + $0x40] sm:$0xff]  ;;  %v56_v14 = vld [vmem:[%s937_s1 + $0x48] sm:$0xff]  ;;  %v57_v16 = vld [vmem:[%s937_s1 + $0x50] sm:$0xff] }
   0x5   :  { %639 = vmatpush3.bf16.msra.mxu0 %v636_v3  ;;  %v652_v15 = vpack.c.bf16 %v56_v14, %v55_v13  ;;  %v58_v17 = vld [vmem:[%s937_s1 + $0x58] sm:$0xff]  ;;  %v59_v19 = vld [vmem:[%s937_s1 + $0x60] sm:$0xff]  ;;  %v60_v20 = vld [vmem:[%s937_s1 + $0x68] sm:$0xff] }
   0x6   :  { %641 = vmatprep.subr.bf16.mxu0 %v640_v5  ;;  %v656_v18 = vpack.c.bf16 %v58_v17, %v57_v16  ;;  %v660_v21 = vpack.c.bf16 %v60_v20, %v59_v19  ;;  %v61_v22 = vld [vmem:[%s937_s1 + $0x70] sm:$0xff]  ;;  %v62_v23 = vld [vmem:[%s937_s1 + $0x78] sm:$0xff]  ;;  %v32_v25 = vld [vmem:[%s938_s0 + $0x8] sm:$0xff] }
   0x7   :  { %v664_v24 = vpack.c.bf16 %v62_v23, %v61_v22  ;;  %v33_v26 = vld [vmem:[%s938_s0 + $0x10] sm:$0xff]  ;;  %v34_v27 = vld [vmem:[%s938_s0 + $0x18] sm:$0xff]  ;;  %v35_v28 = vld [vmem:[%s938_s0 + $0x20] sm:$0xff] }
   0x8   :  { %v36_v29 = vld [vmem:[%s938_s0 + $0x28] sm:$0xff]  ;;  %v37_v30 = vld [vmem:[%s938_s0 + $0x30] sm:$0xff]  ;;  %v38_v31 = vld [vmem:[%s938_s0 + $0x38] sm:$0xff] }
   0x9   :  { %643 = vmatpush3.bf16.msra.mxu0 %v640_v5  ;;  %v39_v32 = vld [vmem:[%s938_s0 + $0x40] sm:$0xff]  ;;  %v40_v33 = vld [vmem:[%s938_s0 + $0x48] sm:$0xff]  ;;  %v41_v34 = vld [vmem:[%s938_s0 + $0x50] sm:$0xff] }
   0xa   :  { %645 = vmatprep.subr.bf16.mxu0 %v644_v8  ;;  %v42_v35 = vld [vmem:[%s938_s0 + $0x58] sm:$0xff]  ;;  %v43_v36 = vld [vmem:[%s938_s0 + $0x60] sm:$0xff]  ;;  %v44_v37 = vld [vmem:[%s938_s0 + $0x68] sm:$0xff] }
   0xb   :  { %v45_v38 = vld [vmem:[%s938_s0 + $0x70] sm:$0xff]  ;;  %v46_v39 = vld [vmem:[%s938_s0 + $0x78] sm:$0xff]  ;;  %v843_v41 = vld [vmem:[%s939_s2] ss:$0 sm:$0xff] }
   0xd   :  { %647 = vmatpush3.bf16.msra.mxu0 %v644_v8 }
   0xe   :  { %649 = vmatprep.subr.bf16.mxu0 %v648_v12 }
  0x11   :  { %651 = vmatpush3.bf16.msra.mxu0 %v648_v12 }
  0x12   :  { %653 = vmatprep.subr.bf16.mxu0 %v652_v15 }
  0x15   :  { %655 = vmatpush3.bf16.msra.mxu0 %v652_v15 }
  0x16   :  { %657 = vmatprep.subr.bf16.mxu0 %v656_v18 }
  0x19   :  { %659 = vmatpush3.bf16.msra.mxu0 %v656_v18 }
  0x1a   :  { %661 = vmatprep.subr.bf16.mxu0 %v660_v21 }
  0x1d   :  { %663 = vmatpush3.bf16.msra.mxu0 %v660_v21 }
  0x1e   :  { %665 = vmatprep.subr.bf16.mxu0 %v664_v24 }
  0x21   :  { %667 = vmatpush3.bf16.msra.mxu0 %v664_v24 }
  0x22   :  { %581 = vmatprep.subr.bf16.mxu0 %v695_v40 }
  0x24   :  { %538 = vmatmul.mubr.f32.vlgmr.msra.gmra.mrb[0].mxu0 %v32_v25 }
  0x25   :  { %540 = vmatprep.mubr.f32.mxu0 %v33_v26 }
  0x28   :  { %541 = vmatmul.mubr.f32.gmra.mrb[2].mxu0 %v34_v27 }
  0x29   :  { %543 = vmatprep.mubr.f32.mxu0 %v35_v28 }
  0x2c   :  { %544 = vmatmul.mubr.f32.gmra.mrb[4].mxu0 %v36_v29 }
  0x2d   :  { %546 = vmatprep.mubr.f32.mxu0 %v37_v30 }
  0x30   :  { %547 = vmatmul.mubr.f32.gmra.mrb[6].mxu0 %v38_v31 }
  0x31   :  { %549 = vmatprep.mubr.f32.mxu0 %v39_v32 }
  0x34   :  { %550 = vmatmul.mubr.f32.gmra.mrb[8].mxu0 %v40_v33  ;;  %v338_v33 = vld [vmem:[%s940_s5] sm:$0xff] }
  0x35   :  { %552 = vmatprep.mubr.f32.mxu0 %v41_v34  ;;  %v339_v34 = vld [vmem:[%s940_s5 + $0x8] sm:$0xff] }
  0x38   :  { %553 = vmatmul.mubr.f32.gmra.mrb[10].mxu0 %v42_v35 }
  0x39   :  { %555 = vmatprep.mubr.f32.mxu0 %v43_v36  ;;  %v255_v36 = vld [vmem:[%s941_s3] sm:$0xf] }
  0x3c   :  { %556 = vmatmul.mubr.f32.gmra.mrb[12].mxu0 %v44_v37  ;;  %v296_v37 = vld [vmem:[%s942_s4] sm:$0xf] }
  0x3d   :  { %558 = vmatprep.mubr.f32.mxu0 %v45_v38  ;;  %v669_v38 = vpack.c.bf16 %v339_v34, %v338_v33 }
  0x40   :  { %559 = vmatmul.mubr.f32.gmra.mrb[14].mxu0 %v46_v39  ;;  %v697_v39 = vmov 0.0|0.0  }
  0x41   :  { %597 = vmatprep.mubr.msk.bf16.mxu0 %vm696_vm0, %v695_v40 }
  0xf7   :  { %v539_v42 = vpop.f32.mrb[0].mxu0 }
  0xf8   :  { %v142_v43 = vadd.f32 %v539_v42, %v843_v41  ;;  %v136_v44 = vpop.f32.mrb[1].mxu0  ;;  %v341_v42 = vld [vmem:[%s940_s5 + $0x18] sm:$0xff] }
  0xf9   :  { %v137_v45 = vadd.f32 %v843_v41, %v136_v44  ;;  %v342_v44 = vld [vmem:[%s940_s5 + $0x20] sm:$0xff] }
  0xfa   :  { %v216_v46 = vmax.f32 %v142_v43, 0.0 }
  0xfb   :  { %v215_v47 = vmax.f32 %v137_v45, 0.0  ;;  %v542_v48 = vpop.f32.mrb[2].mxu0  ;;  %v343_v45 = vld [vmem:[%s940_s5 + $0x28] sm:$0xff] }
  0xfc   :  { %v152_v49 = vadd.f32 %v542_v48, %v843_v41  ;;  %v146_v50 = vpop.f32.mrb[3].mxu0 }
  0xfd   :  { %v147_v51 = vadd.f32 %v843_v41, %v146_v50  ;;  %v231_v52 = vpack.c.bf16 %v216_v46, %v215_v47  ;;  %v675_v46 = vpack.c.bf16 %v343_v45, %v342_v44  ;;  %v344_v47 = vld [vmem:[%s940_s5 + $0x30] sm:$0xff]  ;;  %v347_v50 = vld [vmem:[%s940_s5 + $0x48] sm:$0xff] }
  0xfe   :  { %v218_v53 = vmax.f32 %v152_v49, 0.0  ;;  %v346_v49 = vld [vmem:[%s940_s5 + $0x40] sm:$0xff] }
  0xff   :  { %v217_v54 = vmax.f32 %v147_v51, 0.0  ;;  %v545_v55 = vpop.f32.mrb[4].mxu0  ;;  %562 = vmatpush3.bf16.msra.mxu1 %v231_v52  ;;  %582 = vmatpush3.bf16.msra.mxu0 %v231_v52  ;;  %v681_v51 = vpack.c.bf16 %v347_v50, %v346_v49  ;;  %v348_v52 = vld [vmem:[%s940_s5 + $0x50] sm:$0xff] }
 0x100   :  { %v162_v56 = vadd.f32 %v545_v55, %v843_v41  ;;  %v156_v57 = vpop.f32.mrb[5].mxu0  ;;  %563 = vmatprep.subr.bf16.mxu1 %v695_v40  ;;  %583 = vmatprep.subr.bf16.mxu0 %v695_v40  ;;  %v350_v55 = vld [vmem:[%s940_s5 + $0x60] sm:$0xff] }
 0x101   :  { %v232_v58 = vpack.c.bf16 %v218_v53, %v217_v54  ;;  %v157_v59 = vadd.f32 %v843_v41, %v156_v57  ;;  %v349_v53 = vld [vmem:[%s940_s5 + $0x58] sm:$0xff] }
 0x102   :  { %v220_v60 = vmax.f32 %v162_v56, 0.0  ;;  %v684_v54 = vpack.c.bf16 %v349_v53, %v348_v52  ;;  %v351_v56 = vld [vmem:[%s940_s5 + $0x68] sm:$0xff] }
 0x103   :  { %v219_v61 = vmax.f32 %v157_v59, 0.0  ;;  %v548_v62 = vpop.f32.mrb[6].mxu0  ;;  %564 = vmatpush3.bf16.msra.mxu1 %v232_v58  ;;  %584 = vmatpush3.bf16.msra.mxu0 %v232_v58  ;;  %v687_v57 = vpack.c.bf16 %v351_v56, %v350_v55  ;;  %v352_v58 = vld [vmem:[%s940_s5 + $0x70] sm:$0xff]  ;;  %v353_v59 = vld [vmem:[%s940_s5 + $0x78] sm:$0xff] }
 0x104   :  { %v172_v63 = vadd.f32 %v548_v62, %v843_v41  ;;  %v166_v0 = vpop.f32.mrb[7].mxu0  ;;  %565 = vmatprep.subr.bf16.mxu1 %v695_v40  ;;  %585 = vmatprep.subr.bf16.mxu0 %v695_v40 }
 0x105   :  { %v233_v1 = vpack.c.bf16 %v220_v60, %v219_v61  ;;  %v167_v2 = vadd.f32 %v843_v41, %v166_v0  ;;  %v690_v60 = vpack.c.bf16 %v353_v59, %v352_v58 }
 0x106   :  { %v222_v3 = vmax.f32 %v172_v63, 0.0 }
 0x107   :  { %v221_v4 = vmax.f32 %v167_v2, 0.0  ;;  %v551_v5 = vpop.f32.mrb[8].mxu0  ;;  %566 = vmatpush3.bf16.msra.mxu1 %v233_v1  ;;  %586 = vmatpush3.bf16.msra.mxu0 %v233_v1 }
 0x108   :  { %v182_v6 = vadd.f32 %v551_v5, %v843_v41  ;;  %v176_v7 = vpop.f32.mrb[9].mxu0  ;;  %567 = vmatprep.subr.bf16.mxu1 %v695_v40  ;;  %587 = vmatprep.subr.bf16.mxu0 %v695_v40 }
 0x109   :  { %v234_v8 = vpack.c.bf16 %v222_v3, %v221_v4  ;;  %v177_v9 = vadd.f32 %v843_v41, %v176_v7 }
 0x10a   :  { %v224_v10 = vmax.f32 %v182_v6, 0.0  ;;  %v437_v6 = vld [vmem:[%s943_s6] ss:$0 sm:$0xff] }
 0x10b   :  { %v223_v11 = vmax.f32 %v177_v9, 0.0  ;;  %v554_v12 = vpop.f32.mrb[10].mxu0  ;;  %568 = vmatpush3.bf16.msra.mxu1 %v234_v8  ;;  %588 = vmatpush3.bf16.msra.mxu0 %v234_v8 }
 0x10c   :  { %v192_v13 = vadd.f32 %v554_v12, %v843_v41  ;;  %v186_v14 = vpop.f32.mrb[11].mxu0  ;;  %569 = vmatprep.subr.bf16.mxu1 %v695_v40  ;;  %589 = vmatprep.subr.bf16.mxu0 %v695_v40 }
 0x10d   :  { %v235_v15 = vpack.c.bf16 %v224_v10, %v223_v11  ;;  %v187_v16 = vadd.f32 %v843_v41, %v186_v14 }
 0x10e   :  { %v226_v17 = vmax.f32 %v192_v13, 0.0 }
 0x10f   :  { %v225_v18 = vmax.f32 %v187_v16, 0.0  ;;  %v557_v19 = vpop.f32.mrb[12].mxu0  ;;  %570 = vmatpush3.bf16.msra.mxu1 %v235_v15  ;;  %590 = vmatpush3.bf16.msra.mxu0 %v235_v15 }
 0x110   :  { %v202_v20 = vadd.f32 %v557_v19, %v843_v41  ;;  %v196_v21 = vpop.f32.mrb[13].mxu0  ;;  %571 = vmatprep.subr.bf16.mxu1 %v695_v40  ;;  %591 = vmatprep.subr.bf16.mxu0 %v695_v40 }
 0x111   :  { %v236_v22 = vpack.c.bf16 %v226_v17, %v225_v18  ;;  %v197_v23 = vadd.f32 %v843_v41, %v196_v21 }
 0x112   :  { %v228_v24 = vmax.f32 %v202_v20, 0.0 }
 0x113   :  { %v227_v25 = vmax.f32 %v197_v23, 0.0  ;;  %v560_v26 = vpop.f32.mrb[14].mxu0  ;;  %572 = vmatpush3.bf16.msra.mxu1 %v236_v22  ;;  %592 = vmatpush3.bf16.msra.mxu0 %v236_v22 }
 0x114   :  { %v212_v27 = vadd.f32 %v560_v26, %v843_v41  ;;  %v206_v28 = vpop.f32.mrb[15].mxu0  ;;  %573 = vmatprep.subr.bf16.mxu1 %v695_v40  ;;  %593 = vmatprep.subr.bf16.mxu0 %v695_v40 }
 0x115   :  { %v237_v29 = vpack.c.bf16 %v228_v24, %v227_v25  ;;  %v207_v30 = vadd.f32 %v843_v41, %v206_v28  ;;  %v340_v41 = vld [vmem:[%s940_s5 + $0x10] sm:$0xff] }
 0x116   :  { %v230_v31 = vmax.f32 %v212_v27, 0.0  ;;  %v672_v43 = vpack.c.bf16 %v341_v42, %v340_v41 }
 0x117   :  { %v229_v32 = vmax.f32 %v207_v30, 0.0  ;;  %574 = vmatpush3.bf16.msra.mxu1 %v237_v29  ;;  %594 = vmatpush3.bf16.msra.mxu0 %v237_v29 }
 0x118   :  { %575 = vmatprep.subr.bf16.mxu1 %v695_v40  ;;  %595 = vmatprep.subr.bf16.mxu0 %v695_v40 }
 0x119   :  { %v238_v35 = vpack.c.bf16 %v230_v31, %v229_v32 }
 0x11b   :  { %576 = vmatpush3.bf16.msra.mxu1 %v238_v35  ;;  %596 = vmatpush3.bf16.msra.mxu0 %v238_v35 }
 0x11c   :  { %668 = vmatprep.subr.bf16.mxu1 %v697_v39 }
 0x11e   :  { %578 = vmatmul.mubr.bf16.vlgmr.msra.gmra.mrb[0].mxu1 %v255_v36  ;;  %598 = vmatmul.mubr.bf16.vlgmr.msra.gmra.mrb[16].mxu0 %v296_v37 }
 0x11f   :  { %670 = vmatpush3.bf16.msra.mxu1 %v669_v38  ;;  %633 = vmatprep.mubr.msk.f32.mxu1 %vm696_vm0, %v695_v40  ;;  %v345_v40 = vld [vmem:[%s940_s5 + $0x38] sm:$0xff] }
 0x120   :  { %671 = vmatprep.subr.bf16.mxu1 %v697_v39  ;;  %v678_v48 = vpack.c.bf16 %v345_v40, %v344_v47 }
 0x123   :  { %673 = vmatpush3.bf16.msra.mxu1 %v672_v43 }
 0x124   :  { %674 = vmatprep.subr.bf16.mxu1 %v697_v39 }
 0x127   :  { %676 = vmatpush3.bf16.msra.mxu1 %v675_v46 }
 0x128   :  { %677 = vmatprep.subr.bf16.mxu1 %v697_v39 }
 0x12b   :  { %679 = vmatpush3.bf16.msra.mxu1 %v678_v48 }
 0x12c   :  { %680 = vmatprep.subr.bf16.mxu1 %v697_v39 }
 0x12f   :  { %682 = vmatpush3.bf16.msra.mxu1 %v681_v51 }
 0x130   :  { %683 = vmatprep.subr.bf16.mxu1 %v697_v39 }
 0x133   :  { %685 = vmatpush3.bf16.msra.mxu1 %v684_v54 }
 0x134   :  { %686 = vmatprep.subr.bf16.mxu1 %v697_v39 }
 0x137   :  { %688 = vmatpush3.bf16.msra.mxu1 %v687_v57 }
 0x138   :  { %689 = vmatprep.subr.bf16.mxu1 %v697_v39 }
 0x13b   :  { %691 = vmatpush3.bf16.msra.mxu1 %v690_v60 }
 0x1f1   :  { %v290_v61 = vpop.f32.mrb[0].mxu1  ;;  %v331_v62 = vpop.f32.mrb[16].mxu0 }
 0x1f2   :  { %v337_v63 = vmul.f32 %v331_v62, %v290_v61  ;;  %v579_v0 = vpop.f32.mrb[1].mxu1  ;;  %v599_v1 = vpop.f32.mrb[17].mxu0 }
 0x1f3   :  { %v293_v2 = vpop.f32.mrb[2].mxu1  ;;  %v334_v3 = vpop.f32.mrb[18].mxu0 }
 0x1f4   :  { %v580_v4 = vpop.f32.mrb[3].mxu1  ;;  %v600_v5 = vpop.f32.mrb[19].mxu0  ;;  %634 = vmatmul.mubr.f32.vlgmr.msra.gmra.mrb[4].mxu1 %v337_v63 }
 0x2c7   :  { %v427_v7 = vpop.f32.mrb[4].mxu1 }
 0x2c8   :  { %v428_v8 = vadd.f32 %v437_v6, %v427_v7  ;;  %v635_v9 = vpop.f32.mrb[5].mxu1 }
 0x2ca   :  { %431 = vst [vmem:[%s944_s7] sm:$0xff] %v428_v8 }

// kernel: gine_forward.4
= control target key start
LH: loop header
LB: loop body
LE: loop exit
PB: predicated region body
PF: predicated region fallthrough
CT: control target
= control target key end

     0   :  { %s2343_s5 = inlined_call_operand.vmem [shape: f32[128,128], index: 5, kind: input, shape index: {}]   ;;  %s2344_s1 = inlined_call_operand.vmem [shape: f32[128,128], index: 1, kind: input, shape index: {}]   ;;  %s2345_s7 = inlined_call_operand.vmem [shape: f32[128,128], index: 7, kind: input, shape index: {}]   ;;  %s2346_s4 = inlined_call_operand.vmem [shape: f32[128,128], index: 4, kind: input, shape index: {}]   ;;  %s2347_s2 = inlined_call_operand.vmem [shape: bf16[128,128], index: 2, kind: input, shape index: {}]   ;;  %s2348_s6 = inlined_call_operand.vmem [shape: f32[1,128], index: 6, kind: input, shape index: {}]   ;;  %s2349_s3 = inlined_call_operand.vmem [shape: bf16[128,128], index: 3, kind: input, shape index: {}]   ;;  %s2350_s9 = inlined_call_operand.vmem [shape: f32[128,128], index: 9, kind: input, shape index: {}]   ;;  %s2351_s8 = inlined_call_operand.vmem [shape: f32[1,128], index: 8, kind: input, shape index: {}]   ;;  %s2352_s0 = inlined_call_operand.<no memory space> [shape: f32[1,1], index: 0, kind: input, shape index: {}]   ;;  %s2353_s10 = inlined_call_operand.vmem [shape: f32[1,128], index: 10, kind: input, shape index: {}]   ;;  %s2354_s11 = inlined_call_operand.vmem [shape: f32[1,128], index: 11, kind: input, shape index: {}]   ;;  %s2355_s12 = inlined_call_operand.vmem [shape: f32[1,128], index: 12, kind: input, shape index: {}]   ;;  %s2356_s13 = inlined_call_operand.vmem [shape: f32[128,128], index: 13, kind: output, shape index: {}]  }
   0x1   :  { %v82_v0 = vld [vmem:[%s2343_s5] sm:$0xff]  ;;  %v83_v1 = vld [vmem:[%s2343_s5 + $0x8] sm:$0xff]  ;;  %v84_v2 = vld [vmem:[%s2343_s5 + $0x10] sm:$0xff] }
   0x2   :  { %v1568_v3 = vpack.c.bf16 %v83_v1, %v82_v0  ;;  %v85_v4 = vld [vmem:[%s2343_s5 + $0x18] sm:$0xff]  ;;  %v86_v6 = vld [vmem:[%s2343_s5 + $0x20] sm:$0xff]  ;;  %v87_v7 = vld [vmem:[%s2343_s5 + $0x28] sm:$0xff] }
   0x3   :  { %v1572_v5 = vpack.c.bf16 %v85_v4, %v84_v2  ;;  %v1576_v8 = vpack.c.bf16 %v87_v7, %v86_v6  ;;  %v66_v9 = vld [vmem:[%s2344_s1] sm:$0xff]  ;;  %v88_v10 = vld [vmem:[%s2343_s5 + $0x30] sm:$0xff]  ;;  %v89_v11 = vld [vmem:[%s2343_s5 + $0x38] sm:$0xff] }
   0x4   :  { %1569 = vmatprep.subr.bf16.mxu0 %v1568_v3  ;;  %1368 = vmatprep.mubr.f32.mxu0 %v66_v9  ;;  %v1580_v12 = vpack.c.bf16 %v89_v11, %v88_v10  ;;  %v90_v13 = vld [vmem:[%s2343_s5 + $0x40] sm:$0xff]  ;;  %v91_v14 = vld [vmem:[%s2343_s5 + $0x48] sm:$0xff]  ;;  %v268_v18 = vld [vmem:[%s2345_s7 + $0x10] sm:$0xff] }
   0x5   :  { %1571 = vmatpush3.bf16.msra.mxu0 %v1568_v3  ;;  %v266_v15 = vld [vmem:[%s2345_s7] sm:$0xff]  ;;  %v267_v16 = vld [vmem:[%s2345_s7 + $0x8] sm:$0xff]  ;;  %v1584_v19 = vpack.c.bf16 %v91_v14, %v90_v13  ;;  %v92_v20 = vld [vmem:[%s2343_s5 + $0x50] sm:$0xff] }
   0x6   :  { %1573 = vmatprep.subr.bf16.mxu0 %v1572_v5  ;;  %v1600_v17 = vpack.c.bf16 %v267_v16, %v266_v15  ;;  %v269_v21 = vld [vmem:[%s2345_s7 + $0x18] sm:$0xff]  ;;  %v270_v24 = vld [vmem:[%s2345_s7 + $0x20] sm:$0xff]  ;;  %v271_v25 = vld [vmem:[%s2345_s7 + $0x28] sm:$0xff] }
   0x7   :  { %v93_v22 = vld [vmem:[%s2343_s5 + $0x58] sm:$0xff]  ;;  %v1604_v23 = vpack.c.bf16 %v269_v21, %v268_v18  ;;  %v1608_v26 = vpack.c.bf16 %v271_v25, %v270_v24  ;;  %v272_v28 = vld [vmem:[%s2345_s7 + $0x30] sm:$0xff]  ;;  %v94_v30 = vld [vmem:[%s2343_s5 + $0x60] sm:$0xff] }
   0x8   :  { %1601 = vmatprep.subr.bf16.mxu1 %v1600_v17  ;;  %v1588_v27 = vpack.c.bf16 %v93_v22, %v92_v20  ;;  %v273_v29 = vld [vmem:[%s2345_s7 + $0x38] sm:$0xff]  ;;  %v95_v31 = vld [vmem:[%s2343_s5 + $0x68] sm:$0xff]  ;;  %v274_v34 = vld [vmem:[%s2345_s7 + $0x40] sm:$0xff] }
   0x9   :  { %1575 = vmatpush3.bf16.msra.mxu0 %v1572_v5  ;;  %1603 = vmatpush3.bf16.msra.mxu1 %v1600_v17  ;;  %v1612_v32 = vpack.c.bf16 %v273_v29, %v272_v28  ;;  %v1592_v33 = vpack.c.bf16 %v95_v31, %v94_v30  ;;  %v275_v35 = vld [vmem:[%s2345_s7 + $0x48] sm:$0xff]  ;;  %v96_v36 = vld [vmem:[%s2343_s5 + $0x70] sm:$0xff]  ;;  %v97_v37 = vld [vmem:[%s2343_s5 + $0x78] sm:$0xff] }
   0xa   :  { %1577 = vmatprep.subr.bf16.mxu0 %v1576_v8  ;;  %1605 = vmatprep.subr.bf16.mxu1 %v1604_v23  ;;  %v1616_v38 = vpack.c.bf16 %v275_v35, %v274_v34  ;;  %v1596_v39 = vpack.c.bf16 %v97_v37, %v96_v36  ;;  %v276_v40 = vld [vmem:[%s2345_s7 + $0x50] sm:$0xff]  ;;  %v277_v41 = vld [vmem:[%s2345_s7 + $0x58] sm:$0xff]  ;;  %v1856_v42 = vld [vmem:[%s2346_s4] sm:$0xff] }
   0xb   :  { %v1861_v43 = vld [vmem:[%s2346_s4 + $0x8] sm:$0xff]  ;;  %v1620_v44 = vpack.c.bf16 %v277_v41, %v276_v40  ;;  %v1868_v46 = vld [vmem:[%s2346_s4 + $0x10] sm:$0xff]  ;;  %v1873_v47 = vld [vmem:[%s2346_s4 + $0x18] sm:$0xff] }
   0xc   :  { %v482_v45 = vpack.c.bf16 %v1861_v43, %v1856_v42  ;;  %v278_v48 = vld [vmem:[%s2345_s7 + $0x60] sm:$0xff]  ;;  %v279_v49 = vld [vmem:[%s2345_s7 + $0x68] sm:$0xff]  ;;  %v68_v51 = vld [vmem:[%s2344_s1 + $0x10] sm:$0xff]  ;;  %v483_v52 = vpack.c.bf16 %v1873_v47, %v1868_v46 }
   0xd   :  { %1579 = vmatpush3.bf16.msra.mxu0 %v1576_v8  ;;  %1607 = vmatpush3.bf16.msra.mxu1 %v1604_v23  ;;  %v67_v50 = vld [vmem:[%s2344_s1 + $0x8] sm:$0xff]  ;;  %v1624_v53 = vpack.c.bf16 %v279_v49, %v278_v48  ;;  %v1892_v54 = vld [vmem:[%s2346_s4 + $0x20] sm:$0xff]  ;;  %v69_v56 = vld [vmem:[%s2344_s1 + $0x18] sm:$0xff] }
   0xe   :  { %1581 = vmatprep.subr.bf16.mxu0 %v1580_v12  ;;  %1609 = vmatprep.subr.bf16.mxu1 %v1608_v26  ;;  %v1897_v55 = vld [vmem:[%s2346_s4 + $0x28] sm:$0xff]  ;;  %v70_v57 = vld [vmem:[%s2344_s1 + $0x20] sm:$0xff]  ;;  %v1910_v59 = vld [vmem:[%s2346_s4 + $0x30] sm:$0xff] }
   0xf   :  { %v484_v58 = vpack.c.bf16 %v1897_v55, %v1892_v54  ;;  %v1915_v60 = vld [vmem:[%s2346_s4 + $0x38] sm:$0xff]  ;;  %v71_v61 = vld [vmem:[%s2344_s1 + $0x28] sm:$0xff]  ;;  %v72_v62 = vld [vmem:[%s2344_s1 + $0x30] sm:$0xff] }
  0x10   :  { %v485_v63 = vpack.c.bf16 %v1915_v60, %v1910_v59  ;;  %v1928_v0 = vld [vmem:[%s2346_s4 + $0x40] sm:$0xff]  ;;  %v1933_v1 = vld [vmem:[%s2346_s4 + $0x48] sm:$0xff]  ;;  %v73_v2 = vld [vmem:[%s2344_s1 + $0x38] sm:$0xff] }
  0x11   :  { %1583 = vmatpush3.bf16.msra.mxu0 %v1580_v12  ;;  %1611 = vmatpush3.bf16.msra.mxu1 %v1608_v26  ;;  %v74_v3 = vld [vmem:[%s2344_s1 + $0x40] sm:$0xff]  ;;  %v486_v4 = vpack.c.bf16 %v1933_v1, %v1928_v0  ;;  %v1946_v5 = vld [vmem:[%s2346_s4 + $0x50] sm:$0xff]  ;;  %v1951_v6 = vld [vmem:[%s2346_s4 + $0x58] sm:$0xff] }
  0x12   :  { %1585 = vmatprep.subr.bf16.mxu0 %v1584_v19  ;;  %1613 = vmatprep.subr.bf16.mxu1 %v1612_v32  ;;  %v75_v7 = vld [vmem:[%s2344_s1 + $0x48] sm:$0xff]  ;;  %v76_v8 = vld [vmem:[%s2344_s1 + $0x50] sm:$0xff]  ;;  %v487_v9 = vpack.c.bf16 %v1951_v6, %v1946_v5  ;;  %v1964_v10 = vld [vmem:[%s2346_s4 + $0x60] sm:$0xff] }
  0x13   :  { %v1969_v11 = vld [vmem:[%s2346_s4 + $0x68] sm:$0xff]  ;;  %v77_v12 = vld [vmem:[%s2344_s1 + $0x58] sm:$0xff]  ;;  %v78_v13 = vld [vmem:[%s2344_s1 + $0x60] sm:$0xff] }
  0x14   :  { %v488_v14 = vpack.c.bf16 %v1969_v11, %v1964_v10  ;;  %v79_v15 = vld [vmem:[%s2344_s1 + $0x68] sm:$0xff]  ;;  %v80_v16 = vld [vmem:[%s2344_s1 + $0x70] sm:$0xff]  ;;  %v81_v17 = vld [vmem:[%s2344_s1 + $0x78] sm:$0xff] }
  0x15   :  { %1587 = vmatpush3.bf16.msra.mxu0 %v1584_v19  ;;  %1615 = vmatpush3.bf16.msra.mxu1 %v1612_v32  ;;  %v1991_v18 = vld [vmem:[%s2346_s4 + $0x70] sm:$0xff]  ;;  %v1996_v19 = vld [vmem:[%s2346_s4 + $0x78] sm:$0xff]  ;;  %v1680_v24 = vld [vmem:[%s2347_s2] sm:$0xff]  }
  0x16   :  { %1589 = vmatprep.subr.bf16.mxu0 %v1588_v27  ;;  %1617 = vmatprep.subr.bf16.mxu1 %v1616_v38  ;;  %v489_v20 = vpack.c.bf16 %v1996_v19, %v1991_v18  ;;  %v280_v21 = vld [vmem:[%s2345_s7 + $0x70] sm:$0xff]  ;;  %v281_v22 = vld [vmem:[%s2345_s7 + $0x78] sm:$0xff]  ;;  %v1681_v25 = vld [vmem:[%s2347_s2 + $0x8] sm:$0xff]  }
  0x17   :  { %v1628_v23 = vpack.c.bf16 %v281_v22, %v280_v21  ;;  %v1682_v26 = vld [vmem:[%s2347_s2 + $0x10] sm:$0xff]   ;;  %v1684_v28 = vld [vmem:[%s2347_s2 + $0x20] sm:$0xff]   ;;  %v1685_v29 = vld [vmem:[%s2347_s2 + $0x28] sm:$0xff]  }
  0x18   :  { %v1686_v30 = vld [vmem:[%s2347_s2 + $0x30] sm:$0xff]   ;;  %v1687_v31 = vld [vmem:[%s2347_s2 + $0x38] sm:$0xff]   ;;  %v1187_v32 = vld [vmem:[%s2348_s6] ss:$0 sm:$0xff] }
  0x19   :  { %1591 = vmatpush3.bf16.msra.mxu0 %v1588_v27  ;;  %1619 = vmatpush3.bf16.msra.mxu1 %v1616_v38  ;;  %v1683_v27 = vld [vmem:[%s2347_s2 + $0x18] sm:$0xff]  }
  0x1a   :  { %1593 = vmatprep.subr.bf16.mxu0 %v1592_v33  ;;  %1621 = vmatprep.subr.bf16.mxu1 %v1620_v44 }
  0x1d   :  { %1595 = vmatpush3.bf16.msra.mxu0 %v1592_v33  ;;  %1623 = vmatpush3.bf16.msra.mxu1 %v1620_v44 }
  0x1e   :  { %1597 = vmatprep.subr.bf16.mxu0 %v1596_v39  ;;  %1625 = vmatprep.subr.bf16.mxu1 %v1624_v53 }
  0x21   :  { %1599 = vmatpush3.bf16.msra.mxu0 %v1596_v39  ;;  %1627 = vmatpush3.bf16.msra.mxu1 %v1624_v53 }
  0x22   :  { %1448 = vmatprep.subr.bf16.mxu0 %v482_v45  ;;  %1629 = vmatprep.subr.bf16.mxu1 %v1628_v23 }
  0x24   :  { %1369 = vmatmul.mubr.f32.vlgmr.msra.gmra.mrb[0].mxu0 %v67_v50 }
  0x25   :  { %1371 = vmatprep.mubr.f32.mxu0 %v68_v51  ;;  %1449 = vmatpush3.bf16.msra.mxu0 %v482_v45 }
  0x26   :  { %1450 = vmatprep.subr.bf16.mxu0 %v483_v52  ;;  %1631 = vmatpush3.bf16.msra.mxu1 %v1628_v23 }
  0x28   :  { %1372 = vmatmul.mubr.f32.gmra.mrb[2].mxu0 %v69_v56 }
  0x29   :  { %1374 = vmatprep.mubr.f32.mxu0 %v70_v57  ;;  %1451 = vmatpush3.bf16.msra.mxu0 %v483_v52 }
  0x2a   :  { %1452 = vmatprep.subr.bf16.mxu0 %v484_v58 }
  0x2c   :  { %1375 = vmatmul.mubr.f32.gmra.mrb[4].mxu0 %v71_v61 }
  0x2d   :  { %1377 = vmatprep.mubr.f32.mxu0 %v72_v62  ;;  %1453 = vmatpush3.bf16.msra.mxu0 %v484_v58 }
  0x2e   :  { %1454 = vmatprep.subr.bf16.mxu0 %v485_v63 }
  0x30   :  { %1378 = vmatmul.mubr.f32.gmra.mrb[6].mxu0 %v73_v2 }
  0x31   :  { %1380 = vmatprep.mubr.f32.mxu0 %v74_v3  ;;  %1455 = vmatpush3.bf16.msra.mxu0 %v485_v63 }
  0x32   :  { %1456 = vmatprep.subr.bf16.mxu0 %v486_v4 }
  0x34   :  { %1381 = vmatmul.mubr.f32.gmra.mrb[8].mxu0 %v75_v7 }
  0x35   :  { %1383 = vmatprep.mubr.f32.mxu0 %v76_v8  ;;  %1457 = vmatpush3.bf16.msra.mxu0 %v486_v4 }
  0x36   :  { %1458 = vmatprep.subr.bf16.mxu0 %v487_v9 }
  0x38   :  { %1384 = vmatmul.mubr.f32.gmra.mrb[10].mxu0 %v77_v12 }
  0x39   :  { %1386 = vmatprep.mubr.f32.mxu0 %v78_v13  ;;  %1459 = vmatpush3.bf16.msra.mxu0 %v487_v9 }
  0x3a   :  { %1460 = vmatprep.subr.bf16.mxu0 %v488_v14 }
  0x3c   :  { %1387 = vmatmul.mubr.f32.gmra.mrb[12].mxu0 %v79_v15 }
  0x3d   :  { %1389 = vmatprep.mubr.f32.mxu0 %v80_v16  ;;  %1461 = vmatpush3.bf16.msra.mxu0 %v488_v14 }
  0x3e   :  { %1462 = vmatprep.subr.bf16.mxu0 %v489_v20 }
  0x40   :  { %1390 = vmatmul.mubr.f32.gmra.mrb[14].mxu0 %v81_v17 }
  0x41   :  { %1463 = vmatpush3.bf16.msra.mxu0 %v489_v20  ;;  %1464 = vmatprep.mubr.bf16.mxu0 %v1680_v24 }
  0x44   :  { %1465 = vmatmul.mubr.bf16.vlgmr.msra.gmra.mrb[16].mxu0 %v1681_v25 }
  0x45   :  { %1468 = vmatprep.mubr.bf16.mxu0 %v1682_v26 }
  0x4c   :  { %1469 = vmatmul.mubr.bf16.gmra.mrb[20].mxu0 %v1683_v27 }
  0x4d   :  { %1472 = vmatprep.mubr.bf16.mxu0 %v1684_v28 }
  0x54   :  { %1473 = vmatmul.mubr.bf16.gmra.mrb[24].mxu0 %v1685_v29 }
  0x55   :  { %1476 = vmatprep.mubr.bf16.mxu0 %v1686_v30 }
  0x5c   :  { %1477 = vmatmul.mubr.bf16.gmra.mrb[28].mxu0 %v1687_v31 }
  0xf7   :  { %v1370_v33 = vpop.f32.mrb[0].mxu0 }
  0xf8   :  { %v177_v34 = vadd.f32 %v1370_v33, %v1187_v32  ;;  %v171_v35 = vpop.f32.mrb[1].mxu0 }
  0xf9   :  { %v172_v36 = vadd.f32 %v1187_v32, %v171_v35 }
  0xfa   :  { %v251_v39 = vmax.f32 %v177_v34, 0.0 }
  0xfb   :  { %v1373_v37 = vpop.f32.mrb[2].mxu0  ;;  %v250_v38 = vmax.f32 %v172_v36, 0.0 }
  0xfc   :  { %v187_v40 = vadd.f32 %v1373_v37, %v1187_v32  ;;  %v181_v41 = vpop.f32.mrb[3].mxu0 }
  0xfd   :  { %v182_v44 = vadd.f32 %v1187_v32, %v181_v41  ;;  %1424 = vmatprep.mubr.f32.mxu1 %v250_v38 }
  0xfe   :  { %1425 = vmatmul.mubr.f32.vlgmr.msra.gmra.mrb[0].mxu1 %v251_v39  ;;  %v253_v49 = vmax.f32 %v187_v40, 0.0 }
  0xff   :  { %v252_v45 = vmax.f32 %v182_v44, 0.0  ;;  %v1376_v48 = vpop.f32.mrb[4].mxu0 }
 0x100   :  { %v197_v50 = vadd.f32 %v1376_v48, %v1187_v32  ;;  %v191_v51 = vpop.f32.mrb[5].mxu0 }
 0x101   :  { %v192_v52 = vadd.f32 %v1187_v32, %v191_v51  ;;  %1427 = vmatprep.mubr.f32.mxu1 %v252_v45 }
 0x102   :  { %1428 = vmatmul.mubr.f32.gmra.mrb[2].mxu1 %v253_v49  ;;  %v255_v57 = vmax.f32 %v197_v50, 0.0 }
 0x103   :  { %v254_v53 = vmax.f32 %v192_v52, 0.0  ;;  %v1379_v56 = vpop.f32.mrb[6].mxu0 }
 0x104   :  { %v207_v58 = vadd.f32 %v1379_v56, %v1187_v32  ;;  %v201_v61 = vpop.f32.mrb[7].mxu0  ;;  %v937_v56 = vld [vmem:[%s2350_s9] sm:$0xff] }
 0x105   :  { %v202_v62 = vadd.f32 %v1187_v32, %v201_v61  ;;  %1430 = vmatprep.mubr.f32.mxu1 %v254_v53  ;;  %v1688_v53 = vld [vmem:[%s2349_s3] sm:$0xff]  }
 0x106   :  { %1431 = vmatmul.mubr.f32.gmra.mrb[4].mxu1 %v255_v57  ;;  %v257_v3 = vmax.f32 %v207_v58, 0.0  ;;  %v938_v57 = vld [vmem:[%s2350_s9 + $0x8] sm:$0xff]  ;;  %v939_v58 = vld [vmem:[%s2350_s9 + $0x10] sm:$0xff] }
 0x107   :  { %v256_v63 = vmax.f32 %v202_v62, 0.0  ;;  %v1382_v2 = vpop.f32.mrb[8].mxu0  ;;  %v2075_v61 = vpack.c.bf16 %v938_v57, %v937_v56  ;;  %v940_v62 = vld [vmem:[%s2350_s9 + $0x18] sm:$0xff] }
 0x108   :  { %v217_v4 = vadd.f32 %v1382_v2, %v1187_v32  ;;  %v211_v7 = vpop.f32.mrb[9].mxu0  ;;  %v941_v2 = vld [vmem:[%s2350_s9 + $0x20] sm:$0xff] }
 0x109   :  { %v212_v8 = vadd.f32 %v1187_v32, %v211_v7  ;;  %1433 = vmatprep.mubr.f32.mxu1 %v256_v63  ;;  %v2080_v63 = vpack.c.bf16 %v940_v62, %v939_v58  ;;  %1633 = vmatprep.subr.bf16.mxu0 %v2075_v61  ;;  %v943_v7 = vld [vmem:[%s2350_s9 + $0x30] sm:$0xff] }
 0x10a   :  { %1434 = vmatmul.mubr.f32.gmra.mrb[6].mxu1 %v257_v3  ;;  %v259_v13 = vmax.f32 %v217_v4, 0.0  ;;  %v942_v3 = vld [vmem:[%s2350_s9 + $0x28] sm:$0xff]  ;;  %1635 = vmatpush3.bf16.msra.mxu0 %v2075_v61 }
 0x10b   :  { %v258_v9 = vmax.f32 %v212_v8, 0.0  ;;  %v1385_v12 = vpop.f32.mrb[10].mxu0  ;;  %1637 = vmatprep.subr.bf16.mxu0 %v2080_v63  ;;  %v2091_v4 = vpack.c.bf16 %v942_v3, %v941_v2  ;;  %v944_v8 = vld [vmem:[%s2350_s9 + $0x38] sm:$0xff] }
 0x10c   :  { %v227_v14 = vadd.f32 %v1385_v12, %v1187_v32  ;;  %v221_v15 = vpop.f32.mrb[11].mxu0  ;;  %v945_v12 = vld [vmem:[%s2350_s9 + $0x40] sm:$0xff] }
 0x10d   :  { %v222_v16 = vadd.f32 %v1187_v32, %v221_v15  ;;  %1436 = vmatprep.mubr.f32.mxu1 %v258_v9  ;;  %v2101_v9 = vpack.c.bf16 %v944_v8, %v943_v7  ;;  %v947_v15 = vld [vmem:[%s2350_s9 + $0x50] sm:$0xff] }
 0x10e   :  { %1437 = vmatmul.mubr.f32.gmra.mrb[8].mxu1 %v259_v13  ;;  %v261_v21 = vmax.f32 %v227_v14, 0.0  ;;  %1639 = vmatpush3.bf16.msra.mxu0 %v2080_v63  ;;  %v946_v13 = vld [vmem:[%s2350_s9 + $0x48] sm:$0xff] }
 0x10f   :  { %v260_v17 = vmax.f32 %v222_v16, 0.0  ;;  %v1388_v20 = vpop.f32.mrb[12].mxu0  ;;  %1641 = vmatprep.subr.bf16.mxu0 %v2091_v4  ;;  %v2111_v14 = vpack.c.bf16 %v946_v13, %v945_v12  ;;  %v948_v16 = vld [vmem:[%s2350_s9 + $0x58] sm:$0xff] }
 0x110   :  { %v237_v22 = vadd.f32 %v1388_v20, %v1187_v32  ;;  %v231_v23 = vpop.f32.mrb[13].mxu0  ;;  %v949_v20 = vld [vmem:[%s2350_s9 + $0x60] sm:$0xff] }
 0x111   :  { %v232_v24 = vadd.f32 %v1187_v32, %v231_v23  ;;  %1439 = vmatprep.mubr.f32.mxu1 %v260_v17  ;;  %v2121_v17 = vpack.c.bf16 %v948_v16, %v947_v15  ;;  %v2139_v23 = vld [vmem:[%s2351_s8] ss:$0 sm:$0xff] }
 0x112   :  { %1440 = vmatmul.mubr.f32.gmra.mrb[10].mxu1 %v261_v21  ;;  %v263_v27 = vmax.f32 %v237_v22, 0.0  ;;  %1643 = vmatpush3.bf16.msra.mxu0 %v2091_v4  ;;  %v950_v21 = vld [vmem:[%s2350_s9 + $0x68] sm:$0xff] }
 0x113   :  { %v262_v25 = vmax.f32 %v232_v24, 0.0  ;;  %v1391_v26 = vpop.f32.mrb[14].mxu0  ;;  %1645 = vmatprep.subr.bf16.mxu0 %v2101_v9  ;;  %v2131_v22 = vpack.c.bf16 %v950_v21, %v949_v20 }
 0x114   :  { %v247_v28 = vadd.f32 %v1391_v26, %v1187_v32  ;;  %v241_v29 = vpop.f32.mrb[15].mxu0 }
 0x115   :  { %v242_v30 = vadd.f32 %v1187_v32, %v241_v29  ;;  %1442 = vmatprep.mubr.f32.mxu1 %v262_v25 }
 0x116   :  { %1443 = vmatmul.mubr.f32.gmra.mrb[12].mxu1 %v263_v27  ;;  %v265_v33 = vmax.f32 %v247_v28, 0.0  ;;  %1647 = vmatpush3.bf16.msra.mxu0 %v2101_v9 }
 0x117   :  { %v264_v31 = vmax.f32 %v242_v30, 0.0  ;;  %v2033_v34 = vpop.f32.mrb[16].mxu0  ;;  %1649 = vmatprep.subr.bf16.mxu0 %v2111_v14 }
 0x118   :  { %v2035_v35 = vpop.f32.mrb[17].mxu0 }
 0x119   :  { %1445 = vmatprep.mubr.f32.mxu1 %v264_v31  ;;  %v2037_v36 = vpop.f32.mrb[18].mxu0 }
 0x11a   :  { %1446 = vmatmul.mubr.f32.gmra.mrb[14].mxu1 %v265_v33  ;;  %v575_v37 = vpop.f32.mrb[19].mxu0  ;;  %1651 = vmatpush3.bf16.msra.mxu0 %v2111_v14 }
 0x11b   :  { %1496 = vmatprep.mubr.bf16.mxu1 %v1688_v53  ;;  %1653 = vmatprep.subr.bf16.mxu0 %v2121_v17 }
 0x11e   :  { %1655 = vmatpush3.bf16.msra.mxu0 %v2121_v17 }
 0x11f   :  { %v2039_v38 = vpop.f32.mrb[20].mxu0  ;;  %1657 = vmatprep.subr.bf16.mxu0 %v2131_v22 }
 0x120   :  { %v2041_v39 = vpop.f32.mrb[21].mxu0 }
 0x121   :  { %v2043_v40 = vpop.f32.mrb[22].mxu0 }
 0x122   :  { %v2045_v32 = vpop.f32.mrb[23].mxu0  ;;  %1659 = vmatpush3.bf16.msra.mxu0 %v2131_v22 }
 0x127   :  { %v2047_v41 = vpop.f32.mrb[24].mxu0 }
 0x128   :  { %v2049_v44 = vpop.f32.mrb[25].mxu0 }
 0x129   :  { %v2051_v45 = vpop.f32.mrb[26].mxu0 }
 0x12a   :  { %v2053_v48 = vpop.f32.mrb[27].mxu0 }
 0x12f   :  { %v2055_v49 = vpop.f32.mrb[28].mxu0 }
 0x130   :  { %v2057_v50 = vpop.f32.mrb[29].mxu0 }
 0x131   :  { %v2059_v51 = vpop.f32.mrb[30].mxu0 }
 0x132   :  { %v2061_v52 = vpop.f32.mrb[31].mxu0 }
 0x1d1   :  { %v1426_v24 = vpop.f32.mrb[0].mxu1 }
 0x1d2   :  { %v361_v25 = vadd.f32 %v1426_v24, %v2139_v23  ;;  %v355_v26 = vpop.f32.mrb[1].mxu1 }
 0x1d3   :  { %v356_v27 = vadd.f32 %v2139_v23, %v355_v26 }
 0x1d4   :  { %v435_v28 = vmax.f32 %v361_v25, 0.0 }
 0x1d5   :  { %v434_v29 = vmax.f32 %v356_v27, 0.0  ;;  %v1429_v30 = vpop.f32.mrb[2].mxu1 }
 0x1d6   :  { %v576_v31 = vadd.f32 %v575_v37, %v435_v28  ;;  %v371_v33 = vadd.f32 %v1429_v30, %v2139_v23  ;;  %v365_v53 = vpop.f32.mrb[3].mxu1 }
 0x1d7   :  { %v573_v56 = vadd.f32 %v2035_v35, %v434_v29  ;;  %v366_v57 = vadd.f32 %v2139_v23, %v365_v53 }
 0x1d8   :  { %v636_v58 = vmax.f32 %v576_v31, 0.0  ;;  %v437_v62 = vmax.f32 %v371_v33, 0.0 }
 0x1d9   :  { %v635_v2 = vmax.f32 %v573_v56, 0.0  ;;  %v436_v3 = vmax.f32 %v366_v57, 0.0  ;;  %v1432_v7 = vpop.f32.mrb[4].mxu1 }
 0x1da   :  { %v584_v8 = vadd.f32 %v2037_v36, %v437_v62  ;;  %v381_v12 = vadd.f32 %v1432_v7, %v2139_v23  ;;  %v375_v13 = vpop.f32.mrb[5].mxu1 }
 0x1db   :  { %v683_v15 = vpack.c.bf16 %v636_v58, %v635_v2  ;;  %v581_v37 = vadd.f32 %v2033_v34, %v436_v3  ;;  %v376_v16 = vadd.f32 %v2139_v23, %v375_v13 }
 0x1dc   :  { %v638_v20 = vmax.f32 %v584_v8, 0.0  ;;  %v439_v21 = vmax.f32 %v381_v12, 0.0 }
 0x1dd   :  { %v637_v35 = vmax.f32 %v581_v37, 0.0  ;;  %v438_v24 = vmax.f32 %v376_v16, 0.0  ;;  %v1435_v25 = vpop.f32.mrb[6].mxu1  ;;  %1480 = vmatprep.subr.bf16.mxu1 %v683_v15 }
 0x1de   :  { %v592_v26 = vadd.f32 %v2045_v32, %v439_v21  ;;  %v391_v27 = vadd.f32 %v1435_v25, %v2139_v23  ;;  %v385_v28 = vpop.f32.mrb[7].mxu1  ;;  %1481 = vmatpush3.bf16.msra.mxu1 %v683_v15 }
 0x1df   :  { %v589_v36 = vadd.f32 %v2041_v39, %v438_v24  ;;  %v386_v29 = vadd.f32 %v2139_v23, %v385_v28  ;;  %v684_v30 = vpack.c.bf16 %v638_v20, %v637_v35 }
 0x1e0   :  { %v640_v34 = vmax.f32 %v592_v26, 0.0  ;;  %v441_v31 = vmax.f32 %v391_v27, 0.0 }
 0x1e1   :  { %v639_v33 = vmax.f32 %v589_v36, 0.0  ;;  %v440_v53 = vmax.f32 %v386_v29, 0.0  ;;  %v1438_v56 = vpop.f32.mrb[8].mxu1  ;;  %1482 = vmatprep.subr.bf16.mxu1 %v684_v30 }
 0x1e2   :  { %v600_v57 = vadd.f32 %v2043_v40, %v441_v31  ;;  %v401_v58 = vadd.f32 %v1438_v56, %v2139_v23  ;;  %v395_v32 = vpop.f32.mrb[9].mxu1  ;;  %1483 = vmatpush3.bf16.msra.mxu1 %v684_v30 }
 0x1e3   :  { %v685_v62 = vpack.c.bf16 %v640_v34, %v639_v33  ;;  %v597_v2 = vadd.f32 %v2039_v38, %v440_v53  ;;  %v396_v39 = vadd.f32 %v2139_v23, %v395_v32 }
 0x1e4   :  { %v642_v3 = vmax.f32 %v600_v57, 0.0  ;;  %v443_v7 = vmax.f32 %v401_v58, 0.0 }
 0x1e5   :  { %v641_v8 = vmax.f32 %v597_v2, 0.0  ;;  %v442_v12 = vmax.f32 %v396_v39, 0.0  ;;  %v1441_v13 = vpop.f32.mrb[10].mxu1  ;;  %1484 = vmatprep.subr.bf16.mxu1 %v685_v62 }
 0x1e6   :  { %v608_v15 = vadd.f32 %v2053_v48, %v443_v7  ;;  %v411_v37 = vadd.f32 %v1441_v13, %v2139_v23  ;;  %v405_v40 = vpop.f32.mrb[11].mxu1  ;;  %1485 = vmatpush3.bf16.msra.mxu1 %v685_v62 }
 0x1e7   :  { %v605_v16 = vadd.f32 %v2049_v44, %v442_v12  ;;  %v406_v20 = vadd.f32 %v2139_v23, %v405_v40  ;;  %v686_v21 = vpack.c.bf16 %v642_v3, %v641_v8 }
 0x1e8   :  { %v644_v38 = vmax.f32 %v608_v15, 0.0  ;;  %v445_v35 = vmax.f32 %v411_v37, 0.0  ;;  %v1694_v37 = vld [vmem:[%s2349_s3 + $0x30] sm:$0xff]  }
 0x1e9   :  { %v643_v24 = vmax.f32 %v605_v16, 0.0  ;;  %v444_v25 = vmax.f32 %v406_v20, 0.0  ;;  %v1444_v26 = vpop.f32.mrb[12].mxu1  ;;  %1486 = vmatprep.subr.bf16.mxu1 %v686_v21 }
 0x1ea   :  { %v616_v27 = vadd.f32 %v2051_v45, %v445_v35  ;;  %v421_v28 = vadd.f32 %v1444_v26, %v2139_v23  ;;  %v415_v48 = vpop.f32.mrb[13].mxu1  ;;  %1487 = vmatpush3.bf16.msra.mxu1 %v686_v21 }
 0x1eb   :  { %v687_v36 = vpack.c.bf16 %v644_v38, %v643_v24  ;;  %v613_v29 = vadd.f32 %v2047_v41, %v444_v25  ;;  %v416_v44 = vadd.f32 %v2139_v23, %v415_v48 }
 0x1ec   :  { %v646_v30 = vmax.f32 %v616_v27, 0.0  ;;  %v447_v34 = vmax.f32 %v421_v28, 0.0 }
 0x1ed   :  { %v645_v31 = vmax.f32 %v613_v29, 0.0  ;;  %v446_v33 = vmax.f32 %v416_v44, 0.0  ;;  %v1447_v53 = vpop.f32.mrb[14].mxu1  ;;  %1488 = vmatprep.subr.bf16.mxu1 %v687_v36 }
 0x1ee   :  { %v624_v56 = vadd.f32 %v2061_v52, %v447_v34  ;;  %v431_v57 = vadd.f32 %v1447_v53, %v2139_v23  ;;  %v425_v45 = vpop.f32.mrb[15].mxu1  ;;  %1489 = vmatpush3.bf16.msra.mxu1 %v687_v36 }
 0x1ef   :  { %v621_v58 = vadd.f32 %v2057_v50, %v446_v33  ;;  %v426_v32 = vadd.f32 %v2139_v23, %v425_v45  ;;  %v688_v62 = vpack.c.bf16 %v646_v30, %v645_v31  ;;  %v1689_v50 = vld [vmem:[%s2349_s3 + $0x8] sm:$0xff]   ;;  %v1690_v23 = vld [vmem:[%s2349_s3 + $0x10] sm:$0xff]  }
 0x1f0   :  { %v648_v41 = vmax.f32 %v624_v56, 0.0  ;;  %v449_v2 = vmax.f32 %v431_v57, 0.0 }
 0x1f1   :  { %v647_v39 = vmax.f32 %v621_v58, 0.0  ;;  %v448_v3 = vmax.f32 %v426_v32, 0.0  ;;  %1490 = vmatprep.subr.bf16.mxu1 %v688_v62 }
 0x1f2   :  { %v632_v7 = vadd.f32 %v2059_v51, %v449_v2  ;;  %1491 = vmatpush3.bf16.msra.mxu1 %v688_v62  ;;  %v1692_v51 = vld [vmem:[%s2349_s3 + $0x20] sm:$0xff]  }
 0x1f3   :  { %v689_v8 = vpack.c.bf16 %v648_v41, %v647_v39  ;;  %v629_v52 = vadd.f32 %v2055_v49, %v448_v3  ;;  %v1691_v49 = vld [vmem:[%s2349_s3 + $0x18] sm:$0xff]  }
 0x1f4   :  { %v650_v12 = vmax.f32 %v632_v7, 0.0 }
 0x1f5   :  { %v649_v13 = vmax.f32 %v629_v52, 0.0  ;;  %1492 = vmatprep.subr.bf16.mxu1 %v689_v8 }
 0x1f6   :  { %1493 = vmatpush3.bf16.msra.mxu1 %v689_v8 }
 0x1f7   :  { %v690_v15 = vpack.c.bf16 %v650_v12, %v649_v13 }
 0x1f9   :  { %1494 = vmatprep.subr.bf16.mxu1 %v690_v15 }
 0x1fa   :  { %1495 = vmatpush3.bf16.msra.mxu1 %v690_v15 }
 0x1fb   :  { %1664 = vmatprep.subr.bf16.mxu1 %v2075_v61 }
 0x1fd   :  { %1497 = vmatmul.mubr.bf16.vlgmr.msra.gmra.mrb[16].mxu1 %v1689_v50 }
 0x1fe   :  { %1500 = vmatprep.mubr.bf16.mxu1 %v1690_v23  ;;  %1672 = vmatpush3.bf16.msra.mxu1 %v2075_v61  ;;  %v1693_v61 = vld [vmem:[%s2349_s3 + $0x28] sm:$0xff]  }
 0x1ff   :  { %1665 = vmatprep.subr.bf16.mxu1 %v2080_v63 }
 0x202   :  { %1673 = vmatpush3.bf16.msra.mxu1 %v2080_v63  ;;  %v1695_v63 = vld [vmem:[%s2349_s3 + $0x38] sm:$0xff]  }
 0x203   :  { %1666 = vmatprep.subr.bf16.mxu1 %v2091_v4 }
 0x205   :  { %1501 = vmatmul.mubr.bf16.gmra.mrb[20].mxu1 %v1691_v49  ;;  %v2247_v49 = vld [vmem:[%s2355_s12] ss:$0 sm:$0xff] }
 0x206   :  { %1504 = vmatprep.mubr.bf16.mxu1 %v1692_v51  ;;  %1674 = vmatpush3.bf16.msra.mxu1 %v2091_v4  ;;  %v951_v4 = vld [vmem:[%s2350_s9 + $0x70] sm:$0xff] }
 0x207   :  { %1667 = vmatprep.subr.bf16.mxu1 %v2101_v9 }
 0x20a   :  { %1675 = vmatpush3.bf16.msra.mxu1 %v2101_v9  ;;  %v952_v9 = vld [vmem:[%s2350_s9 + $0x78] sm:$0xff] }
 0x20b   :  { %1668 = vmatprep.subr.bf16.mxu1 %v2111_v14 }
 0x20d   :  { %1505 = vmatmul.mubr.bf16.gmra.mrb[24].mxu1 %v1693_v61 }
 0x20e   :  { %1508 = vmatprep.mubr.bf16.mxu1 %v1694_v37  ;;  %1676 = vmatpush3.bf16.msra.mxu1 %v2111_v14  ;;  %v1660_v14 = vpack.c.bf16 %v952_v9, %v951_v4 }
 0x20f   :  { %1669 = vmatprep.subr.bf16.mxu1 %v2121_v17 }
 0x210   :  { %1661 = vmatprep.subr.bf16.mxu0 %v1660_v14 }
 0x211   :  { %1663 = vmatpush3.bf16.msra.mxu0 %v1660_v14 }
 0x212   :  { %1677 = vmatpush3.bf16.msra.mxu1 %v2121_v17  ;;  %v888_v17 = vstv %s2352_s0 }
 0x213   :  { %1670 = vmatprep.subr.bf16.mxu1 %v2131_v22  ;;  %v889_v40 = vmul.f32 %v888_v17, %v1856_v42  ;;  %v890_v16 = vmul.f32 %v888_v17, %v1861_v43  ;;  %v891_v20 = vmul.f32 %v888_v17, %v1868_v46  ;;  %v892_v25 = vmul.f32 %v888_v17, %v1873_v47 }
 0x214   :  { %v893_v28 = vmul.f32 %v888_v17, %v1892_v54  ;;  %v894_v36 = vmul.f32 %v888_v17, %v1897_v55  ;;  %v895_v43 = vmul.f32 %v888_v17, %v1910_v59  ;;  %v896_v47 = vmul.f32 %v888_v17, %v1915_v60 }
 0x215   :  { %1509 = vmatmul.mubr.bf16.gmra.mrb[28].mxu1 %v1695_v63  ;;  %v897_v54 = vmul.f32 %v888_v17, %v1928_v0  ;;  %v898_v55 = vmul.f32 %v888_v17, %v1933_v1  ;;  %v899_v59 = vmul.f32 %v888_v17, %v1946_v5  ;;  %v900_v60 = vmul.f32 %v888_v17, %v1951_v6 }
 0x216   :  { %1678 = vmatpush3.bf16.msra.mxu1 %v2131_v22  ;;  %v901_v0 = vmul.f32 %v888_v17, %v1964_v10  ;;  %v902_v1 = vmul.f32 %v888_v17, %v1969_v11  ;;  %v903_v5 = vmul.f32 %v888_v17, %v1991_v18  ;;  %v904_v6 = vmul.f32 %v888_v17, %v1996_v19  ;;  %v2235_v11 = vld [vmem:[%s2353_s10] ss:$0 sm:$0xff] }
 0x217   :  { %1671 = vmatprep.subr.bf16.mxu1 %v1660_v14  ;;  %v2241_v19 = vld [vmem:[%s2354_s11] ss:$0 sm:$0xff] }
 0x21a   :  { %1679 = vmatpush3.bf16.msra.mxu1 %v1660_v14 }
 0x2d0   :  { %v1498_v22 = vpop.f32.mrb[16].mxu1 }
 0x2d1   :  { %v773_v21 = vpop.f32.mrb[17].mxu1  ;;  %v923_v27 = vadd.f32 %v1498_v22, %v891_v20 }
 0x2d2   :  { %v921_v38 = vadd.f32 %v889_v40, %v773_v21  ;;  %v1499_v35 = vpop.f32.mrb[18].mxu1 }
 0x2d3   :  { %v776_v24 = vpop.f32.mrb[19].mxu1  ;;  %v924_v48 = vadd.f32 %v1499_v35, %v892_v25 }
 0x2d4   :  { %v922_v26 = vadd.f32 %v890_v16, %v776_v24  ;;  %1544 = vmatprep.mubr.f32.mxu0 %v921_v38 }
 0x2d6   :  { %1545 = vmatmul.mubr.f32.vlgmr.msra.gmra.mrb[32].mxu0 %v922_v26 }
 0x2d7   :  { %1547 = vmatprep.mubr.f32.mxu0 %v923_v27 }
 0x2d8   :  { %v1502_v42 = vpop.f32.mrb[20].mxu1 }
 0x2d9   :  { %v789_v46 = vpop.f32.mrb[21].mxu1  ;;  %v927_v31 = vadd.f32 %v1502_v42, %v895_v43 }
 0x2da   :  { %v925_v29 = vadd.f32 %v893_v28, %v789_v46  ;;  %v1503_v44 = vpop.f32.mrb[22].mxu1  ;;  %1548 = vmatmul.mubr.f32.gmra.mrb[34].mxu0 %v924_v48 }
 0x2db   :  { %v792_v30 = vpop.f32.mrb[23].mxu1  ;;  %v928_v33 = vadd.f32 %v1503_v44, %v896_v47 }
 0x2dc   :  { %v926_v34 = vadd.f32 %v894_v36, %v792_v30  ;;  %1550 = vmatprep.mubr.f32.mxu0 %v925_v29 }
 0x2de   :  { %1551 = vmatmul.mubr.f32.gmra.mrb[36].mxu0 %v926_v34 }
 0x2df   :  { %1553 = vmatprep.mubr.f32.mxu0 %v927_v31 }
 0x2e0   :  { %v1506_v53 = vpop.f32.mrb[24].mxu1 }
 0x2e1   :  { %v805_v56 = vpop.f32.mrb[25].mxu1  ;;  %v931_v62 = vadd.f32 %v1506_v53, %v899_v59 }
 0x2e2   :  { %v929_v57 = vadd.f32 %v897_v54, %v805_v56  ;;  %v1507_v45 = vpop.f32.mrb[26].mxu1  ;;  %1554 = vmatmul.mubr.f32.gmra.mrb[38].mxu0 %v928_v33 }
 0x2e3   :  { %v808_v58 = vpop.f32.mrb[27].mxu1  ;;  %v932_v41 = vadd.f32 %v1507_v45, %v900_v60 }
 0x2e4   :  { %v930_v32 = vadd.f32 %v898_v55, %v808_v58  ;;  %1556 = vmatprep.mubr.f32.mxu1 %v929_v57 }
 0x2e6   :  { %1557 = vmatmul.mubr.f32.vlgmr.msra.gmra.mrb[32].mxu1 %v930_v32 }
 0x2e7   :  { %1559 = vmatprep.mubr.f32.mxu1 %v931_v62 }
 0x2e8   :  { %v1510_v2 = vpop.f32.mrb[28].mxu1 }
 0x2e9   :  { %v821_v39 = vpop.f32.mrb[29].mxu1  ;;  %v935_v12 = vadd.f32 %v1510_v2, %v903_v5 }
 0x2ea   :  { %v933_v3 = vadd.f32 %v901_v0, %v821_v39  ;;  %v1511_v7 = vpop.f32.mrb[30].mxu1  ;;  %1560 = vmatmul.mubr.f32.gmra.mrb[34].mxu1 %v932_v41 }
 0x2eb   :  { %v824_v8 = vpop.f32.mrb[31].mxu1  ;;  %v936_v10 = vadd.f32 %v1511_v7, %v904_v6 }
 0x2ec   :  { %v934_v52 = vadd.f32 %v902_v1, %v824_v8  ;;  %1562 = vmatprep.mubr.f32.mxu1 %v933_v3 }
 0x2ee   :  { %1563 = vmatmul.mubr.f32.gmra.mrb[36].mxu1 %v934_v52 }
 0x2ef   :  { %1565 = vmatprep.mubr.f32.mxu1 %v935_v12 }
 0x2f2   :  { %1566 = vmatmul.mubr.f32.gmra.mrb[38].mxu1 %v936_v10 }
 0x3a9   :  { %v1546_v18 = vpop.f32.mrb[32].mxu0 }
 0x3aa   :  { %v1032_v13 = vadd.f32 %v1546_v18, %v2235_v11  ;;  %v1026_v15 = vpop.f32.mrb[33].mxu0 }
 0x3ab   :  { %v1027_v50 = vadd.f32 %v2235_v11, %v1026_v15 }
 0x3ac   :  { %v1106_v23 = vmax.f32 %v1032_v13, 0.0 }
 0x3ad   :  { %v1105_v51 = vmax.f32 %v1027_v50, 0.0  ;;  %v1549_v61 = vpop.f32.mrb[34].mxu0 }
 0x3ae   :  { %v1129_v37 = vmul.f32 %v2241_v19, %v1106_v23  ;;  %v1042_v63 = vadd.f32 %v1549_v61, %v2235_v11  ;;  %v1036_v4 = vpop.f32.mrb[35].mxu0 }
 0x3af   :  { %v1128_v9 = vmul.f32 %v2241_v19, %v1105_v51  ;;  %v1037_v14 = vadd.f32 %v2235_v11, %v1036_v4 }
 0x3b0   :  { %v1152_v17 = vadd.f32 %v2247_v49, %v1129_v37  ;;  %v1108_v40 = vmax.f32 %v1042_v63, 0.0 }
 0x3b1   :  { %v1151_v22 = vadd.f32 %v2247_v49, %v1128_v9  ;;  %v1107_v16 = vmax.f32 %v1037_v14, 0.0  ;;  %v1552_v20 = vpop.f32.mrb[36].mxu0 }
 0x3b2   :  { %1168 = vst [vmem:[%s2356_s13 + $0x8] sm:$0xff] %v1152_v17  ;;  %v1131_v21 = vmul.f32 %v2241_v19, %v1108_v40  ;;  %v1052_v38 = vadd.f32 %v1552_v20, %v2235_v11  ;;  %v1046_v35 = vpop.f32.mrb[37].mxu0 }
 0x3b3   :  { %1167 = vst [vmem:[%s2356_s13] sm:$0xff] %v1151_v22  ;;  %v1130_v24 = vmul.f32 %v2241_v19, %v1107_v16  ;;  %v1047_v25 = vadd.f32 %v2235_v11, %v1046_v35 }
 0x3b4   :  { %v1154_v26 = vadd.f32 %v2247_v49, %v1131_v21  ;;  %v1110_v27 = vmax.f32 %v1052_v38, 0.0 }
 0x3b5   :  { %v1153_v28 = vadd.f32 %v2247_v49, %v1130_v24  ;;  %v1109_v48 = vmax.f32 %v1047_v25, 0.0  ;;  %v1555_v42 = vpop.f32.mrb[38].mxu0 }
 0x3b6   :  { %1170 = vst [vmem:[%s2356_s13 + $0x18] sm:$0xff] %v1154_v26  ;;  %v1133_v36 = vmul.f32 %v2241_v19, %v1110_v27  ;;  %v1062_v43 = vadd.f32 %v1555_v42, %v2235_v11  ;;  %v1056_v46 = vpop.f32.mrb[39].mxu0 }
 0x3b7   :  { %1169 = vst [vmem:[%s2356_s13 + $0x10] sm:$0xff] %v1153_v28  ;;  %v1132_v29 = vmul.f32 %v2241_v19, %v1109_v48  ;;  %v1057_v44 = vadd.f32 %v2235_v11, %v1056_v46 }
 0x3b8   :  { %v1156_v30 = vadd.f32 %v2247_v49, %v1133_v36  ;;  %v1112_v47 = vmax.f32 %v1062_v43, 0.0 }
 0x3b9   :  { %v1155_v34 = vadd.f32 %v2247_v49, %v1132_v29  ;;  %v1111_v31 = vmax.f32 %v1057_v44, 0.0  ;;  %v1558_v54 = vpop.f32.mrb[32].mxu1 }
 0x3ba   :  { %1172 = vst [vmem:[%s2356_s13 + $0x28] sm:$0xff] %v1156_v30  ;;  %v1135_v33 = vmul.f32 %v2241_v19, %v1112_v47  ;;  %v1072_v53 = vadd.f32 %v1558_v54, %v2235_v11  ;;  %v1066_v55 = vpop.f32.mrb[33].mxu1 }
 0x3bb   :  { %1171 = vst [vmem:[%s2356_s13 + $0x20] sm:$0xff] %v1155_v34  ;;  %v1134_v59 = vmul.f32 %v2241_v19, %v1111_v31  ;;  %v1067_v56 = vadd.f32 %v2235_v11, %v1066_v55 }
 0x3bc   :  { %v1158_v57 = vadd.f32 %v2247_v49, %v1135_v33  ;;  %v1114_v45 = vmax.f32 %v1072_v53, 0.0 }
 0x3bd   :  { %v1157_v58 = vadd.f32 %v2247_v49, %v1134_v59  ;;  %v1113_v60 = vmax.f32 %v1067_v56, 0.0  ;;  %v1561_v32 = vpop.f32.mrb[34].mxu1 }
 0x3be   :  { %1174 = vst [vmem:[%s2356_s13 + $0x38] sm:$0xff] %v1158_v57  ;;  %v1137_v62 = vmul.f32 %v2241_v19, %v1114_v45  ;;  %v1082_v0 = vadd.f32 %v1561_v32, %v2235_v11  ;;  %v1076_v41 = vpop.f32.mrb[35].mxu1 }
 0x3bf   :  { %1173 = vst [vmem:[%s2356_s13 + $0x30] sm:$0xff] %v1157_v58  ;;  %v1136_v2 = vmul.f32 %v2241_v19, %v1113_v60  ;;  %v1077_v1 = vadd.f32 %v2235_v11, %v1076_v41 }
 0x3c0   :  { %v1160_v5 = vadd.f32 %v2247_v49, %v1137_v62  ;;  %v1116_v39 = vmax.f32 %v1082_v0, 0.0 }
 0x3c1   :  { %v1159_v3 = vadd.f32 %v2247_v49, %v1136_v2  ;;  %v1115_v7 = vmax.f32 %v1077_v1, 0.0  ;;  %v1564_v8 = vpop.f32.mrb[36].mxu1 }
 0x3c2   :  { %1176 = vst [vmem:[%s2356_s13 + $0x48] sm:$0xff] %v1160_v5  ;;  %v1139_v6 = vmul.f32 %v2241_v19, %v1116_v39  ;;  %v1092_v52 = vadd.f32 %v1564_v8, %v2235_v11  ;;  %v1086_v12 = vpop.f32.mrb[37].mxu1 }
 0x3c3   :  { %1175 = vst [vmem:[%s2356_s13 + $0x40] sm:$0xff] %v1159_v3  ;;  %v1138_v10 = vmul.f32 %v2241_v19, %v1115_v7  ;;  %v1087_v18 = vadd.f32 %v2235_v11, %v1086_v12 }
 0x3c4   :  { %v1162_v13 = vadd.f32 %v2247_v49, %v1139_v6  ;;  %v1118_v15 = vmax.f32 %v1092_v52, 0.0 }
 0x3c5   :  { %v1161_v50 = vadd.f32 %v2247_v49, %v1138_v10  ;;  %v1117_v23 = vmax.f32 %v1087_v18, 0.0  ;;  %v1567_v51 = vpop.f32.mrb[38].mxu1 }
 0x3c6   :  { %1178 = vst [vmem:[%s2356_s13 + $0x58] sm:$0xff] %v1162_v13  ;;  %v1141_v61 = vmul.f32 %v2241_v19, %v1118_v15  ;;  %v1102_v37 = vadd.f32 %v1567_v51, %v2235_v11  ;;  %v1096_v63 = vpop.f32.mrb[39].mxu1 }
 0x3c7   :  { %1177 = vst [vmem:[%s2356_s13 + $0x50] sm:$0xff] %v1161_v50  ;;  %v1140_v4 = vmul.f32 %v2241_v19, %v1117_v23  ;;  %v1097_v9 = vadd.f32 %v2235_v11, %v1096_v63 }
 0x3c8   :  { %v1164_v14 = vadd.f32 %v2247_v49, %v1141_v61  ;;  %v1120_v17 = vmax.f32 %v1102_v37, 0.0 }
 0x3c9   :  { %v1163_v40 = vadd.f32 %v2247_v49, %v1140_v4  ;;  %v1119_v22 = vmax.f32 %v1097_v9, 0.0 }
 0x3ca   :  { %1180 = vst [vmem:[%s2356_s13 + $0x68] sm:$0xff] %v1164_v14  ;;  %v1143_v16 = vmul.f32 %v2241_v19, %v1120_v17 }
 0x3cb   :  { %1179 = vst [vmem:[%s2356_s13 + $0x60] sm:$0xff] %v1163_v40  ;;  %v1142_v20 = vmul.f32 %v2241_v19, %v1119_v22 }
 0x3cc   :  { %v1166_v11 = vadd.f32 %v2247_v49, %v1143_v16 }
 0x3cd   :  { %v1165_v21 = vadd.f32 %v2247_v49, %v1142_v20 }
 0x3ce   :  { %1182 = vst [vmem:[%s2356_s13 + $0x78] sm:$0xff] %v1166_v11 }
 0x3cf   :  { %1181 = vst [vmem:[%s2356_s13 + $0x70] sm:$0xff] %v1165_v21 }

// kernel: gine_forward.3
= control target key start
LH: loop header
LB: loop body
LE: loop exit
PB: predicated region body
PF: predicated region fallthrough
CT: control target
= control target key end

     0   :  { %s2795_s0 = inlined_call_operand.<no memory space> [shape: f32[1,1], index: 0, kind: input, shape index: {}]   ;;  %s2796_s1 = inlined_call_operand.vmem [shape: f32[128,128], index: 1, kind: input, shape index: {}]   ;;  %s2797_s2 = inlined_call_operand.vmem [shape: bf16[128,128], index: 2, kind: input, shape index: {}]   ;;  %s2798_s3 = inlined_call_operand.vmem [shape: bf16[128,128], index: 3, kind: input, shape index: {}]   ;;  %s2799_s4 = inlined_call_operand.vmem [shape: f32[128,128], index: 4, kind: input, shape index: {}]   ;;  %s2800_s5 = inlined_call_operand.hbm [shape: f32[128,128], index: 5, kind: input, shape index: {}]   ;;  %s2801_s6 = inlined_call_operand.vmem [shape: f32[1,128], index: 6, kind: input, shape index: {}]   ;;  %s2802_s7 = inlined_call_operand.hbm [shape: f32[128,128], index: 7, kind: input, shape index: {}]   ;;  %s2803_s8 = inlined_call_operand.vmem [shape: f32[1,128], index: 8, kind: input, shape index: {}]   ;;  %s2804_s9 = inlined_call_operand.vmem [shape: f32[128,128], index: 9, kind: input, shape index: {}]   ;;  %s2805_s10 = inlined_call_operand.vmem [shape: f32[1,128], index: 10, kind: input, shape index: {}]   ;;  %s2806_s11 = inlined_call_operand.vmem [shape: f32[1,128], index: 11, kind: input, shape index: {}]   ;;  %s2807_s12 = inlined_call_operand.vmem [shape: f32[1,128], index: 12, kind: input, shape index: {}]   ;;  %s2808_s13 = inlined_call_operand.vmem [shape: f32[128,128], index: 13, kind: input, shape index: {}]   ;;  %s2809_s14 = inlined_call_operand.vmem [shape: f32[1,128], index: 14, kind: input, shape index: {}]   ;;  %s2810_s15 = inlined_call_operand.vmem [shape: f32[1,128], index: 15, kind: input, shape index: {}]   ;;  %s2811_s16 = inlined_call_operand.vmem [shape: f32[1,128], index: 16, kind: input, shape index: {}]   ;;  %s2812_s17 = inlined_call_operand.vmem [shape: f32[128,128], index: 17, kind: output, shape index: {}]  }
   0x1   :  { %2814 = sst [smem:[#allocation10_spill]] %s2795_s0 }
   0x2   :  { %2815 = sst [smem:[#allocation11_spill]] %s2796_s1 }
   0x3   :  { %23 = vsyncpa [#allocation5], 0 }
   0x4   :  { %24 = vsyncpa [#allocation7], 0  ;;  %s2127_s24 = smov [#allocation4]   ;;  %s2079_s28 = scalar_lea.hbm %s2800_s5, 2048 }
   0x5   :  { %s40_s25 = sshll.u32 %s2127_s24, 4  ;;  %p2080_p0 = scmp.ne.s32.totalorder %s2800_s5, %s2079_s28  ;;  %s41_s25 = int_to_ptr.vmem [resolvable:$true] %s40_s25 }
   0x6   :  { %p2083_p1 = scmp.lt.u32.totalorder %s2079_s28, %s2800_s5 }
   0x8   :  { %p2085_p2 = pnand %p2083_p1, %p2080_p0 }
   0xa   :  { %2088 = shalt.err (!%p2085_p2)
}
   0xb   :  { %s2089_s19 = scalar_lea.vmem %s41_s25, 2048  ;;  %p2094_p4 = scmp.lt.s32.totalorder %s41_s25, %s41_s25 }
   0xc   :  { %p2090_p3 = scmp.ne.s32.totalorder %s41_s25, %s2089_s19  ;;  %p2095_p5 = scmp.lt.s32.totalorder %s2089_s19, %s2089_s19 }
   0xe   :  { %p2096_p6 = por %p2095_p5, %p2094_p4 }
  0x10   :  { %p2097_p7 = pnand %p2096_p6, %p2090_p3 }
  0x12   :  { %2100 = shalt.err (!%p2097_p7)
}
  0x13   :  { %s2128_s1 = smov 128   ;;  %s2129_s20 = smov 8  }
  0x14   :  { %46 = dma.hbm_to_vmem [thread:$0]  %s2800_s5, 2048, %s41_s25, [#allocation5], %s2128_s1, %s2128_s1, %s2129_s20  }
  0x15   :  { %s2130_s23 = smov [#allocation6]   ;;  %s2101_s28 = scalar_lea.hbm %s2802_s7, 2048 }
  0x16   :  { %s54_s24 = sshll.u32 %s2130_s23, 4  ;;  %p2102_p8 = scmp.ne.s32.totalorder %s2802_s7, %s2101_s28  ;;  %s55_s24 = int_to_ptr.vmem [resolvable:$true] %s54_s24 }
  0x17   :  { %p2105_p9 = scmp.lt.u32.totalorder %s2101_s28, %s2802_s7 }
  0x19   :  { %p2107_p10 = pnand %p2105_p9, %p2102_p8 }
  0x1b   :  { %2110 = shalt.err (!%p2107_p10)
}
  0x1c   :  { %s2111_s19 = scalar_lea.vmem %s55_s24, 2048  ;;  %p2116_p12 = scmp.lt.s32.totalorder %s55_s24, %s55_s24 }
  0x1d   :  { %p2112_p11 = scmp.ne.s32.totalorder %s55_s24, %s2111_s19  ;;  %p2117_p13 = scmp.lt.s32.totalorder %s2111_s19, %s2111_s19 }
  0x1f   :  { %p2118_p0 = por %p2117_p13, %p2116_p12 }
  0x21   :  { %p2119_p1 = pnand %p2118_p0, %p2112_p11 }
  0x23   :  { %2122 = shalt.err (!%p2119_p1)
}
  0x24   :  { %60 = dma.hbm_to_vmem [thread:$0]  %s2802_s7, 2048, %s55_s24, [#allocation7], %s2128_s1, %s2128_s1, %s2129_s20  }
  0x25   :  { %2123 = dma.done.wait [#allocation5], 2048  }
  0x26   :  { %2124 = vsyncadd [#allocation5], 4294965248 }
  0x27   :  { %2125 = dma.done.wait [#allocation7], 2048  }
  0x28   :  { %2126 = vsyncadd [#allocation7], 4294965248  ;;  %v122_v0 = vld [vmem:[#allocation4] sm:$0xff]  ;;  %v123_v1 = vld [vmem:[#allocation4 + $0x8] sm:$0xff]  ;;  %s2816_s23 = sld [smem:[#allocation11_spill]] }
  0x29   :  { %v124_v2 = vld [vmem:[#allocation4 + $0x10] sm:$0xff]  ;;  %v1931_v3 = vpack.c.bf16 %v123_v1, %v122_v0  ;;  %v125_v4 = vld [vmem:[#allocation4 + $0x18] sm:$0xff]  ;;  %v126_v6 = vld [vmem:[#allocation4 + $0x20] sm:$0xff] }
  0x2a   :  { %v1935_v5 = vpack.c.bf16 %v125_v4, %v124_v2  ;;  %v127_v7 = vld [vmem:[#allocation4 + $0x28] sm:$0xff]  ;;  %v128_v10 = vld [vmem:[#allocation4 + $0x30] sm:$0xff]  ;;  %v129_v11 = vld [vmem:[#allocation4 + $0x38] sm:$0xff] }
  0x2b   :  { %1932 = vmatprep.subr.bf16.mxu0 %v1931_v3  ;;  %v1939_v8 = vpack.c.bf16 %v127_v7, %v126_v6  ;;  %v1943_v12 = vpack.c.bf16 %v129_v11, %v128_v10  ;;  %v130_v13 = vld [vmem:[#allocation4 + $0x40] sm:$0xff]  ;;  %v131_v14 = vld [vmem:[#allocation4 + $0x48] sm:$0xff]  ;;  %v308_v18 = vld [vmem:[#allocation6 + $0x10] sm:$0xff] }
  0x2c   :  { %1934 = vmatpush3.bf16.msra.mxu0 %v1931_v3  ;;  %v306_v15 = vld [vmem:[#allocation6] sm:$0xff]  ;;  %v307_v16 = vld [vmem:[#allocation6 + $0x8] sm:$0xff]  ;;  %v1947_v19 = vpack.c.bf16 %v131_v14, %v130_v13  ;;  %v132_v20 = vld [vmem:[#allocation4 + $0x50] sm:$0xff] }
  0x2d   :  { %1936 = vmatprep.subr.bf16.mxu0 %v1935_v5  ;;  %v1963_v17 = vpack.c.bf16 %v307_v16, %v306_v15  ;;  %v309_v21 = vld [vmem:[#allocation6 + $0x18] sm:$0xff]  ;;  %v310_v24 = vld [vmem:[#allocation6 + $0x20] sm:$0xff]  ;;  %v311_v25 = vld [vmem:[#allocation6 + $0x28] sm:$0xff] }
  0x2e   :  { %v106_v9 = vld [vmem:[%s2816_s23] sm:$0xff]  ;;  %v133_v22 = vld [vmem:[#allocation4 + $0x58] sm:$0xff]  ;;  %v1967_v23 = vpack.c.bf16 %v309_v21, %v308_v18  ;;  %v1971_v26 = vpack.c.bf16 %v311_v25, %v310_v24  ;;  %v312_v28 = vld [vmem:[#allocation6 + $0x30] sm:$0xff] }
  0x2f   :  { %1675 = vmatprep.mubr.f32.mxu0 %v106_v9  ;;  %1964 = vmatprep.subr.bf16.mxu1 %v1963_v17  ;;  %v1951_v27 = vpack.c.bf16 %v133_v22, %v132_v20  ;;  %v313_v29 = vld [vmem:[#allocation6 + $0x38] sm:$0xff]  ;;  %v134_v30 = vld [vmem:[#allocation4 + $0x60] sm:$0xff]  ;;  %v135_v31 = vld [vmem:[#allocation4 + $0x68] sm:$0xff] }
  0x30   :  { %1938 = vmatpush3.bf16.msra.mxu0 %v1935_v5  ;;  %1966 = vmatpush3.bf16.msra.mxu1 %v1963_v17  ;;  %v314_v32 = vld [vmem:[#allocation6 + $0x40] sm:$0xff]  ;;  %v315_v33 = vld [vmem:[#allocation6 + $0x48] sm:$0xff]  ;;  %v136_v34 = vld [vmem:[#allocation4 + $0x70] sm:$0xff]  ;;  %v1975_v36 = vpack.c.bf16 %v313_v29, %v312_v28  ;;  %v1955_v37 = vpack.c.bf16 %v135_v31, %v134_v30 }
  0x31   :  { %1940 = vmatprep.subr.bf16.mxu0 %v1939_v8  ;;  %1968 = vmatprep.subr.bf16.mxu1 %v1967_v23  ;;  %v137_v35 = vld [vmem:[#allocation4 + $0x78] sm:$0xff]  ;;  %v316_v38 = vld [vmem:[#allocation6 + $0x50] sm:$0xff]  ;;  %v2251_v40 = vld [vmem:[%s2799_s4] sm:$0xff]  ;;  %v1979_v42 = vpack.c.bf16 %v315_v33, %v314_v32 }
  0x32   :  { %v317_v39 = vld [vmem:[#allocation6 + $0x58] sm:$0xff]  ;;  %v2256_v41 = vld [vmem:[%s2799_s4 + $0x8] sm:$0xff]  ;;  %v1959_v43 = vpack.c.bf16 %v137_v35, %v136_v34  ;;  %v2261_v44 = vld [vmem:[%s2799_s4 + $0x10] sm:$0xff] }
  0x33   :  { %v2266_v45 = vld [vmem:[%s2799_s4 + $0x18] sm:$0xff]  ;;  %v1983_v46 = vpack.c.bf16 %v317_v39, %v316_v38  ;;  %v318_v47 = vld [vmem:[#allocation6 + $0x60] sm:$0xff]  ;;  %v522_v48 = vpack.c.bf16 %v2256_v41, %v2251_v40  ;;  %v319_v49 = vld [vmem:[#allocation6 + $0x68] sm:$0xff] }
  0x34   :  { %1942 = vmatpush3.bf16.msra.mxu0 %v1939_v8  ;;  %1970 = vmatpush3.bf16.msra.mxu1 %v1967_v23  ;;  %v107_v50 = vld [vmem:[%s2816_s23 + $0x8] sm:$0xff]  ;;  %v108_v51 = vld [vmem:[%s2816_s23 + $0x10] sm:$0xff]  ;;  %v523_v52 = vpack.c.bf16 %v2266_v45, %v2261_v44  ;;  %v1987_v53 = vpack.c.bf16 %v319_v49, %v318_v47  ;;  %v2281_v54 = vld [vmem:[%s2799_s4 + $0x20] sm:$0xff] }
  0x35   :  { %1944 = vmatprep.subr.bf16.mxu0 %v1943_v12  ;;  %1972 = vmatprep.subr.bf16.mxu1 %v1971_v26  ;;  %v2286_v55 = vld [vmem:[%s2799_s4 + $0x28] sm:$0xff]  ;;  %v109_v56 = vld [vmem:[%s2816_s23 + $0x18] sm:$0xff]  ;;  %v110_v57 = vld [vmem:[%s2816_s23 + $0x20] sm:$0xff] }
  0x36   :  { %v524_v58 = vpack.c.bf16 %v2286_v55, %v2281_v54  ;;  %v2299_v59 = vld [vmem:[%s2799_s4 + $0x30] sm:$0xff]  ;;  %v2304_v60 = vld [vmem:[%s2799_s4 + $0x38] sm:$0xff]  ;;  %v111_v61 = vld [vmem:[%s2816_s23 + $0x28] sm:$0xff] }
  0x37   :  { %v112_v62 = vld [vmem:[%s2816_s23 + $0x30] sm:$0xff]  ;;  %v525_v63 = vpack.c.bf16 %v2304_v60, %v2299_v59  ;;  %v2317_v0 = vld [vmem:[%s2799_s4 + $0x40] sm:$0xff]  ;;  %v2322_v1 = vld [vmem:[%s2799_s4 + $0x48] sm:$0xff] }
  0x38   :  { %1946 = vmatpush3.bf16.msra.mxu0 %v1943_v12  ;;  %1974 = vmatpush3.bf16.msra.mxu1 %v1971_v26  ;;  %v113_v2 = vld [vmem:[%s2816_s23 + $0x38] sm:$0xff]  ;;  %v114_v3 = vld [vmem:[%s2816_s23 + $0x40] sm:$0xff]  ;;  %v526_v4 = vpack.c.bf16 %v2322_v1, %v2317_v0  ;;  %v2335_v5 = vld [vmem:[%s2799_s4 + $0x50] sm:$0xff] }
  0x39   :  { %1948 = vmatprep.subr.bf16.mxu0 %v1947_v19  ;;  %1976 = vmatprep.subr.bf16.mxu1 %v1975_v36  ;;  %v2340_v6 = vld [vmem:[%s2799_s4 + $0x58] sm:$0xff]  ;;  %v115_v7 = vld [vmem:[%s2816_s23 + $0x48] sm:$0xff]  ;;  %v116_v8 = vld [vmem:[%s2816_s23 + $0x50] sm:$0xff] }
  0x3a   :  { %v527_v9 = vpack.c.bf16 %v2340_v6, %v2335_v5  ;;  %v2353_v10 = vld [vmem:[%s2799_s4 + $0x60] sm:$0xff]  ;;  %v2358_v11 = vld [vmem:[%s2799_s4 + $0x68] sm:$0xff]  ;;  %v117_v12 = vld [vmem:[%s2816_s23 + $0x58] sm:$0xff] }
  0x3b   :  { %v118_v13 = vld [vmem:[%s2816_s23 + $0x60] sm:$0xff]  ;;  %v528_v14 = vpack.c.bf16 %v2358_v11, %v2353_v10  ;;  %v119_v15 = vld [vmem:[%s2816_s23 + $0x68] sm:$0xff]  ;;  %v120_v16 = vld [vmem:[%s2816_s23 + $0x70] sm:$0xff] }
  0x3c   :  { %1950 = vmatpush3.bf16.msra.mxu0 %v1947_v19  ;;  %1978 = vmatpush3.bf16.msra.mxu1 %v1975_v36  ;;  %v121_v17 = vld [vmem:[%s2816_s23 + $0x78] sm:$0xff]  ;;  %v2380_v18 = vld [vmem:[%s2799_s4 + $0x70] sm:$0xff]  ;;  %v2063_v24 = vld [vmem:[%s2797_s2] sm:$0xff]  }
  0x3d   :  { %1952 = vmatprep.subr.bf16.mxu0 %v1951_v27  ;;  %1980 = vmatprep.subr.bf16.mxu1 %v1979_v42  ;;  %v2385_v19 = vld [vmem:[%s2799_s4 + $0x78] sm:$0xff]  ;;  %v320_v21 = vld [vmem:[#allocation6 + $0x70] sm:$0xff]  ;;  %v2064_v25 = vld [vmem:[%s2797_s2 + $0x8] sm:$0xff]  }
  0x3e   :  { %v529_v20 = vpack.c.bf16 %v2385_v19, %v2380_v18  ;;  %v321_v22 = vld [vmem:[#allocation6 + $0x78] sm:$0xff]  ;;  %v2065_v26 = vld [vmem:[%s2797_s2 + $0x10] sm:$0xff]   ;;  %v2067_v28 = vld [vmem:[%s2797_s2 + $0x20] sm:$0xff]  }
  0x3f   :  { %v1991_v23 = vpack.c.bf16 %v321_v22, %v320_v21  ;;  %v2068_v29 = vld [vmem:[%s2797_s2 + $0x28] sm:$0xff]   ;;  %v2069_v30 = vld [vmem:[%s2797_s2 + $0x30] sm:$0xff]   ;;  %v2070_v31 = vld [vmem:[%s2797_s2 + $0x38] sm:$0xff]  }
  0x40   :  { %1954 = vmatpush3.bf16.msra.mxu0 %v1951_v27  ;;  %1982 = vmatpush3.bf16.msra.mxu1 %v1979_v42  ;;  %v2066_v27 = vld [vmem:[%s2797_s2 + $0x18] sm:$0xff]   ;;  %v1459_v32 = vld [vmem:[%s2801_s6] ss:$0 sm:$0xff] }
  0x41   :  { %1956 = vmatprep.subr.bf16.mxu0 %v1955_v37  ;;  %1984 = vmatprep.subr.bf16.mxu1 %v1983_v46 }
  0x44   :  { %1958 = vmatpush3.bf16.msra.mxu0 %v1955_v37  ;;  %1986 = vmatpush3.bf16.msra.mxu1 %v1983_v46 }
  0x45   :  { %1960 = vmatprep.subr.bf16.mxu0 %v1959_v43  ;;  %1988 = vmatprep.subr.bf16.mxu1 %v1987_v53 }
  0x48   :  { %1962 = vmatpush3.bf16.msra.mxu0 %v1959_v43  ;;  %1990 = vmatpush3.bf16.msra.mxu1 %v1987_v53 }
  0x49   :  { %1755 = vmatprep.subr.bf16.mxu0 %v522_v48  ;;  %1992 = vmatprep.subr.bf16.mxu1 %v1991_v23 }
  0x4b   :  { %1676 = vmatmul.mubr.f32.vlgmr.msra.gmra.mrb[0].mxu0 %v107_v50 }
  0x4c   :  { %1678 = vmatprep.mubr.f32.mxu0 %v108_v51  ;;  %1756 = vmatpush3.bf16.msra.mxu0 %v522_v48 }
  0x4d   :  { %1757 = vmatprep.subr.bf16.mxu0 %v523_v52  ;;  %1994 = vmatpush3.bf16.msra.mxu1 %v1991_v23 }
  0x4f   :  { %1679 = vmatmul.mubr.f32.gmra.mrb[2].mxu0 %v109_v56 }
  0x50   :  { %1681 = vmatprep.mubr.f32.mxu0 %v110_v57  ;;  %1758 = vmatpush3.bf16.msra.mxu0 %v523_v52 }
  0x51   :  { %1759 = vmatprep.subr.bf16.mxu0 %v524_v58 }
  0x53   :  { %1682 = vmatmul.mubr.f32.gmra.mrb[4].mxu0 %v111_v61 }
  0x54   :  { %1684 = vmatprep.mubr.f32.mxu0 %v112_v62  ;;  %1760 = vmatpush3.bf16.msra.mxu0 %v524_v58 }
  0x55   :  { %1761 = vmatprep.subr.bf16.mxu0 %v525_v63 }
  0x57   :  { %1685 = vmatmul.mubr.f32.gmra.mrb[6].mxu0 %v113_v2 }
  0x58   :  { %1687 = vmatprep.mubr.f32.mxu0 %v114_v3  ;;  %1762 = vmatpush3.bf16.msra.mxu0 %v525_v63 }
  0x59   :  { %1763 = vmatprep.subr.bf16.mxu0 %v526_v4 }
  0x5b   :  { %1688 = vmatmul.mubr.f32.gmra.mrb[8].mxu0 %v115_v7 }
  0x5c   :  { %1690 = vmatprep.mubr.f32.mxu0 %v116_v8  ;;  %1764 = vmatpush3.bf16.msra.mxu0 %v526_v4 }
  0x5d   :  { %1765 = vmatprep.subr.bf16.mxu0 %v527_v9 }
  0x5f   :  { %1691 = vmatmul.mubr.f32.gmra.mrb[10].mxu0 %v117_v12 }
  0x60   :  { %1693 = vmatprep.mubr.f32.mxu0 %v118_v13  ;;  %1766 = vmatpush3.bf16.msra.mxu0 %v527_v9 }
  0x61   :  { %1767 = vmatprep.subr.bf16.mxu0 %v528_v14 }
  0x63   :  { %1694 = vmatmul.mubr.f32.gmra.mrb[12].mxu0 %v119_v15 }
  0x64   :  { %1696 = vmatprep.mubr.f32.mxu0 %v120_v16  ;;  %1768 = vmatpush3.bf16.msra.mxu0 %v528_v14 }
  0x65   :  { %1769 = vmatprep.subr.bf16.mxu0 %v529_v20 }
  0x67   :  { %1697 = vmatmul.mubr.f32.gmra.mrb[14].mxu0 %v121_v17 }
  0x68   :  { %1770 = vmatpush3.bf16.msra.mxu0 %v529_v20  ;;  %1771 = vmatprep.mubr.bf16.mxu0 %v2063_v24 }
  0x6b   :  { %1772 = vmatmul.mubr.bf16.vlgmr.msra.gmra.mrb[16].mxu0 %v2064_v25 }
  0x6c   :  { %1775 = vmatprep.mubr.bf16.mxu0 %v2065_v26 }
  0x73   :  { %1776 = vmatmul.mubr.bf16.gmra.mrb[20].mxu0 %v2066_v27 }
  0x74   :  { %1779 = vmatprep.mubr.bf16.mxu0 %v2067_v28 }
  0x7b   :  { %1780 = vmatmul.mubr.bf16.gmra.mrb[24].mxu0 %v2068_v29 }
  0x7c   :  { %1783 = vmatprep.mubr.bf16.mxu0 %v2069_v30 }
  0x83   :  { %1784 = vmatmul.mubr.bf16.gmra.mrb[28].mxu0 %v2070_v31 }
 0x11e   :  { %v1677_v33 = vpop.f32.mrb[0].mxu0 }
 0x11f   :  { %v217_v34 = vadd.f32 %v1677_v33, %v1459_v32  ;;  %v211_v35 = vpop.f32.mrb[1].mxu0 }
 0x120   :  { %v212_v36 = vadd.f32 %v1459_v32, %v211_v35 }
 0x121   :  { %v291_v39 = vmax.f32 %v217_v34, 0.0 }
 0x122   :  { %v1680_v37 = vpop.f32.mrb[2].mxu0  ;;  %v290_v38 = vmax.f32 %v212_v36, 0.0 }
 0x123   :  { %v227_v42 = vadd.f32 %v1680_v37, %v1459_v32  ;;  %v221_v43 = vpop.f32.mrb[3].mxu0 }
 0x124   :  { %v222_v46 = vadd.f32 %v1459_v32, %v221_v43  ;;  %1731 = vmatprep.mubr.f32.mxu1 %v290_v38 }
 0x125   :  { %1732 = vmatmul.mubr.f32.vlgmr.msra.gmra.mrb[0].mxu1 %v291_v39  ;;  %v293_v49 = vmax.f32 %v227_v42, 0.0 }
 0x126   :  { %v292_v47 = vmax.f32 %v222_v46, 0.0  ;;  %v1683_v48 = vpop.f32.mrb[4].mxu0 }
 0x127   :  { %v237_v50 = vadd.f32 %v1683_v48, %v1459_v32  ;;  %v231_v51 = vpop.f32.mrb[5].mxu0 }
 0x128   :  { %v232_v52 = vadd.f32 %v1459_v32, %v231_v51  ;;  %1734 = vmatprep.mubr.f32.mxu1 %v292_v47 }
 0x129   :  { %1735 = vmatmul.mubr.f32.gmra.mrb[2].mxu1 %v293_v49  ;;  %v295_v57 = vmax.f32 %v237_v50, 0.0 }
 0x12a   :  { %v294_v53 = vmax.f32 %v232_v52, 0.0  ;;  %v1686_v56 = vpop.f32.mrb[6].mxu0 }
 0x12b   :  { %v247_v58 = vadd.f32 %v1686_v56, %v1459_v32  ;;  %v241_v61 = vpop.f32.mrb[7].mxu0  ;;  %v977_v56 = vld [vmem:[%s2804_s9] sm:$0xff] }
 0x12c   :  { %v242_v62 = vadd.f32 %v1459_v32, %v241_v61  ;;  %1737 = vmatprep.mubr.f32.mxu1 %v294_v53  ;;  %v2071_v53 = vld [vmem:[%s2798_s3] sm:$0xff]  }
 0x12d   :  { %1738 = vmatmul.mubr.f32.gmra.mrb[4].mxu1 %v295_v57  ;;  %v297_v3 = vmax.f32 %v247_v58, 0.0  ;;  %v978_v57 = vld [vmem:[%s2804_s9 + $0x8] sm:$0xff]  ;;  %v979_v58 = vld [vmem:[%s2804_s9 + $0x10] sm:$0xff] }
 0x12e   :  { %v296_v63 = vmax.f32 %v242_v62, 0.0  ;;  %v1689_v2 = vpop.f32.mrb[8].mxu0  ;;  %v1995_v61 = vpack.c.bf16 %v978_v57, %v977_v56  ;;  %v980_v62 = vld [vmem:[%s2804_s9 + $0x18] sm:$0xff] }
 0x12f   :  { %v257_v4 = vadd.f32 %v1689_v2, %v1459_v32  ;;  %v251_v7 = vpop.f32.mrb[9].mxu0  ;;  %v981_v2 = vld [vmem:[%s2804_s9 + $0x20] sm:$0xff] }
 0x130   :  { %v252_v8 = vadd.f32 %v1459_v32, %v251_v7  ;;  %1740 = vmatprep.mubr.f32.mxu1 %v296_v63  ;;  %v1999_v63 = vpack.c.bf16 %v980_v62, %v979_v58  ;;  %1996 = vmatprep.subr.bf16.mxu0 %v1995_v61  ;;  %v983_v7 = vld [vmem:[%s2804_s9 + $0x30] sm:$0xff] }
 0x131   :  { %1741 = vmatmul.mubr.f32.gmra.mrb[6].mxu1 %v297_v3  ;;  %v299_v13 = vmax.f32 %v257_v4, 0.0  ;;  %v982_v3 = vld [vmem:[%s2804_s9 + $0x28] sm:$0xff]  ;;  %1998 = vmatpush3.bf16.msra.mxu0 %v1995_v61 }
 0x132   :  { %v298_v9 = vmax.f32 %v252_v8, 0.0  ;;  %v1692_v12 = vpop.f32.mrb[10].mxu0  ;;  %2000 = vmatprep.subr.bf16.mxu0 %v1999_v63  ;;  %v2003_v4 = vpack.c.bf16 %v982_v3, %v981_v2  ;;  %v984_v8 = vld [vmem:[%s2804_s9 + $0x38] sm:$0xff] }
 0x133   :  { %v267_v14 = vadd.f32 %v1692_v12, %v1459_v32  ;;  %v261_v15 = vpop.f32.mrb[11].mxu0  ;;  %v985_v12 = vld [vmem:[%s2804_s9 + $0x40] sm:$0xff] }
 0x134   :  { %v262_v16 = vadd.f32 %v1459_v32, %v261_v15  ;;  %1743 = vmatprep.mubr.f32.mxu1 %v298_v9  ;;  %v2007_v9 = vpack.c.bf16 %v984_v8, %v983_v7  ;;  %v987_v15 = vld [vmem:[%s2804_s9 + $0x50] sm:$0xff] }
 0x135   :  { %1744 = vmatmul.mubr.f32.gmra.mrb[8].mxu1 %v299_v13  ;;  %v301_v21 = vmax.f32 %v267_v14, 0.0  ;;  %2002 = vmatpush3.bf16.msra.mxu0 %v1999_v63  ;;  %v986_v13 = vld [vmem:[%s2804_s9 + $0x48] sm:$0xff] }
 0x136   :  { %v300_v17 = vmax.f32 %v262_v16, 0.0  ;;  %v1695_v20 = vpop.f32.mrb[12].mxu0  ;;  %2004 = vmatprep.subr.bf16.mxu0 %v2003_v4  ;;  %v2011_v14 = vpack.c.bf16 %v986_v13, %v985_v12  ;;  %v988_v16 = vld [vmem:[%s2804_s9 + $0x58] sm:$0xff] }
 0x137   :  { %v277_v22 = vadd.f32 %v1695_v20, %v1459_v32  ;;  %v271_v23 = vpop.f32.mrb[13].mxu0  ;;  %v989_v20 = vld [vmem:[%s2804_s9 + $0x60] sm:$0xff] }
 0x138   :  { %v272_v24 = vadd.f32 %v1459_v32, %v271_v23  ;;  %1746 = vmatprep.mubr.f32.mxu1 %v300_v17  ;;  %v2015_v17 = vpack.c.bf16 %v988_v16, %v987_v15  ;;  %v2494_v23 = vld [vmem:[%s2803_s8] ss:$0 sm:$0xff]  ;;  %s2817_s8 = sld [smem:[#allocation10_spill]] }
 0x139   :  { %1747 = vmatmul.mubr.f32.gmra.mrb[10].mxu1 %v301_v21  ;;  %v303_v27 = vmax.f32 %v277_v22, 0.0  ;;  %2006 = vmatpush3.bf16.msra.mxu0 %v2003_v4  ;;  %v990_v21 = vld [vmem:[%s2804_s9 + $0x68] sm:$0xff] }
 0x13a   :  { %v302_v25 = vmax.f32 %v272_v24, 0.0  ;;  %v1698_v26 = vpop.f32.mrb[14].mxu0  ;;  %2008 = vmatprep.subr.bf16.mxu0 %v2007_v9  ;;  %v2019_v22 = vpack.c.bf16 %v990_v21, %v989_v20 }
 0x13b   :  { %v287_v28 = vadd.f32 %v1698_v26, %v1459_v32  ;;  %v281_v29 = vpop.f32.mrb[15].mxu0 }
 0x13c   :  { %v282_v30 = vadd.f32 %v1459_v32, %v281_v29  ;;  %1749 = vmatprep.mubr.f32.mxu1 %v302_v25 }
 0x13d   :  { %1750 = vmatmul.mubr.f32.gmra.mrb[12].mxu1 %v303_v27  ;;  %v305_v33 = vmax.f32 %v287_v28, 0.0  ;;  %2010 = vmatpush3.bf16.msra.mxu0 %v2007_v9 }
 0x13e   :  { %v304_v31 = vmax.f32 %v282_v30, 0.0  ;;  %v2416_v34 = vpop.f32.mrb[16].mxu0  ;;  %2012 = vmatprep.subr.bf16.mxu0 %v2011_v14 }
 0x13f   :  { %v2418_v35 = vpop.f32.mrb[17].mxu0 }
 0x140   :  { %1752 = vmatprep.mubr.f32.mxu1 %v304_v31  ;;  %v2420_v36 = vpop.f32.mrb[18].mxu0 }
 0x141   :  { %1753 = vmatmul.mubr.f32.gmra.mrb[14].mxu1 %v305_v33  ;;  %v615_v37 = vpop.f32.mrb[19].mxu0  ;;  %2014 = vmatpush3.bf16.msra.mxu0 %v2011_v14 }
 0x142   :  { %1803 = vmatprep.mubr.bf16.mxu1 %v2071_v53  ;;  %2016 = vmatprep.subr.bf16.mxu0 %v2015_v17 }
 0x145   :  { %2018 = vmatpush3.bf16.msra.mxu0 %v2015_v17 }
 0x146   :  { %v2422_v38 = vpop.f32.mrb[20].mxu0  ;;  %2020 = vmatprep.subr.bf16.mxu0 %v2019_v22 }
 0x147   :  { %v2424_v39 = vpop.f32.mrb[21].mxu0 }
 0x148   :  { %v2426_v42 = vpop.f32.mrb[22].mxu0 }
 0x149   :  { %v2428_v32 = vpop.f32.mrb[23].mxu0  ;;  %2022 = vmatpush3.bf16.msra.mxu0 %v2019_v22 }
 0x14e   :  { %v2430_v43 = vpop.f32.mrb[24].mxu0 }
 0x14f   :  { %v2432_v46 = vpop.f32.mrb[25].mxu0 }
 0x150   :  { %v2434_v47 = vpop.f32.mrb[26].mxu0 }
 0x151   :  { %v2436_v48 = vpop.f32.mrb[27].mxu0 }
 0x156   :  { %v2438_v49 = vpop.f32.mrb[28].mxu0 }
 0x157   :  { %v2440_v50 = vpop.f32.mrb[29].mxu0 }
 0x158   :  { %v2442_v51 = vpop.f32.mrb[30].mxu0 }
 0x159   :  { %v2444_v52 = vpop.f32.mrb[31].mxu0 }
 0x1f8   :  { %v1733_v24 = vpop.f32.mrb[0].mxu1 }
 0x1f9   :  { %v401_v25 = vadd.f32 %v1733_v24, %v2494_v23  ;;  %v395_v26 = vpop.f32.mrb[1].mxu1 }
 0x1fa   :  { %v396_v27 = vadd.f32 %v2494_v23, %v395_v26 }
 0x1fb   :  { %v475_v28 = vmax.f32 %v401_v25, 0.0 }
 0x1fc   :  { %v474_v29 = vmax.f32 %v396_v27, 0.0  ;;  %v1736_v30 = vpop.f32.mrb[2].mxu1 }
 0x1fd   :  { %v616_v31 = vadd.f32 %v615_v37, %v475_v28  ;;  %v411_v33 = vadd.f32 %v1736_v30, %v2494_v23  ;;  %v405_v53 = vpop.f32.mrb[3].mxu1 }
 0x1fe   :  { %v613_v56 = vadd.f32 %v2418_v35, %v474_v29  ;;  %v406_v57 = vadd.f32 %v2494_v23, %v405_v53 }
 0x1ff   :  { %v676_v58 = vmax.f32 %v616_v31, 0.0  ;;  %v477_v61 = vmax.f32 %v411_v33, 0.0 }
 0x200   :  { %v675_v62 = vmax.f32 %v613_v56, 0.0  ;;  %v476_v63 = vmax.f32 %v406_v57, 0.0  ;;  %v1739_v2 = vpop.f32.mrb[4].mxu1 }
 0x201   :  { %v624_v3 = vadd.f32 %v2420_v36, %v477_v61  ;;  %v421_v4 = vadd.f32 %v1739_v2, %v2494_v23  ;;  %v415_v7 = vpop.f32.mrb[5].mxu1 }
 0x202   :  { %v723_v8 = vpack.c.bf16 %v676_v58, %v675_v62  ;;  %v621_v37 = vadd.f32 %v2416_v34, %v476_v63  ;;  %v416_v9 = vadd.f32 %v2494_v23, %v415_v7 }
 0x203   :  { %v678_v12 = vmax.f32 %v624_v3, 0.0  ;;  %v479_v13 = vmax.f32 %v421_v4, 0.0 }
 0x204   :  { %v677_v35 = vmax.f32 %v621_v37, 0.0  ;;  %v478_v14 = vmax.f32 %v416_v9, 0.0  ;;  %v1742_v15 = vpop.f32.mrb[6].mxu1  ;;  %1787 = vmatprep.subr.bf16.mxu1 %v723_v8 }
 0x205   :  { %v632_v16 = vadd.f32 %v2428_v32, %v479_v13  ;;  %v431_v17 = vadd.f32 %v1742_v15, %v2494_v23  ;;  %v425_v20 = vpop.f32.mrb[7].mxu1  ;;  %1788 = vmatpush3.bf16.msra.mxu1 %v723_v8 }
 0x206   :  { %v629_v36 = vadd.f32 %v2424_v39, %v478_v14  ;;  %v426_v21 = vadd.f32 %v2494_v23, %v425_v20  ;;  %v724_v22 = vpack.c.bf16 %v678_v12, %v677_v35 }
 0x207   :  { %v680_v34 = vmax.f32 %v632_v16, 0.0  ;;  %v481_v24 = vmax.f32 %v431_v17, 0.0 }
 0x208   :  { %v679_v25 = vmax.f32 %v629_v36, 0.0  ;;  %v480_v26 = vmax.f32 %v426_v21, 0.0  ;;  %v1745_v27 = vpop.f32.mrb[8].mxu1  ;;  %1789 = vmatprep.subr.bf16.mxu1 %v724_v22 }
 0x209   :  { %v640_v28 = vadd.f32 %v2426_v42, %v481_v24  ;;  %v441_v29 = vadd.f32 %v1745_v27, %v2494_v23  ;;  %v435_v32 = vpop.f32.mrb[9].mxu1  ;;  %1790 = vmatpush3.bf16.msra.mxu1 %v724_v22 }
 0x20a   :  { %v725_v30 = vpack.c.bf16 %v680_v34, %v679_v25  ;;  %v637_v31 = vadd.f32 %v2422_v38, %v480_v26  ;;  %v436_v39 = vadd.f32 %v2494_v23, %v435_v32 }
 0x20b   :  { %v682_v33 = vmax.f32 %v640_v28, 0.0  ;;  %v483_v53 = vmax.f32 %v441_v29, 0.0 }
 0x20c   :  { %v681_v56 = vmax.f32 %v637_v31, 0.0  ;;  %v482_v57 = vmax.f32 %v436_v39, 0.0  ;;  %v1748_v58 = vpop.f32.mrb[10].mxu1  ;;  %1791 = vmatprep.subr.bf16.mxu1 %v725_v30  ;;  %v2076_v39 = vld [vmem:[%s2798_s3 + $0x28] sm:$0xff]  }
 0x20d   :  { %v648_v61 = vadd.f32 %v2436_v48, %v483_v53  ;;  %v451_v62 = vadd.f32 %v1748_v58, %v2494_v23  ;;  %v445_v42 = vpop.f32.mrb[11].mxu1  ;;  %1792 = vmatpush3.bf16.msra.mxu1 %v725_v30  ;;  %v2078_v53 = vld [vmem:[%s2798_s3 + $0x38] sm:$0xff]  }
 0x20e   :  { %v645_v63 = vadd.f32 %v2432_v46, %v482_v57  ;;  %v446_v2 = vadd.f32 %v2494_v23, %v445_v42  ;;  %v726_v3 = vpack.c.bf16 %v682_v33, %v681_v56  ;;  %v2077_v33 = vld [vmem:[%s2798_s3 + $0x30] sm:$0xff]   ;;  %v992_v57 = vld [vmem:[%s2804_s9 + $0x78] sm:$0xff] }
 0x20f   :  { %v684_v38 = vmax.f32 %v648_v61, 0.0  ;;  %v485_v4 = vmax.f32 %v451_v62, 0.0  ;;  %v991_v56 = vld [vmem:[%s2804_s9 + $0x70] sm:$0xff]  ;;  %v1207_v61 = vld [vmem:[%s2808_s13] sm:$0xff]  ;;  %v1208_v62 = vld [vmem:[%s2808_s13 + $0x8] sm:$0xff] }
 0x210   :  { %v683_v7 = vmax.f32 %v645_v63, 0.0  ;;  %v484_v8 = vmax.f32 %v446_v2, 0.0  ;;  %v1751_v37 = vpop.f32.mrb[12].mxu1  ;;  %1793 = vmatprep.subr.bf16.mxu1 %v726_v3  ;;  %v2023_v58 = vpack.c.bf16 %v992_v57, %v991_v56  ;;  %v1209_v42 = vld [vmem:[%s2808_s13 + $0x10] sm:$0xff]  ;;  %v2027_v63 = vpack.c.bf16 %v1208_v62, %v1207_v61  ;;  %v1210_v2 = vld [vmem:[%s2808_s13 + $0x18] sm:$0xff] }
 0x211   :  { %v656_v9 = vadd.f32 %v2434_v47, %v485_v4  ;;  %v461_v12 = vadd.f32 %v1751_v37, %v2494_v23  ;;  %v455_v48 = vpop.f32.mrb[13].mxu1  ;;  %1794 = vmatpush3.bf16.msra.mxu1 %v726_v3  ;;  %v2031_v3 = vpack.c.bf16 %v1210_v2, %v1209_v42  ;;  %v1212_v4 = vld [vmem:[%s2808_s13 + $0x28] sm:$0xff]  ;;  %v1214_v37 = vld [vmem:[%s2808_s13 + $0x38] sm:$0xff] }
 0x212   :  { %v727_v13 = vpack.c.bf16 %v684_v38, %v683_v7  ;;  %v653_v35 = vadd.f32 %v2430_v43, %v484_v8  ;;  %v456_v46 = vadd.f32 %v2494_v23, %v455_v48  ;;  %2024 = vmatprep.subr.bf16.mxu0 %v2023_v58  ;;  %v1211_v38 = vld [vmem:[%s2808_s13 + $0x20] sm:$0xff]  ;;  %v1213_v8 = vld [vmem:[%s2808_s13 + $0x30] sm:$0xff]  ;;  %v1216_v48 = vld [vmem:[%s2808_s13 + $0x48] sm:$0xff] }
 0x213   :  { %v686_v14 = vmax.f32 %v656_v9, 0.0  ;;  %v487_v15 = vmax.f32 %v461_v12, 0.0  ;;  %2026 = vmatpush3.bf16.msra.mxu0 %v2023_v58  ;;  %v2035_v7 = vpack.c.bf16 %v1212_v4, %v1211_v38  ;;  %v2039_v9 = vpack.c.bf16 %v1214_v37, %v1213_v8  ;;  %v1215_v12 = vld [vmem:[%s2808_s13 + $0x40] sm:$0xff]  ;;  %v1222_v4 = vld [vmem:[%s2808_s13 + $0x78] sm:$0xff] }
 0x214   :  { %v685_v16 = vmax.f32 %v653_v35, 0.0  ;;  %v486_v17 = vmax.f32 %v456_v46, 0.0  ;;  %v1754_v20 = vpop.f32.mrb[14].mxu1  ;;  %1795 = vmatprep.subr.bf16.mxu1 %v727_v13  ;;  %v1217_v35 = vld [vmem:[%s2808_s13 + $0x50] sm:$0xff]  ;;  %v1218_v46 = vld [vmem:[%s2808_s13 + $0x58] sm:$0xff] }
 0x215   :  { %v664_v36 = vadd.f32 %v2444_v52, %v487_v15  ;;  %v471_v21 = vadd.f32 %v1754_v20, %v2494_v23  ;;  %v465_v47 = vpop.f32.mrb[15].mxu1  ;;  %1796 = vmatpush3.bf16.msra.mxu1 %v727_v13  ;;  %v2043_v13 = vpack.c.bf16 %v1216_v48, %v1215_v12  ;;  %v928_v15 = vstv %s2817_s8  ;;  %v2624_v8 = vld [vmem:[%s2805_s10] ss:$0 sm:$0xff] }
 0x216   :  { %v661_v22 = vadd.f32 %v2440_v50, %v486_v17  ;;  %v466_v34 = vadd.f32 %v2494_v23, %v465_v47  ;;  %v728_v24 = vpack.c.bf16 %v686_v14, %v685_v16  ;;  %v2072_v50 = vld [vmem:[%s2798_s3 + $0x8] sm:$0xff]   ;;  %v2073_v23 = vld [vmem:[%s2798_s3 + $0x10] sm:$0xff]   ;;  %v2047_v14 = vpack.c.bf16 %v1218_v46, %v1217_v35  ;;  %v2630_v48 = vld [vmem:[%s2806_s11] ss:$0 sm:$0xff] }
 0x217   :  { %v688_v43 = vmax.f32 %v664_v36, 0.0  ;;  %v489_v25 = vmax.f32 %v471_v21, 0.0  ;;  %v929_v16 = vmul.f32 %v928_v15, %v2251_v40  ;;  %v930_v20 = vmul.f32 %v928_v15, %v2256_v41 }
 0x218   :  { %v687_v26 = vmax.f32 %v661_v22, 0.0  ;;  %v488_v27 = vmax.f32 %v466_v34, 0.0  ;;  %1797 = vmatprep.subr.bf16.mxu1 %v728_v24  ;;  %v931_v36 = vmul.f32 %v928_v15, %v2261_v44  ;;  %v935_v41 = vmul.f32 %v928_v15, %v2299_v59 }
 0x219   :  { %v672_v28 = vadd.f32 %v2442_v51, %v489_v25  ;;  %1798 = vmatpush3.bf16.msra.mxu1 %v728_v24  ;;  %v2075_v51 = vld [vmem:[%s2798_s3 + $0x20] sm:$0xff]   ;;  %v932_v24 = vmul.f32 %v928_v15, %v2266_v45  ;;  %v936_v45 = vmul.f32 %v928_v15, %v2304_v60  ;;  %v939_v59 = vmul.f32 %v928_v15, %v2335_v5 }
 0x21a   :  { %v729_v29 = vpack.c.bf16 %v688_v43, %v687_v26  ;;  %v669_v52 = vadd.f32 %v2438_v49, %v488_v27  ;;  %v2074_v49 = vld [vmem:[%s2798_s3 + $0x18] sm:$0xff]   ;;  %v933_v26 = vmul.f32 %v928_v15, %v2281_v54  ;;  %v937_v54 = vmul.f32 %v928_v15, %v2317_v0 }
 0x21b   :  { %v690_v32 = vmax.f32 %v672_v28, 0.0  ;;  %v934_v28 = vmul.f32 %v928_v15, %v2286_v55  ;;  %v938_v55 = vmul.f32 %v928_v15, %v2322_v1  ;;  %v940_v60 = vmul.f32 %v928_v15, %v2340_v6 }
 0x21c   :  { %v689_v30 = vmax.f32 %v669_v52, 0.0  ;;  %1799 = vmatprep.subr.bf16.mxu1 %v729_v29  ;;  %v941_v0 = vmul.f32 %v928_v15, %v2353_v10  ;;  %v942_v1 = vmul.f32 %v928_v15, %v2358_v11  ;;  %v943_v5 = vmul.f32 %v928_v15, %v2380_v18  ;;  %v1219_v11 = vld [vmem:[%s2808_s13 + $0x60] sm:$0xff]  ;;  %v1220_v18 = vld [vmem:[%s2808_s13 + $0x68] sm:$0xff] }
 0x21d   :  { %1800 = vmatpush3.bf16.msra.mxu1 %v729_v29  ;;  %v944_v6 = vmul.f32 %v928_v15, %v2385_v19  ;;  %v2051_v38 = vpack.c.bf16 %v1220_v18, %v1219_v11  ;;  %v1221_v19 = vld [vmem:[%s2808_s13 + $0x70] sm:$0xff] }
 0x21e   :  { %v730_v31 = vpack.c.bf16 %v690_v32, %v689_v30 }
 0x220   :  { %1801 = vmatprep.subr.bf16.mxu1 %v730_v31 }
 0x221   :  { %1802 = vmatpush3.bf16.msra.mxu1 %v730_v31 }
 0x222   :  { %2028 = vmatprep.subr.bf16.mxu1 %v2027_v63 }
 0x224   :  { %1804 = vmatmul.mubr.bf16.vlgmr.msra.gmra.mrb[16].mxu1 %v2072_v50 }
 0x225   :  { %1807 = vmatprep.mubr.bf16.mxu1 %v2073_v23  ;;  %2030 = vmatpush3.bf16.msra.mxu1 %v2027_v63 }
 0x226   :  { %2032 = vmatprep.subr.bf16.mxu1 %v2031_v3 }
 0x229   :  { %2034 = vmatpush3.bf16.msra.mxu1 %v2031_v3 }
 0x22a   :  { %2036 = vmatprep.subr.bf16.mxu1 %v2035_v7 }
 0x22c   :  { %1808 = vmatmul.mubr.bf16.gmra.mrb[20].mxu1 %v2074_v49 }
 0x22d   :  { %1811 = vmatprep.mubr.bf16.mxu1 %v2075_v51  ;;  %2038 = vmatpush3.bf16.msra.mxu1 %v2035_v7  ;;  %v2055_v7 = vpack.c.bf16 %v1222_v4, %v1221_v19 }
 0x22e   :  { %2040 = vmatprep.subr.bf16.mxu1 %v2039_v9 }
 0x231   :  { %2042 = vmatpush3.bf16.msra.mxu1 %v2039_v9 }
 0x232   :  { %2044 = vmatprep.subr.bf16.mxu1 %v2043_v13 }
 0x234   :  { %1812 = vmatmul.mubr.bf16.gmra.mrb[24].mxu1 %v2076_v39 }
 0x235   :  { %1815 = vmatprep.mubr.bf16.mxu1 %v2077_v33  ;;  %2046 = vmatpush3.bf16.msra.mxu1 %v2043_v13 }
 0x236   :  { %2048 = vmatprep.subr.bf16.mxu1 %v2047_v14 }
 0x239   :  { %2050 = vmatpush3.bf16.msra.mxu1 %v2047_v14 }
 0x23a   :  { %2052 = vmatprep.subr.bf16.mxu1 %v2051_v38 }
 0x23c   :  { %1816 = vmatmul.mubr.bf16.gmra.mrb[28].mxu1 %v2078_v53 }
 0x23d   :  { %2054 = vmatpush3.bf16.msra.mxu1 %v2051_v38 }
 0x23e   :  { %2056 = vmatprep.subr.bf16.mxu1 %v2055_v7 }
 0x241   :  { %2058 = vmatpush3.bf16.msra.mxu1 %v2055_v7 }
 0x2f7   :  { %v1805_v17 = vpop.f32.mrb[16].mxu1 }
 0x2f8   :  { %v813_v21 = vpop.f32.mrb[17].mxu1  ;;  %v963_v25 = vadd.f32 %v1805_v17, %v931_v36 }
 0x2f9   :  { %v961_v47 = vadd.f32 %v929_v16, %v813_v21  ;;  %v1806_v22 = vpop.f32.mrb[18].mxu1  ;;  %v2637_v16 = vld [vmem:[%s2807_s12] ss:$0 sm:$0xff] }
 0x2fa   :  { %v816_v34 = vpop.f32.mrb[19].mxu1  ;;  %v964_v27 = vadd.f32 %v1806_v22, %v932_v24 }
 0x2fb   :  { %v962_v43 = vadd.f32 %v930_v20, %v816_v34  ;;  %1851 = vmatprep.mubr.f32.mxu0 %v961_v47 }
 0x2fd   :  { %1852 = vmatmul.mubr.f32.vlgmr.msra.gmra.mrb[32].mxu0 %v962_v43 }
 0x2fe   :  { %1854 = vmatprep.mubr.f32.mxu0 %v963_v25 }
 0x2ff   :  { %v1809_v40 = vpop.f32.mrb[20].mxu1 }
 0x300   :  { %v829_v44 = vpop.f32.mrb[21].mxu1  ;;  %v967_v31 = vadd.f32 %v1809_v40, %v935_v41 }
 0x301   :  { %v965_v29 = vadd.f32 %v933_v26, %v829_v44  ;;  %v1810_v52 = vpop.f32.mrb[22].mxu1  ;;  %1855 = vmatmul.mubr.f32.gmra.mrb[34].mxu0 %v964_v27 }
 0x302   :  { %v832_v32 = vpop.f32.mrb[23].mxu1  ;;  %v968_v50 = vadd.f32 %v1810_v52, %v936_v45 }
 0x303   :  { %v966_v30 = vadd.f32 %v934_v28, %v832_v32  ;;  %1857 = vmatprep.mubr.f32.mxu0 %v965_v29 }
 0x305   :  { %1858 = vmatmul.mubr.f32.gmra.mrb[36].mxu0 %v966_v30 }
 0x306   :  { %1860 = vmatprep.mubr.f32.mxu0 %v967_v31 }
 0x307   :  { %v1813_v23 = vpop.f32.mrb[24].mxu1 }
 0x308   :  { %v845_v49 = vpop.f32.mrb[25].mxu1  ;;  %v971_v56 = vadd.f32 %v1813_v23, %v939_v59 }
 0x309   :  { %v969_v51 = vadd.f32 %v937_v54, %v845_v49  ;;  %v1814_v39 = vpop.f32.mrb[26].mxu1  ;;  %1861 = vmatmul.mubr.f32.gmra.mrb[38].mxu0 %v968_v50 }
 0x30a   :  { %v848_v33 = vpop.f32.mrb[27].mxu1  ;;  %v972_v57 = vadd.f32 %v1814_v39, %v940_v60 }
 0x30b   :  { %v970_v53 = vadd.f32 %v938_v55, %v848_v33  ;;  %1863 = vmatprep.mubr.f32.mxu0 %v969_v51 }
 0x30d   :  { %1864 = vmatmul.mubr.f32.gmra.mrb[40].mxu0 %v970_v53 }
 0x30e   :  { %1866 = vmatprep.mubr.f32.mxu0 %v971_v56 }
 0x30f   :  { %v1817_v58 = vpop.f32.mrb[28].mxu1 }
 0x310   :  { %v861_v61 = vpop.f32.mrb[29].mxu1  ;;  %v975_v3 = vadd.f32 %v1817_v58, %v943_v5 }
 0x311   :  { %v973_v62 = vadd.f32 %v941_v0, %v861_v61  ;;  %v1818_v42 = vpop.f32.mrb[30].mxu1  ;;  %1867 = vmatmul.mubr.f32.gmra.mrb[42].mxu0 %v972_v57 }
 0x312   :  { %v864_v63 = vpop.f32.mrb[31].mxu1  ;;  %v976_v10 = vadd.f32 %v1818_v42, %v944_v6 }
 0x313   :  { %v974_v2 = vadd.f32 %v942_v1, %v864_v63  ;;  %1869 = vmatprep.mubr.f32.mxu0 %v973_v62 }
 0x315   :  { %1870 = vmatmul.mubr.f32.gmra.mrb[44].mxu0 %v974_v2 }
 0x316   :  { %1872 = vmatprep.mubr.f32.mxu0 %v975_v3 }
 0x319   :  { %1873 = vmatmul.mubr.f32.gmra.mrb[46].mxu0 %v976_v10 }
 0x3d0   :  { %v1853_v37 = vpop.f32.mrb[32].mxu0 }
 0x3d1   :  { %v1072_v9 = vadd.f32 %v1853_v37, %v2624_v8  ;;  %v1066_v12 = vpop.f32.mrb[33].mxu0 }
 0x3d2   :  { %v1067_v13 = vadd.f32 %v2624_v8, %v1066_v12 }
 0x3d3   :  { %v1146_v35 = vmax.f32 %v1072_v9, 0.0 }
 0x3d4   :  { %v1145_v46 = vmax.f32 %v1067_v13, 0.0  ;;  %v1856_v14 = vpop.f32.mrb[34].mxu0 }
 0x3d5   :  { %v1169_v15 = vmul.f32 %v2630_v48, %v1146_v35  ;;  %v1082_v17 = vadd.f32 %v1856_v14, %v2624_v8  ;;  %v1076_v20 = vpop.f32.mrb[35].mxu0 }
 0x3d6   :  { %v1168_v36 = vmul.f32 %v2630_v48, %v1145_v46  ;;  %v1077_v21 = vadd.f32 %v2624_v8, %v1076_v20 }
 0x3d7   :  { %v1148_v47 = vmax.f32 %v1082_v17, 0.0  ;;  %v1192_v43 = vadd.f32 %v2637_v16, %v1169_v15 }
 0x3d8   :  { %v1147_v22 = vmax.f32 %v1077_v21, 0.0  ;;  %v1859_v34 = vpop.f32.mrb[36].mxu0  ;;  %v1191_v24 = vadd.f32 %v2637_v16, %v1168_v36 }
 0x3d9   :  { %v1171_v25 = vmul.f32 %v2630_v48, %v1148_v47  ;;  %v1092_v26 = vadd.f32 %v1859_v34, %v2624_v8  ;;  %v1086_v27 = vpop.f32.mrb[37].mxu0 }
 0x3da   :  { %v1170_v40 = vmul.f32 %v2630_v48, %v1147_v22  ;;  %v1087_v28 = vadd.f32 %v2624_v8, %v1086_v27  ;;  %1907 = vmatprep.mubr.f32.mxu1 %v1191_v24 }
 0x3db   :  { %v1150_v41 = vmax.f32 %v1092_v26, 0.0  ;;  %1908 = vmatmul.mubr.f32.vlgmr.msra.gmra.mrb[32].mxu1 %v1192_v43  ;;  %v1194_v31 = vadd.f32 %v2637_v16, %v1171_v25 }
 0x3dc   :  { %v1149_v44 = vmax.f32 %v1087_v28, 0.0  ;;  %v1862_v29 = vpop.f32.mrb[38].mxu0  ;;  %v1193_v52 = vadd.f32 %v2637_v16, %v1170_v40 }
 0x3dd   :  { %v1173_v32 = vmul.f32 %v2630_v48, %v1150_v41  ;;  %v1102_v45 = vadd.f32 %v1862_v29, %v2624_v8  ;;  %v1096_v30 = vpop.f32.mrb[39].mxu0 }
 0x3de   :  { %v1172_v54 = vmul.f32 %v2630_v48, %v1149_v44  ;;  %v1097_v50 = vadd.f32 %v2624_v8, %v1096_v30  ;;  %1910 = vmatprep.mubr.f32.mxu1 %v1193_v52 }
 0x3df   :  { %v1152_v23 = vmax.f32 %v1102_v45, 0.0  ;;  %1911 = vmatmul.mubr.f32.gmra.mrb[34].mxu1 %v1194_v31  ;;  %v1196_v60 = vadd.f32 %v2637_v16, %v1173_v32 }
 0x3e0   :  { %v1151_v55 = vmax.f32 %v1097_v50, 0.0  ;;  %v1865_v59 = vpop.f32.mrb[40].mxu0  ;;  %v1195_v49 = vadd.f32 %v2637_v16, %v1172_v54 }
 0x3e1   :  { %v1175_v51 = vmul.f32 %v2630_v48, %v1152_v23  ;;  %v1112_v39 = vadd.f32 %v1865_v59, %v2624_v8  ;;  %v1106_v33 = vpop.f32.mrb[41].mxu0 }
 0x3e2   :  { %v1174_v53 = vmul.f32 %v2630_v48, %v1151_v55  ;;  %v1107_v56 = vadd.f32 %v2624_v8, %v1106_v33  ;;  %1913 = vmatprep.mubr.f32.mxu1 %v1195_v49 }
 0x3e3   :  { %v1154_v0 = vmax.f32 %v1112_v39, 0.0  ;;  %1914 = vmatmul.mubr.f32.gmra.mrb[36].mxu1 %v1196_v60  ;;  %v1198_v42 = vadd.f32 %v2637_v16, %v1175_v51 }
 0x3e4   :  { %v1153_v57 = vmax.f32 %v1107_v56, 0.0  ;;  %v1868_v58 = vpop.f32.mrb[42].mxu0  ;;  %v1197_v1 = vadd.f32 %v2637_v16, %v1174_v53 }
 0x3e5   :  { %v1177_v5 = vmul.f32 %v2630_v48, %v1154_v0  ;;  %v1122_v61 = vadd.f32 %v1868_v58, %v2624_v8  ;;  %v1116_v62 = vpop.f32.mrb[43].mxu0 }
 0x3e6   :  { %v1176_v63 = vmul.f32 %v2630_v48, %v1153_v57  ;;  %v1117_v6 = vadd.f32 %v2624_v8, %v1116_v62  ;;  %1916 = vmatprep.mubr.f32.mxu1 %v1197_v1 }
 0x3e7   :  { %v1156_v2 = vmax.f32 %v1122_v61, 0.0  ;;  %1917 = vmatmul.mubr.f32.gmra.mrb[38].mxu1 %v1198_v42  ;;  %v1200_v4 = vadd.f32 %v2637_v16, %v1177_v5 }
 0x3e8   :  { %v1155_v3 = vmax.f32 %v1117_v6, 0.0  ;;  %v1871_v10 = vpop.f32.mrb[44].mxu0  ;;  %v1199_v11 = vadd.f32 %v2637_v16, %v1176_v63 }
 0x3e9   :  { %v1179_v18 = vmul.f32 %v2630_v48, %v1156_v2  ;;  %v1132_v38 = vadd.f32 %v1871_v10, %v2624_v8  ;;  %v1126_v19 = vpop.f32.mrb[45].mxu0 }
 0x3ea   :  { %v1178_v7 = vmul.f32 %v2630_v48, %v1155_v3  ;;  %v1127_v37 = vadd.f32 %v2624_v8, %v1126_v19  ;;  %1919 = vmatprep.mubr.f32.mxu1 %v1199_v11 }
 0x3eb   :  { %v1158_v9 = vmax.f32 %v1132_v38, 0.0  ;;  %1920 = vmatmul.mubr.f32.gmra.mrb[40].mxu1 %v1200_v4  ;;  %v1202_v17 = vadd.f32 %v2637_v16, %v1179_v18 }
 0x3ec   :  { %v1157_v12 = vmax.f32 %v1127_v37, 0.0  ;;  %v1874_v13 = vpop.f32.mrb[46].mxu0  ;;  %v1201_v35 = vadd.f32 %v2637_v16, %v1178_v7 }
 0x3ed   :  { %v1181_v46 = vmul.f32 %v2630_v48, %v1158_v9  ;;  %v1142_v14 = vadd.f32 %v1874_v13, %v2624_v8  ;;  %v1136_v15 = vpop.f32.mrb[47].mxu0 }
 0x3ee   :  { %v1180_v20 = vmul.f32 %v2630_v48, %v1157_v12  ;;  %v1137_v36 = vadd.f32 %v2624_v8, %v1136_v15  ;;  %1922 = vmatprep.mubr.f32.mxu1 %v1201_v35  ;;  %v2687_v8 = vld [vmem:[%s2809_s14] ss:$0 sm:$0xff] }
 0x3ef   :  { %v1160_v21 = vmax.f32 %v1142_v14, 0.0  ;;  %1923 = vmatmul.mubr.f32.gmra.mrb[42].mxu1 %v1202_v17  ;;  %v1204_v24 = vadd.f32 %v2637_v16, %v1181_v46 }
 0x3f0   :  { %v1159_v47 = vmax.f32 %v1137_v36, 0.0  ;;  %v1203_v22 = vadd.f32 %v2637_v16, %v1180_v20 }
 0x3f1   :  { %v1183_v34 = vmul.f32 %v2630_v48, %v1160_v21 }
 0x3f2   :  { %v1182_v43 = vmul.f32 %v2630_v48, %v1159_v47  ;;  %1925 = vmatprep.mubr.f32.mxu1 %v1203_v22  ;;  %v2693_v48 = vld [vmem:[%s2810_s15] ss:$0 sm:$0xff] }
 0x3f3   :  { %1926 = vmatmul.mubr.f32.gmra.mrb[44].mxu1 %v1204_v24  ;;  %v1206_v26 = vadd.f32 %v2637_v16, %v1183_v34 }
 0x3f4   :  { %v1205_v25 = vadd.f32 %v2637_v16, %v1182_v43  ;;  %v2699_v16 = vld [vmem:[%s2811_s16] ss:$0 sm:$0xff] }
 0x3f6   :  { %1928 = vmatprep.mubr.f32.mxu1 %v1205_v25 }
 0x3f7   :  { %1929 = vmatmul.mubr.f32.gmra.mrb[46].mxu1 %v1206_v26 }
 0x4ae   :  { %v1909_v27 = vpop.f32.mrb[32].mxu1 }
 0x4af   :  { %v1302_v40 = vadd.f32 %v1909_v27, %v2687_v8  ;;  %v1296_v28 = vpop.f32.mrb[33].mxu1 }
 0x4b0   :  { %v1297_v41 = vadd.f32 %v2687_v8, %v1296_v28 }
 0x4b1   :  { %v1376_v44 = vmax.f32 %v1302_v40, 0.0 }
 0x4b2   :  { %v1375_v29 = vmax.f32 %v1297_v41, 0.0  ;;  %v1912_v52 = vpop.f32.mrb[34].mxu1 }
 0x4b3   :  { %v1399_v32 = vmul.f32 %v2693_v48, %v1376_v44  ;;  %v1312_v45 = vadd.f32 %v1912_v52, %v2687_v8  ;;  %v1306_v30 = vpop.f32.mrb[35].mxu1 }
 0x4b4   :  { %v1398_v31 = vmul.f32 %v2693_v48, %v1375_v29  ;;  %v1307_v54 = vadd.f32 %v2687_v8, %v1306_v30 }
 0x4b5   :  { %v1422_v50 = vadd.f32 %v2699_v16, %v1399_v32  ;;  %v1378_v23 = vmax.f32 %v1312_v45, 0.0 }
 0x4b6   :  { %v1421_v55 = vadd.f32 %v2699_v16, %v1398_v31  ;;  %v1377_v59 = vmax.f32 %v1307_v54, 0.0  ;;  %v1915_v49 = vpop.f32.mrb[36].mxu1 }
 0x4b7   :  { %1438 = vst [vmem:[%s2812_s17 + $0x8] sm:$0xff] %v1422_v50  ;;  %v1401_v51 = vmul.f32 %v2693_v48, %v1378_v23  ;;  %v1322_v39 = vadd.f32 %v1915_v49, %v2687_v8  ;;  %v1316_v33 = vpop.f32.mrb[37].mxu1 }
 0x4b8   :  { %1437 = vst [vmem:[%s2812_s17] sm:$0xff] %v1421_v55  ;;  %v1400_v60 = vmul.f32 %v2693_v48, %v1377_v59  ;;  %v1317_v53 = vadd.f32 %v2687_v8, %v1316_v33 }
 0x4b9   :  { %v1424_v56 = vadd.f32 %v2699_v16, %v1401_v51  ;;  %v1380_v0 = vmax.f32 %v1322_v39, 0.0 }
 0x4ba   :  { %v1423_v57 = vadd.f32 %v2699_v16, %v1400_v60  ;;  %v1379_v58 = vmax.f32 %v1317_v53, 0.0  ;;  %v1918_v1 = vpop.f32.mrb[38].mxu1 }
 0x4bb   :  { %1440 = vst [vmem:[%s2812_s17 + $0x18] sm:$0xff] %v1424_v56  ;;  %v1403_v5 = vmul.f32 %v2693_v48, %v1380_v0  ;;  %v1332_v61 = vadd.f32 %v1918_v1, %v2687_v8  ;;  %v1326_v62 = vpop.f32.mrb[39].mxu1 }
 0x4bc   :  { %1439 = vst [vmem:[%s2812_s17 + $0x10] sm:$0xff] %v1423_v57  ;;  %v1402_v42 = vmul.f32 %v2693_v48, %v1379_v58  ;;  %v1327_v63 = vadd.f32 %v2687_v8, %v1326_v62 }
 0x4bd   :  { %v1426_v6 = vadd.f32 %v2699_v16, %v1403_v5  ;;  %v1382_v2 = vmax.f32 %v1332_v61, 0.0 }
 0x4be   :  { %v1425_v3 = vadd.f32 %v2699_v16, %v1402_v42  ;;  %v1381_v10 = vmax.f32 %v1327_v63, 0.0  ;;  %v1921_v11 = vpop.f32.mrb[40].mxu1 }
 0x4bf   :  { %1442 = vst [vmem:[%s2812_s17 + $0x28] sm:$0xff] %v1426_v6  ;;  %v1405_v18 = vmul.f32 %v2693_v48, %v1382_v2  ;;  %v1342_v38 = vadd.f32 %v1921_v11, %v2687_v8  ;;  %v1336_v19 = vpop.f32.mrb[41].mxu1 }
 0x4c0   :  { %1441 = vst [vmem:[%s2812_s17 + $0x20] sm:$0xff] %v1425_v3  ;;  %v1404_v4 = vmul.f32 %v2693_v48, %v1381_v10  ;;  %v1337_v7 = vadd.f32 %v2687_v8, %v1336_v19 }
 0x4c1   :  { %v1428_v37 = vadd.f32 %v2699_v16, %v1405_v18  ;;  %v1384_v9 = vmax.f32 %v1342_v38, 0.0 }
 0x4c2   :  { %v1427_v12 = vadd.f32 %v2699_v16, %v1404_v4  ;;  %v1383_v13 = vmax.f32 %v1337_v7, 0.0  ;;  %v1924_v35 = vpop.f32.mrb[42].mxu1 }
 0x4c3   :  { %1444 = vst [vmem:[%s2812_s17 + $0x38] sm:$0xff] %v1428_v37  ;;  %v1407_v46 = vmul.f32 %v2693_v48, %v1384_v9  ;;  %v1352_v14 = vadd.f32 %v1924_v35, %v2687_v8  ;;  %v1346_v15 = vpop.f32.mrb[43].mxu1 }
 0x4c4   :  { %1443 = vst [vmem:[%s2812_s17 + $0x30] sm:$0xff] %v1427_v12  ;;  %v1406_v17 = vmul.f32 %v2693_v48, %v1383_v13  ;;  %v1347_v20 = vadd.f32 %v2687_v8, %v1346_v15 }
 0x4c5   :  { %v1430_v36 = vadd.f32 %v2699_v16, %v1407_v46  ;;  %v1386_v21 = vmax.f32 %v1352_v14, 0.0 }
 0x4c6   :  { %v1429_v47 = vadd.f32 %v2699_v16, %v1406_v17  ;;  %v1385_v22 = vmax.f32 %v1347_v20, 0.0  ;;  %v1927_v34 = vpop.f32.mrb[44].mxu1 }
 0x4c7   :  { %1446 = vst [vmem:[%s2812_s17 + $0x48] sm:$0xff] %v1430_v36  ;;  %v1409_v24 = vmul.f32 %v2693_v48, %v1386_v21  ;;  %v1362_v43 = vadd.f32 %v1927_v34, %v2687_v8  ;;  %v1356_v25 = vpop.f32.mrb[45].mxu1 }
 0x4c8   :  { %1445 = vst [vmem:[%s2812_s17 + $0x40] sm:$0xff] %v1429_v47  ;;  %v1408_v26 = vmul.f32 %v2693_v48, %v1385_v22  ;;  %v1357_v27 = vadd.f32 %v2687_v8, %v1356_v25 }
 0x4c9   :  { %v1432_v40 = vadd.f32 %v2699_v16, %v1409_v24  ;;  %v1388_v28 = vmax.f32 %v1362_v43, 0.0 }
 0x4ca   :  { %v1431_v41 = vadd.f32 %v2699_v16, %v1408_v26  ;;  %v1387_v44 = vmax.f32 %v1357_v27, 0.0  ;;  %v1930_v29 = vpop.f32.mrb[46].mxu1 }
 0x4cb   :  { %1448 = vst [vmem:[%s2812_s17 + $0x58] sm:$0xff] %v1432_v40  ;;  %v1411_v52 = vmul.f32 %v2693_v48, %v1388_v28  ;;  %v1372_v32 = vadd.f32 %v1930_v29, %v2687_v8  ;;  %v1366_v45 = vpop.f32.mrb[47].mxu1 }
 0x4cc   :  { %1447 = vst [vmem:[%s2812_s17 + $0x50] sm:$0xff] %v1431_v41  ;;  %v1410_v30 = vmul.f32 %v2693_v48, %v1387_v44  ;;  %v1367_v31 = vadd.f32 %v2687_v8, %v1366_v45 }
 0x4cd   :  { %v1434_v54 = vadd.f32 %v2699_v16, %v1411_v52  ;;  %v1390_v50 = vmax.f32 %v1372_v32, 0.0 }
 0x4ce   :  { %v1433_v23 = vadd.f32 %v2699_v16, %v1410_v30  ;;  %v1389_v55 = vmax.f32 %v1367_v31, 0.0 }
 0x4cf   :  { %1450 = vst [vmem:[%s2812_s17 + $0x68] sm:$0xff] %v1434_v54  ;;  %v1413_v59 = vmul.f32 %v2693_v48, %v1390_v50 }
 0x4d0   :  { %1449 = vst [vmem:[%s2812_s17 + $0x60] sm:$0xff] %v1433_v23  ;;  %v1412_v49 = vmul.f32 %v2693_v48, %v1389_v55 }
 0x4d1   :  { %v1436_v8 = vadd.f32 %v2699_v16, %v1413_v59 }
 0x4d2   :  { %v1435_v51 = vadd.f32 %v2699_v16, %v1412_v49 }
 0x4d3   :  { %1452 = vst [vmem:[%s2812_s17 + $0x78] sm:$0xff] %v1436_v8 }
 0x4d4   :  { %1451 = vst [vmem:[%s2812_s17 + $0x70] sm:$0xff] %v1435_v51 }
 0x4d5   :  { %1457 = vsyncpa [#allocation5], 1 }
 0x4d6   :  { %1458 = vsyncpa [#allocation7], 1 }

</bundles_post_ra>
